<compile_context>
chip_gen: v5e
topology: v5e:2x2
jax: 0.10.0
libtpu: 0.0.40
codegen_flags: <defaults>
</compile_context>

<pallas_src>
import functools

import jax
import jax.numpy as jnp
import numpy as np
from jax.experimental import pallas as pl
from jax.experimental.pallas import tpu as pltpu

EPS = 1e-5        # PyTorch BatchNorm2d default eps
LANES = 128       # TPU vreg lane width
_BASE = 16        # scratch row offset of the padded image (aligned, >=1 guard row)


def _round_up(v, m):
    return (v + m - 1) // m * m


def _tap_conv(scratch, w_ref, base, H, W):
    """3x3 conv as 9 contiguous-slice MXU matmuls on the flat padded scratch.

    scratch row [base + p] holds the f32 activation at flat padded position
    p = r*(W+2) + c (r, c include the 1-pixel halo).  Output index q in
    [0, H*(W+2)) corresponds to padded position p = q + (W+2); entries with
    c in {0, W+1} are junk and are masked/discarded by the caller.
    Operands are cast to bf16 immediately before the dot; accumulation is f32.
    """
    wp2 = W + 2
    n_out = H * wp2
    acc = None
    for ky in range(3):
        for kx in range(3):
            off = base + wp2 + (ky - 1) * wp2 + (kx - 1)
            win = scratch[pl.ds(off, n_out), :]                       # (n_out, Cp) f32
            part = jnp.dot(win.astype(jnp.bfloat16), w_ref[ky * 3 + kx],
                           preferred_element_type=jnp.float32)        # MXU
            acc = part if acc is None else acc + part                 # no zero-init
    return acc                                                        # (n_out, Cp) f32


def _conv1_kernel(x_ref, s_ref, b_ref, mask_ref, w_ref, y_ref, scratch,
                  *, H, W, base):
    """y1 = conv1(relu(bn1(x))) for one image (flat padded layout)."""
    wp2 = W + 2
    P = (H + 2) * wp2
    ppad, cp = scratch.shape

    # Zero only the guard rows; the padded image (incl. its halo, zeroed by the
    # mask) is fully overwritten by the single contiguous activation store.
    scratch[pl.ds(0, base), :] = jnp.zeros((base, cp), scratch.dtype)
    scratch[pl.ds(base + P, ppad - base - P), :] = jnp.zeros(
        (ppad - base - P, cp), scratch.dtype)

    x = x_ref[0]                                                      # (P, Cp) f32
    act = jnp.maximum(x * s_ref[...] + b_ref[...], 0.0) * mask_ref[...]
    scratch[pl.ds(base, P), :] = act

    y_ref[0] = _tap_conv(scratch, w_ref, base, H, W)


def _conv2_kernel(y1_ref, x_ref, s_ref, b_ref, mask_ref, w_ref, o_ref, scratch,
                  *, H, W, base):
    """out = relu(conv2(relu(bn2(y1))) + x) for one image."""
    wp2 = W + 2
    n_rows = H * wp2
    lo = base + wp2                      # scratch row of the first real pixel row
    hi = lo + n_rows
    ppad, cp = scratch.shape

    # Zero halo rows + guards only; column halos are zeroed via mask_ref.
    scratch[pl.ds(0, lo), :] = jnp.zeros((lo, cp), scratch.dtype)
    scratch[pl.ds(hi, ppad - hi), :] = jnp.zeros((ppad - hi, cp), scratch.dtype)

    y1 = y1_ref[0]                                                    # (n_rows, Cp) f32
    act = jnp.maximum(y1 * s_ref[...] + b_ref[...], 0.0) * mask_ref[...]
    scratch[pl.ds(lo, n_rows), :] = act

    y2 = _tap_conv(scratch, w_ref, base, H, W)
    shortcut = x_ref[0, pl.ds(wp2, n_rows), :]        # original x, same positions
    o_ref[0] = jnp.maximum(y2 + shortcut, 0.0)


@jax.jit
def resblock_pallas(x_nchw, w1_oihw, w2_oihw, g1, b1, g2, b2):
    """Forward of the PyTorch ResBlock (training-mode BatchNorm), NCHW in/out."""
    N, C, H, W = x_nchw.shape
    Cout = w1_oihw.shape[0]
    if Cout != C:
        # TODO(synk): projection shortcut (1x1 conv + BN) for stride != 1 or
        # in_channels != out_channels is not implemented (not hit by defaults).
        raise NotImplementedError("identity-shortcut ResBlock only (C == Cout)")

    Cp = _round_up(C, LANES)             # lane-dense (128-multiple) channel dim
    wp2, hp2 = W + 2, H + 2
    P = hp2 * wp2                        # flat padded pixels per image
    n_rows = H * wp2                     # conv output positions computed per image
    base = _BASE
    ppad = _round_up(base + P + 8, 8)    # scratch rows incl. guard rows

    x_f32 = x_nchw.astype(jnp.float32)

    # ---- BN1: training-mode batch stats over (N,H,W); centered variance ----
    m1 = jnp.mean(x_f32, axis=(0, 2, 3))
    v1 = jnp.var(x_f32, axis=(0, 2, 3))
    s1 = g1.astype(jnp.float32) * jax.lax.rsqrt(v1 + EPS)
    t1 = b1.astype(jnp.float32) - m1 * s1
    s1p = jnp.zeros((1, Cp), jnp.float32).at[0, :C].set(s1)
    b1p = jnp.zeros((1, Cp), jnp.float32).at[0, :C].set(t1)

    # ---- layout prep (fused in this jit): NHWC, pad channels + halo, flatten ----
    x_nhwc = jnp.transpose(x_f32, (0, 2, 3, 1))
    x_pad = jnp.pad(x_nhwc, ((0, 0), (1, 1), (1, 1), (0, Cp - C)))
    x_flat = x_pad.reshape(N, P, Cp)

    def prep_w(w):                        # OIHW -> (9, Cp_in, Cp_out) bf16
        w_hwio = jnp.transpose(w.astype(jnp.float32), (2, 3, 1, 0))
        w_p = jnp.pad(w_hwio, ((0, 0), (0, 0), (0, Cp - C), (0, Cp - Cout)))
        return w_p.reshape(9, Cp, Cp).astype(jnp.bfloat16)

    w1p, w2p = prep_w(w1_oihw), prep_w(w2_oihw)

    mask2d = jnp.zeros((hp2, wp2), jnp.float32).at[1:H + 1, 1:W + 1].set(1.0)
    mask_full = mask2d.reshape(P, 1)                       # zero every halo position
    mask_col = mask2d[1:H + 1, :].reshape(n_rows, 1)       # zero halo columns only

    cparams = pltpu.CompilerParams(
        dimension_semantics=("parallel",),     # megacore: shard batch across TCs
        vmem_limit_bytes=48 * 1024 * 1024)     # budget fits v7x's 64 MiB VMEM

    # TODO(synk): for very large H*W, split each image into row blocks with a
    # 1-row halo; one image per grid step is sufficient at these sizes.

    conv1 = pl.pallas_call(
        functools.partial(_conv1_kernel, H=H, W=W, base=base),
        out_shape=jax.ShapeDtypeStruct((N, n_rows, Cp), jnp.float32),
        grid=(N,),
        in_specs=[
            pl.BlockSpec((1, P, Cp), lambda n: (n, 0, 0)),
            pl.BlockSpec((1, Cp), lambda n: (0, 0)),
            pl.BlockSpec((1, Cp), lambda n: (0, 0)),
            pl.BlockSpec((P, 1), lambda n: (0, 0)),
            pl.BlockSpec((9, Cp, Cp), lambda n: (0, 0, 0)),
        ],
        out_specs=pl.BlockSpec((1, n_rows, Cp), lambda n: (n, 0, 0)),
        scratch_shapes=[pltpu.VMEM((ppad, Cp), jnp.float32)],
        compiler_params=cparams,
    )
    y1 = conv1(x_flat, s1p, b1p, mask_full, w1p)

    # ---- BN2 stats from conv1 output (real pixels / real channels only) ----
    y1_img = y1.reshape(N, H, wp2, Cp)[:, :, 1:W + 1, :C]
    m2 = jnp.mean(y1_img, axis=(0, 1, 2))
    v2 = jnp.var(y1_img, axis=(0, 1, 2))
    s2 = g2.astype(jnp.float32) * jax.lax.rsqrt(v2 + EPS)
    t2 = b2.astype(jnp.float32) - m2 * s2
    s2p = jnp.zeros((1, Cp), jnp.float32).at[0, :C].set(s2)
    b2p = jnp.zeros((1, Cp), jnp.float32).at[0, :C].set(t2)

    conv2 = pl.pallas_call(
        functools.partial(_conv2_kernel, H=H, W=W, base=base),
        out_shape=jax.ShapeDtypeStruct((N, n_rows, Cp), jnp.float32),
        grid=(N,),
        in_specs=[
            pl.BlockSpec((1, n_rows, Cp), lambda n: (n, 0, 0)),
            pl.BlockSpec((1, P, Cp), lambda n: (n, 0, 0)),
            pl.BlockSpec((1, Cp), lambda n: (0, 0)),
            pl.BlockSpec((1, Cp), lambda n: (0, 0)),
            pl.BlockSpec((n_rows, 1), lambda n: (0, 0)),
            pl.BlockSpec((9, Cp, Cp), lambda n: (0, 0, 0)),
        ],
        out_specs=pl.BlockSpec((1, n_rows, Cp), lambda n: (n, 0, 0)),
        scratch_shapes=[pltpu.VMEM((ppad, Cp), jnp.float32)],
        compiler_params=cparams,
    )
    out_flat = conv2(y1, x_flat, s2p, b2p, mask_col, w2p)

    # Lane-dense kernel output; interior/channel extraction + NCHW is wrapper plumbing.
    out = out_flat.reshape(N, H, wp2, Cp)[:, :, 1:W + 1, :C]
    return jnp.transpose(out, (0, 3, 1, 2))


def resblock_ref(x, w1, w2, g1, b1, g2, b2):
    """Pure-JAX reference matching the PyTorch forward (training-mode BN)."""
    def bn_relu(v, g, b):
        m = v.mean(axis=(0, 2, 3), keepdims=True)
        var = v.var(axis=(0, 2, 3), keepdims=True)
        vn = (v - m) / jnp.sqrt(var + EPS)
        return jax.nn.relu(vn * g.reshape(1, -1, 1, 1) + b.reshape(1, -1, 1, 1))

    def conv(v, w):
        return jax.lax.conv_general_dilated(
            v, w, window_strides=(1, 1), padding=((1, 1), (1, 1)),
            dimension_numbers=("NCHW", "OIHW", "NCHW"))

    out = conv(bn_relu(x, g1, b1), w1)
    out = conv(bn_relu(out, g2, b2), w2)
    return jax.nn.relu(out + x)


if __name__ == "__main__":
    key = jax.random.PRNGKey(0)
    k1, k2, k3, k4, k5, k6 = jax.random.split(key, 6)
    N, C, H, W = 2, 4, 16, 16

    x = jax.random.normal(k1, (N, C, H, W), jnp.float32)
    w1 = 0.2 * jax.random.normal(k2, (C, C, 3, 3), jnp.float32)
    w2 = 0.2 * jax.random.normal(k3, (C, C, 3, 3), jnp.float32)
    g1 = 1.0 + 0.1 * jax.random.normal(k4, (C,), jnp.float32)
    b1 = 0.1 * jax.random.normal(k5, (C,), jnp.float32)
    g2 = 1.0 + 0.1 * jax.random.normal(k6, (C,), jnp.float32)
    b2 = 0.05 * jnp.ones((C,), jnp.float32)

    out = jax.block_until_ready(resblock_pallas(x, w1, w2, g1, b1, g2, b2))
    ref = resblock_ref(x, w1, w2, g1, b1, g2, b2)

    # MXU operands are bf16 (per v5e/v6e guidance) while the reference is pure
    # f32, so allow a few-percent tolerance.
    np.testing.assert_allclose(np.asarray(out), np.asarray(ref),
                               rtol=5e-2, atol=5e-2)
    print("KERNEL_OK")
</pallas_src>

<mosaic_0001>
module attributes {stable_mosaic.version = 11 : i64} {
  func.func @_conv1_kernel(%arg0: i32, %arg1: memref<1x324x128xf32, #tpu.memory_space<vmem>>, %arg2: memref<1x128xf32, #tpu.memory_space<vmem>>, %arg3: memref<1x128xf32, #tpu.memory_space<vmem>>, %arg4: memref<324x1xf32, #tpu.memory_space<vmem>>, %arg5: memref<9x128x128xbf16, #tpu.memory_space<vmem>>, %arg6: memref<1x288x128xf32, #tpu.memory_space<vmem>>, %arg7: memref<352x128xf32, #tpu.memory_space<vmem>>) attributes {dimension_semantics = [#tpu.dimension_semantics<parallel>], iteration_bounds = array<i64: 2>, scalar_prefetch = 0 : i64, scratch_operands = 1 : i64, tpu.core_type = #tpu.core_type<tc>, window_params = [{transform_indices = @transform_0, window_bounds = array<i64: 1, 324, 128>}, {pipeline_mode = #tpu.pipeline_mode<synchronous>, transform_indices = @transform_1, window_bounds = array<i64: 1, 128>}, {pipeline_mode = #tpu.pipeline_mode<synchronous>, transform_indices = @transform_2, window_bounds = array<i64: 1, 128>}, {pipeline_mode = #tpu.pipeline_mode<synchronous>, transform_indices = @transform_3, window_bounds = array<i64: 324, 1>}, {pipeline_mode = #tpu.pipeline_mode<synchronous>, transform_indices = @transform_4, window_bounds = array<i64: 9, 128, 128>}, {transform_indices = @transform_5, window_bounds = array<i64: 1, 288, 128>}]} {
    %cst = arith.constant 0.000000e+00 : f32
    %0 = vector.broadcast %cst : f32 to vector<16x128xf32>
    %c0 = arith.constant 0 : index
    %c0_0 = arith.constant 0 : index
    %1 = vector.load %arg7[%c0, %c0_0] : memref<352x128xf32, #tpu.memory_space<vmem>>, vector<16x128xf32>
    tpu.vector_store %arg7[%c0, %c0_0], %0 {strides = array<i32>} : memref<352x128xf32, #tpu.memory_space<vmem>>, vector<16x128xf32>,
    %cst_1 = arith.constant 0.000000e+00 : f32
    %2 = vector.broadcast %cst_1 : f32 to vector<12x128xf32>
    %c340 = arith.constant 340 : index
    %c0_2 = arith.constant 0 : index
    %3 = vector.load %arg7[%c340, %c0_2] : memref<352x128xf32, #tpu.memory_space<vmem>>, vector<12x128xf32>
    tpu.vector_store %arg7[%c340, %c0_2], %2 {strides = array<i32>} : memref<352x128xf32, #tpu.memory_space<vmem>>, vector<12x128xf32>,
    %c0_3 = arith.constant 0 : index
    %c0_4 = arith.constant 0 : index
    %c0_5 = arith.constant 0 : index
    %4 = vector.load %arg1[%c0_3, %c0_4, %c0_5] : memref<1x324x128xf32, #tpu.memory_space<vmem>>, vector<1x324x128xf32>
    %5 = vector.shape_cast %4 : vector<1x324x128xf32> to vector<324x128xf32>
    %c0_6 = arith.constant 0 : index
    %c0_7 = arith.constant 0 : index
    %6 = vector.load %arg2[%c0_6, %c0_7] : memref<1x128xf32, #tpu.memory_space<vmem>>, vector<1x128xf32>
    %7 = vector.broadcast %6 : vector<1x128xf32> to vector<324x128xf32>
    %8 = arith.mulf %5, %7 : vector<324x128xf32>
    %c0_8 = arith.constant 0 : index
    %c0_9 = arith.constant 0 : index
    %9 = vector.load %arg3[%c0_8, %c0_9] : memref<1x128xf32, #tpu.memory_space<vmem>>, vector<1x128xf32>
    %10 = vector.broadcast %9 : vector<1x128xf32> to vector<324x128xf32>
    %11 = arith.addf %8, %10 : vector<324x128xf32>
    %cst_10 = arith.constant 0.000000e+00 : f32
    %12 = vector.broadcast %cst_10 : f32 to vector<324x128xf32>
    %13 = arith.maximumf %11, %12 : vector<324x128xf32>
    %c0_11 = arith.constant 0 : index
    %c0_12 = arith.constant 0 : index
    %14 = vector.load %arg4[%c0_11, %c0_12] : memref<324x1xf32, #tpu.memory_space<vmem>>, vector<324x1xf32>
    %15 = vector.broadcast %14 : vector<324x1xf32> to vector<324x128xf32>
    %16 = arith.mulf %13, %15 : vector<324x128xf32>
    %c16 = arith.constant 16 : index
    %c0_13 = arith.constant 0 : index
    %17 = vector.load %arg7[%c16, %c0_13] : memref<352x128xf32, #tpu.memory_space<vmem>>, vector<324x128xf32>
    tpu.vector_store %arg7[%c16, %c0_13], %16 {strides = array<i32>} : memref<352x128xf32, #tpu.memory_space<vmem>>, vector<324x128xf32>,
    %c15 = arith.constant 15 : index
    %c0_14 = arith.constant 0 : index
    %18 = vector.load %arg7[%c15, %c0_14] : memref<352x128xf32, #tpu.memory_space<vmem>>, vector<288x128xf32>
    %19 = arith.truncf %18 : vector<288x128xf32> to vector<288x128xbf16>
    %c0_15 = arith.constant 0 : index
    %c0_16 = arith.constant 0 : index
    %c0_17 = arith.constant 0 : index
    %20 = vector.load %arg5[%c0_15, %c0_16, %c0_17] : memref<9x128x128xbf16, #tpu.memory_space<vmem>>, vector<1x128x128xbf16>
    %21 = vector.shape_cast %20 : vector<1x128x128xbf16> to vector<128x128xbf16>
    %cst_18 = arith.constant dense<0.000000e+00> : vector<288x128xf32>
    %22 = tpu.matmul %19, %21, %cst_18 {dimension_numbers = #tpu.dot_dimension_numbers<[1], [0], [0], [1], [0, 0, 1, 1], [], []>} : vector<288x128xbf16>, vector<128x128xbf16>, vector<288x128xf32> -> vector<288x128xf32>
    %c16_19 = arith.constant 16 : index
    %c0_20 = arith.constant 0 : index
    %23 = vector.load %arg7[%c16_19, %c0_20] : memref<352x128xf32, #tpu.memory_space<vmem>>, vector<288x128xf32>
    %24 = arith.truncf %23 : vector<288x128xf32> to vector<288x128xbf16>
    %c1 = arith.constant 1 : index
    %c0_21 = arith.constant 0 : index
    %c0_22 = arith.constant 0 : index
    %25 = vector.load %arg5[%c1, %c0_21, %c0_22] : memref<9x128x128xbf16, #tpu.memory_space<vmem>>, vector<1x128x128xbf16>
    %26 = vector.shape_cast %25 : vector<1x128x128xbf16> to vector<128x128xbf16>
    %cst_23 = arith.constant dense<0.000000e+00> : vector<288x128xf32>
    %27 = tpu.matmul %24, %26, %cst_23 {dimension_numbers = #tpu.dot_dimension_numbers<[1], [0], [0], [1], [0, 0, 1, 1], [], []>} : vector<288x128xbf16>, vector<128x128xbf16>, vector<288x128xf32> -> vector<288x128xf32>
    %28 = arith.addf %22, %27 : vector<288x128xf32>
    %c17 = arith.constant 17 : index
    %c0_24 = arith.constant 0 : index
    %29 = vector.load %arg7[%c17, %c0_24] : memref<352x128xf32, #tpu.memory_space<vmem>>, vector<288x128xf32>
    %30 = arith.truncf %29 : vector<288x128xf32> to vector<288x128xbf16>
    %c2 = arith.constant 2 : index
    %c0_25 = arith.constant 0 : index
    %c0_26 = arith.constant 0 : index
    %31 = vector.load %arg5[%c2, %c0_25, %c0_26] : memref<9x128x128xbf16, #tpu.memory_space<vmem>>, vector<1x128x128xbf16>
    %32 = vector.shape_cast %31 : vector<1x128x128xbf16> to vector<128x128xbf16>
    %cst_27 = arith.constant dense<0.000000e+00> : vector<288x128xf32>
    %33 = tpu.matmul %30, %32, %cst_27 {dimension_numbers = #tpu.dot_dimension_numbers<[1], [0], [0], [1], [0, 0, 1, 1], [], []>} : vector<288x128xbf16>, vector<128x128xbf16>, vector<288x128xf32> -> vector<288x128xf32>
    %34 = arith.addf %28, %33 : vector<288x128xf32>
    %c33 = arith.constant 33 : index
    %c0_28 = arith.constant 0 : index
    %35 = vector.load %arg7[%c33, %c0_28] : memref<352x128xf32, #tpu.memory_space<vmem>>, vector<288x128xf32>
    %36 = arith.truncf %35 : vector<288x128xf32> to vector<288x128xbf16>
    %c3 = arith.constant 3 : index
    %c0_29 = arith.constant 0 : index
    %c0_30 = arith.constant 0 : index
    %37 = vector.load %arg5[%c3, %c0_29, %c0_30] : memref<9x128x128xbf16, #tpu.memory_space<vmem>>, vector<1x128x128xbf16>
    %38 = vector.shape_cast %37 : vector<1x128x128xbf16> to vector<128x128xbf16>
    %cst_31 = arith.constant dense<0.000000e+00> : vector<288x128xf32>
    %39 = tpu.matmul %36, %38, %cst_31 {dimension_numbers = #tpu.dot_dimension_numbers<[1], [0], [0], [1], [0, 0, 1, 1], [], []>} : vector<288x128xbf16>, vector<128x128xbf16>, vector<288x128xf32> -> vector<288x128xf32>
    %40 = arith.addf %34, %39 : vector<288x128xf32>
    %c34 = arith.constant 34 : index
    %c0_32 = arith.constant 0 : index
    %41 = vector.load %arg7[%c34, %c0_32] : memref<352x128xf32, #tpu.memory_space<vmem>>, vector<288x128xf32>
    %42 = arith.truncf %41 : vector<288x128xf32> to vector<288x128xbf16>
    %c4 = arith.constant 4 : index
    %c0_33 = arith.constant 0 : index
    %c0_34 = arith.constant 0 : index
    %43 = vector.load %arg5[%c4, %c0_33, %c0_34] : memref<9x128x128xbf16, #tpu.memory_space<vmem>>, vector<1x128x128xbf16>
    %44 = vector.shape_cast %43 : vector<1x128x128xbf16> to vector<128x128xbf16>
    %cst_35 = arith.constant dense<0.000000e+00> : vector<288x128xf32>
    %45 = tpu.matmul %42, %44, %cst_35 {dimension_numbers = #tpu.dot_dimension_numbers<[1], [0], [0], [1], [0, 0, 1, 1], [], []>} : vector<288x128xbf16>, vector<128x128xbf16>, vector<288x128xf32> -> vector<288x128xf32>
    %46 = arith.addf %40, %45 : vector<288x128xf32>
    %c35 = arith.constant 35 : index
    %c0_36 = arith.constant 0 : index
    %47 = vector.load %arg7[%c35, %c0_36] : memref<352x128xf32, #tpu.memory_space<vmem>>, vector<288x128xf32>
    %48 = arith.truncf %47 : vector<288x128xf32> to vector<288x128xbf16>
    %c5 = arith.constant 5 : index
    %c0_37 = arith.constant 0 : index
    %c0_38 = arith.constant 0 : index
    %49 = vector.load %arg5[%c5, %c0_37, %c0_38] : memref<9x128x128xbf16, #tpu.memory_space<vmem>>, vector<1x128x128xbf16>
    %50 = vector.shape_cast %49 : vector<1x128x128xbf16> to vector<128x128xbf16>
    %cst_39 = arith.constant dense<0.000000e+00> : vector<288x128xf32>
    %51 = tpu.matmul %48, %50, %cst_39 {dimension_numbers = #tpu.dot_dimension_numbers<[1], [0], [0], [1], [0, 0, 1, 1], [], []>} : vector<288x128xbf16>, vector<128x128xbf16>, vector<288x128xf32> -> vector<288x128xf32>
    %52 = arith.addf %46, %51 : vector<288x128xf32>
    %c51 = arith.constant 51 : index
    %c0_40 = arith.constant 0 : index
    %53 = vector.load %arg7[%c51, %c0_40] : memref<352x128xf32, #tpu.memory_space<vmem>>, vector<288x128xf32>
    %54 = arith.truncf %53 : vector<288x128xf32> to vector<288x128xbf16>
    %c6 = arith.constant 6 : index
    %c0_41 = arith.constant 0 : index
    %c0_42 = arith.constant 0 : index
    %55 = vector.load %arg5[%c6, %c0_41, %c0_42] : memref<9x128x128xbf16, #tpu.memory_space<vmem>>, vector<1x128x128xbf16>
    %56 = vector.shape_cast %55 : vector<1x128x128xbf16> to vector<128x128xbf16>
    %cst_43 = arith.constant dense<0.000000e+00> : vector<288x128xf32>
    %57 = tpu.matmul %54, %56, %cst_43 {dimension_numbers = #tpu.dot_dimension_numbers<[1], [0], [0], [1], [0, 0, 1, 1], [], []>} : vector<288x128xbf16>, vector<128x128xbf16>, vector<288x128xf32> -> vector<288x128xf32>
    %58 = arith.addf %52, %57 : vector<288x128xf32>
    %c52 = arith.constant 52 : index
    %c0_44 = arith.constant 0 : index
    %59 = vector.load %arg7[%c52, %c0_44] : memref<352x128xf32, #tpu.memory_space<vmem>>, vector<288x128xf32>
    %60 = arith.truncf %59 : vector<288x128xf32> to vector<288x128xbf16>
    %c7 = arith.constant 7 : index
    %c0_45 = arith.constant 0 : index
    %c0_46 = arith.constant 0 : index
    %61 = vector.load %arg5[%c7, %c0_45, %c0_46] : memref<9x128x128xbf16, #tpu.memory_space<vmem>>, vector<1x128x128xbf16>
    %62 = vector.shape_cast %61 : vector<1x128x128xbf16> to vector<128x128xbf16>
    %cst_47 = arith.constant dense<0.000000e+00> : vector<288x128xf32>
    %63 = tpu.matmul %60, %62, %cst_47 {dimension_numbers = #tpu.dot_dimension_numbers<[1], [0], [0], [1], [0, 0, 1, 1], [], []>} : vector<288x128xbf16>, vector<128x128xbf16>, vector<288x128xf32> -> vector<288x128xf32>
    %64 = arith.addf %58, %63 : vector<288x128xf32>
    %c53 = arith.constant 53 : index
    %c0_48 = arith.constant 0 : index
    %65 = vector.load %arg7[%c53, %c0_48] : memref<352x128xf32, #tpu.memory_space<vmem>>, vector<288x128xf32>
    %66 = arith.truncf %65 : vector<288x128xf32> to vector<288x128xbf16>
    %c8 = arith.constant 8 : index
    %c0_49 = arith.constant 0 : index
    %c0_50 = arith.constant 0 : index
    %67 = vector.load %arg5[%c8, %c0_49, %c0_50] : memref<9x128x128xbf16, #tpu.memory_space<vmem>>, vector<1x128x128xbf16>
    %68 = vector.shape_cast %67 : vector<1x128x128xbf16> to vector<128x128xbf16>
    %cst_51 = arith.constant dense<0.000000e+00> : vector<288x128xf32>
    %69 = tpu.matmul %66, %68, %cst_51 {dimension_numbers = #tpu.dot_dimension_numbers<[1], [0], [0], [1], [0, 0, 1, 1], [], []>} : vector<288x128xbf16>, vector<128x128xbf16>, vector<288x128xf32> -> vector<288x128xf32>
    %70 = arith.addf %64, %69 : vector<288x128xf32>
    %c0_52 = arith.constant 0 : index
    %c0_53 = arith.constant 0 : index
    %c0_54 = arith.constant 0 : index
    %71 = vector.load %arg6[%c0_52, %c0_53, %c0_54] : memref<1x288x128xf32, #tpu.memory_space<vmem>>, vector<1x288x128xf32>
    %72 = vector.shape_cast %71 : vector<1x288x128xf32> to vector<288x128xf32>
    %73 = vector.shape_cast %70 : vector<288x128xf32> to vector<1x288x128xf32>
    tpu.vector_store %arg6[%c0_52, %c0_53, %c0_54], %73 {strides = array<i32>} : memref<1x288x128xf32, #tpu.memory_space<vmem>>, vector<1x288x128xf32>,
    return
  }
  func.func @transform_0(%arg0: i32) -> (i32, i32, i32) {
    %c0_i32 = arith.constant 0 : i32
    %c0_i32_0 = arith.constant 0 : i32
    %c0_i32_1 = arith.constant 0 : i32
    return %arg0, %c0_i32, %c0_i32_0 : i32, i32, i32
  }
  func.func @transform_1(%arg0: i32) -> (i32, i32) {
    %c0_i32 = arith.constant 0 : i32
    %c0_i32_0 = arith.constant 0 : i32
    %c0_i32_1 = arith.constant 0 : i32
    return %c0_i32, %c0_i32_0 : i32, i32
  }
  func.func @transform_2(%arg0: i32) -> (i32, i32) {
    %c0_i32 = arith.constant 0 : i32
    %c0_i32_0 = arith.constant 0 : i32
    %c0_i32_1 = arith.constant 0 : i32
    return %c0_i32, %c0_i32_0 : i32, i32
  }
  func.func @transform_3(%arg0: i32) -> (i32, i32) {
    %c0_i32 = arith.constant 0 : i32
    %c0_i32_0 = arith.constant 0 : i32
    %c0_i32_1 = arith.constant 0 : i32
    return %c0_i32, %c0_i32_0 : i32, i32
  }
  func.func @transform_4(%arg0: i32) -> (i32, i32, i32) {
    %c0_i32 = arith.constant 0 : i32
    %c0_i32_0 = arith.constant 0 : i32
    %c0_i32_1 = arith.constant 0 : i32
    %c0_i32_2 = arith.constant 0 : i32
    return %c0_i32, %c0_i32_0, %c0_i32_1 : i32, i32, i32
  }
  func.func @transform_5(%arg0: i32) -> (i32, i32, i32) {
    %c0_i32 = arith.constant 0 : i32
    %c0_i32_0 = arith.constant 0 : i32
    %c0_i32_1 = arith.constant 0 : i32
    return %arg0, %c0_i32, %c0_i32_0 : i32, i32, i32
  }
}

module attributes {stable_mosaic.version = 11 : i64} {
  func.func @_conv2_kernel(%arg0: i32, %arg1: memref<1x288x128xf32, #tpu.memory_space<vmem>>, %arg2: memref<1x324x128xf32, #tpu.memory_space<vmem>>, %arg3: memref<1x128xf32, #tpu.memory_space<vmem>>, %arg4: memref<1x128xf32, #tpu.memory_space<vmem>>, %arg5: memref<288x1xf32, #tpu.memory_space<vmem>>, %arg6: memref<9x128x128xbf16, #tpu.memory_space<vmem>>, %arg7: memref<1x288x128xf32, #tpu.memory_space<vmem>>, %arg8: memref<352x128xf32, #tpu.memory_space<vmem>>) attributes {dimension_semantics = [#tpu.dimension_semantics<parallel>], iteration_bounds = array<i64: 2>, scalar_prefetch = 0 : i64, scratch_operands = 1 : i64, tpu.core_type = #tpu.core_type<tc>, window_params = [{transform_indices = @transform_0, window_bounds = array<i64: 1, 288, 128>}, {transform_indices = @transform_1, window_bounds = array<i64: 1, 324, 128>}, {pipeline_mode = #tpu.pipeline_mode<synchronous>, transform_indices = @transform_2, window_bounds = array<i64: 1, 128>}, {pipeline_mode = #tpu.pipeline_mode<synchronous>, transform_indices = @transform_3, window_bounds = array<i64: 1, 128>}, {pipeline_mode = #tpu.pipeline_mode<synchronous>, transform_indices = @transform_4, window_bounds = array<i64: 288, 1>}, {pipeline_mode = #tpu.pipeline_mode<synchronous>, transform_indices = @transform_5, window_bounds = array<i64: 9, 128, 128>}, {transform_indices = @transform_6, window_bounds = array<i64: 1, 288, 128>}]} {
    %cst = arith.constant 0.000000e+00 : f32
    %0 = vector.broadcast %cst : f32 to vector<34x128xf32>
    %c0 = arith.constant 0 : index
    %c0_0 = arith.constant 0 : index
    %1 = vector.load %arg8[%c0, %c0_0] : memref<352x128xf32, #tpu.memory_space<vmem>>, vector<34x128xf32>
    tpu.vector_store %arg8[%c0, %c0_0], %0 {strides = array<i32>} : memref<352x128xf32, #tpu.memory_space<vmem>>, vector<34x128xf32>,
    %cst_1 = arith.constant 0.000000e+00 : f32
    %2 = vector.broadcast %cst_1 : f32 to vector<30x128xf32>
    %c322 = arith.constant 322 : index
    %c0_2 = arith.constant 0 : index
    %3 = vector.load %arg8[%c322, %c0_2] : memref<352x128xf32, #tpu.memory_space<vmem>>, vector<30x128xf32>
    tpu.vector_store %arg8[%c322, %c0_2], %2 {strides = array<i32>} : memref<352x128xf32, #tpu.memory_space<vmem>>, vector<30x128xf32>,
    %c0_3 = arith.constant 0 : index
    %c0_4 = arith.constant 0 : index
    %c0_5 = arith.constant 0 : index
    %4 = vector.load %arg1[%c0_3, %c0_4, %c0_5] : memref<1x288x128xf32, #tpu.memory_space<vmem>>, vector<1x288x128xf32>
    %5 = vector.shape_cast %4 : vector<1x288x128xf32> to vector<288x128xf32>
    %c0_6 = arith.constant 0 : index
    %c0_7 = arith.constant 0 : index
    %6 = vector.load %arg3[%c0_6, %c0_7] : memref<1x128xf32, #tpu.memory_space<vmem>>, vector<1x128xf32>
    %7 = vector.broadcast %6 : vector<1x128xf32> to vector<288x128xf32>
    %8 = arith.mulf %5, %7 : vector<288x128xf32>
    %c0_8 = arith.constant 0 : index
    %c0_9 = arith.constant 0 : index
    %9 = vector.load %arg4[%c0_8, %c0_9] : memref<1x128xf32, #tpu.memory_space<vmem>>, vector<1x128xf32>
    %10 = vector.broadcast %9 : vector<1x128xf32> to vector<288x128xf32>
    %11 = arith.addf %8, %10 : vector<288x128xf32>
    %cst_10 = arith.constant 0.000000e+00 : f32
    %12 = vector.broadcast %cst_10 : f32 to vector<288x128xf32>
    %13 = arith.maximumf %11, %12 : vector<288x128xf32>
    %c0_11 = arith.constant 0 : index
    %c0_12 = arith.constant 0 : index
    %14 = vector.load %arg5[%c0_11, %c0_12] : memref<288x1xf32, #tpu.memory_space<vmem>>, vector<288x1xf32>
    %15 = vector.broadcast %14 : vector<288x1xf32> to vector<288x128xf32>
    %16 = arith.mulf %13, %15 : vector<288x128xf32>
    %c34 = arith.constant 34 : index
    %c0_13 = arith.constant 0 : index
    %17 = vector.load %arg8[%c34, %c0_13] : memref<352x128xf32, #tpu.memory_space<vmem>>, vector<288x128xf32>
    tpu.vector_store %arg8[%c34, %c0_13], %16 {strides = array<i32>} : memref<352x128xf32, #tpu.memory_space<vmem>>, vector<288x128xf32>,
    %c15 = arith.constant 15 : index
    %c0_14 = arith.constant 0 : index
    %18 = vector.load %arg8[%c15, %c0_14] : memref<352x128xf32, #tpu.memory_space<vmem>>, vector<288x128xf32>
    %19 = arith.truncf %18 : vector<288x128xf32> to vector<288x128xbf16>
    %c0_15 = arith.constant 0 : index
    %c0_16 = arith.constant 0 : index
    %c0_17 = arith.constant 0 : index
    %20 = vector.load %arg6[%c0_15, %c0_16, %c0_17] : memref<9x128x128xbf16, #tpu.memory_space<vmem>>, vector<1x128x128xbf16>
    %21 = vector.shape_cast %20 : vector<1x128x128xbf16> to vector<128x128xbf16>
    %cst_18 = arith.constant dense<0.000000e+00> : vector<288x128xf32>
    %22 = tpu.matmul %19, %21, %cst_18 {dimension_numbers = #tpu.dot_dimension_numbers<[1], [0], [0], [1], [0, 0, 1, 1], [], []>} : vector<288x128xbf16>, vector<128x128xbf16>, vector<288x128xf32> -> vector<288x128xf32>
    %c16 = arith.constant 16 : index
    %c0_19 = arith.constant 0 : index
    %23 = vector.load %arg8[%c16, %c0_19] : memref<352x128xf32, #tpu.memory_space<vmem>>, vector<288x128xf32>
    %24 = arith.truncf %23 : vector<288x128xf32> to vector<288x128xbf16>
    %c1 = arith.constant 1 : index
    %c0_20 = arith.constant 0 : index
    %c0_21 = arith.constant 0 : index
    %25 = vector.load %arg6[%c1, %c0_20, %c0_21] : memref<9x128x128xbf16, #tpu.memory_space<vmem>>, vector<1x128x128xbf16>
    %26 = vector.shape_cast %25 : vector<1x128x128xbf16> to vector<128x128xbf16>
    %cst_22 = arith.constant dense<0.000000e+00> : vector<288x128xf32>
    %27 = tpu.matmul %24, %26, %cst_22 {dimension_numbers = #tpu.dot_dimension_numbers<[1], [0], [0], [1], [0, 0, 1, 1], [], []>} : vector<288x128xbf16>, vector<128x128xbf16>, vector<288x128xf32> -> vector<288x128xf32>
    %28 = arith.addf %22, %27 : vector<288x128xf32>
    %c17 = arith.constant 17 : index
    %c0_23 = arith.constant 0 : index
    %29 = vector.load %arg8[%c17, %c0_23] : memref<352x128xf32, #tpu.memory_space<vmem>>, vector<288x128xf32>
    %30 = arith.truncf %29 : vector<288x128xf32> to vector<288x128xbf16>
    %c2 = arith.constant 2 : index
    %c0_24 = arith.constant 0 : index
    %c0_25 = arith.constant 0 : index
    %31 = vector.load %arg6[%c2, %c0_24, %c0_25] : memref<9x128x128xbf16, #tpu.memory_space<vmem>>, vector<1x128x128xbf16>
    %32 = vector.shape_cast %31 : vector<1x128x128xbf16> to vector<128x128xbf16>
    %cst_26 = arith.constant dense<0.000000e+00> : vector<288x128xf32>
    %33 = tpu.matmul %30, %32, %cst_26 {dimension_numbers = #tpu.dot_dimension_numbers<[1], [0], [0], [1], [0, 0, 1, 1], [], []>} : vector<288x128xbf16>, vector<128x128xbf16>, vector<288x128xf32> -> vector<288x128xf32>
    %34 = arith.addf %28, %33 : vector<288x128xf32>
    %c33 = arith.constant 33 : index
    %c0_27 = arith.constant 0 : index
    %35 = vector.load %arg8[%c33, %c0_27] : memref<352x128xf32, #tpu.memory_space<vmem>>, vector<288x128xf32>
    %36 = arith.truncf %35 : vector<288x128xf32> to vector<288x128xbf16>
    %c3 = arith.constant 3 : index
    %c0_28 = arith.constant 0 : index
    %c0_29 = arith.constant 0 : index
    %37 = vector.load %arg6[%c3, %c0_28, %c0_29] : memref<9x128x128xbf16, #tpu.memory_space<vmem>>, vector<1x128x128xbf16>
    %38 = vector.shape_cast %37 : vector<1x128x128xbf16> to vector<128x128xbf16>
    %cst_30 = arith.constant dense<0.000000e+00> : vector<288x128xf32>
    %39 = tpu.matmul %36, %38, %cst_30 {dimension_numbers = #tpu.dot_dimension_numbers<[1], [0], [0], [1], [0, 0, 1, 1], [], []>} : vector<288x128xbf16>, vector<128x128xbf16>, vector<288x128xf32> -> vector<288x128xf32>
    %40 = arith.addf %34, %39 : vector<288x128xf32>
    %c34_31 = arith.constant 34 : index
    %c0_32 = arith.constant 0 : index
    %41 = vector.load %arg8[%c34_31, %c0_32] : memref<352x128xf32, #tpu.memory_space<vmem>>, vector<288x128xf32>
    %42 = arith.truncf %41 : vector<288x128xf32> to vector<288x128xbf16>
    %c4 = arith.constant 4 : index
    %c0_33 = arith.constant 0 : index
    %c0_34 = arith.constant 0 : index
    %43 = vector.load %arg6[%c4, %c0_33, %c0_34] : memref<9x128x128xbf16, #tpu.memory_space<vmem>>, vector<1x128x128xbf16>
    %44 = vector.shape_cast %43 : vector<1x128x128xbf16> to vector<128x128xbf16>
    %cst_35 = arith.constant dense<0.000000e+00> : vector<288x128xf32>
    %45 = tpu.matmul %42, %44, %cst_35 {dimension_numbers = #tpu.dot_dimension_numbers<[1], [0], [0], [1], [0, 0, 1, 1], [], []>} : vector<288x128xbf16>, vector<128x128xbf16>, vector<288x128xf32> -> vector<288x128xf32>
    %46 = arith.addf %40, %45 : vector<288x128xf32>
    %c35 = arith.constant 35 : index
    %c0_36 = arith.constant 0 : index
    %47 = vector.load %arg8[%c35, %c0_36] : memref<352x128xf32, #tpu.memory_space<vmem>>, vector<288x128xf32>
    %48 = arith.truncf %47 : vector<288x128xf32> to vector<288x128xbf16>
    %c5 = arith.constant 5 : index
    %c0_37 = arith.constant 0 : index
    %c0_38 = arith.constant 0 : index
    %49 = vector.load %arg6[%c5, %c0_37, %c0_38] : memref<9x128x128xbf16, #tpu.memory_space<vmem>>, vector<1x128x128xbf16>
    %50 = vector.shape_cast %49 : vector<1x128x128xbf16> to vector<128x128xbf16>
    %cst_39 = arith.constant dense<0.000000e+00> : vector<288x128xf32>
    %51 = tpu.matmul %48, %50, %cst_39 {dimension_numbers = #tpu.dot_dimension_numbers<[1], [0], [0], [1], [0, 0, 1, 1], [], []>} : vector<288x128xbf16>, vector<128x128xbf16>, vector<288x128xf32> -> vector<288x128xf32>
    %52 = arith.addf %46, %51 : vector<288x128xf32>
    %c51 = arith.constant 51 : index
    %c0_40 = arith.constant 0 : index
    %53 = vector.load %arg8[%c51, %c0_40] : memref<352x128xf32, #tpu.memory_space<vmem>>, vector<288x128xf32>
    %54 = arith.truncf %53 : vector<288x128xf32> to vector<288x128xbf16>
    %c6 = arith.constant 6 : index
    %c0_41 = arith.constant 0 : index
    %c0_42 = arith.constant 0 : index
    %55 = vector.load %arg6[%c6, %c0_41, %c0_42] : memref<9x128x128xbf16, #tpu.memory_space<vmem>>, vector<1x128x128xbf16>
    %56 = vector.shape_cast %55 : vector<1x128x128xbf16> to vector<128x128xbf16>
    %cst_43 = arith.constant dense<0.000000e+00> : vector<288x128xf32>
    %57 = tpu.matmul %54, %56, %cst_43 {dimension_numbers = #tpu.dot_dimension_numbers<[1], [0], [0], [1], [0, 0, 1, 1], [], []>} : vector<288x128xbf16>, vector<128x128xbf16>, vector<288x128xf32> -> vector<288x128xf32>
    %58 = arith.addf %52, %57 : vector<288x128xf32>
    %c52 = arith.constant 52 : index
    %c0_44 = arith.constant 0 : index
    %59 = vector.load %arg8[%c52, %c0_44] : memref<352x128xf32, #tpu.memory_space<vmem>>, vector<288x128xf32>
    %60 = arith.truncf %59 : vector<288x128xf32> to vector<288x128xbf16>
    %c7 = arith.constant 7 : index
    %c0_45 = arith.constant 0 : index
    %c0_46 = arith.constant 0 : index
    %61 = vector.load %arg6[%c7, %c0_45, %c0_46] : memref<9x128x128xbf16, #tpu.memory_space<vmem>>, vector<1x128x128xbf16>
    %62 = vector.shape_cast %61 : vector<1x128x128xbf16> to vector<128x128xbf16>
    %cst_47 = arith.constant dense<0.000000e+00> : vector<288x128xf32>
    %63 = tpu.matmul %60, %62, %cst_47 {dimension_numbers = #tpu.dot_dimension_numbers<[1], [0], [0], [1], [0, 0, 1, 1], [], []>} : vector<288x128xbf16>, vector<128x128xbf16>, vector<288x128xf32> -> vector<288x128xf32>
    %64 = arith.addf %58, %63 : vector<288x128xf32>
    %c53 = arith.constant 53 : index
    %c0_48 = arith.constant 0 : index
    %65 = vector.load %arg8[%c53, %c0_48] : memref<352x128xf32, #tpu.memory_space<vmem>>, vector<288x128xf32>
    %66 = arith.truncf %65 : vector<288x128xf32> to vector<288x128xbf16>
    %c8 = arith.constant 8 : index
    %c0_49 = arith.constant 0 : index
    %c0_50 = arith.constant 0 : index
    %67 = vector.load %arg6[%c8, %c0_49, %c0_50] : memref<9x128x128xbf16, #tpu.memory_space<vmem>>, vector<1x128x128xbf16>
    %68 = vector.shape_cast %67 : vector<1x128x128xbf16> to vector<128x128xbf16>
    %cst_51 = arith.constant dense<0.000000e+00> : vector<288x128xf32>
    %69 = tpu.matmul %66, %68, %cst_51 {dimension_numbers = #tpu.dot_dimension_numbers<[1], [0], [0], [1], [0, 0, 1, 1], [], []>} : vector<288x128xbf16>, vector<128x128xbf16>, vector<288x128xf32> -> vector<288x128xf32>
    %70 = arith.addf %64, %69 : vector<288x128xf32>
    %c0_52 = arith.constant 0 : index
    %c18 = arith.constant 18 : index
    %c0_53 = arith.constant 0 : index
    %71 = vector.load %arg2[%c0_52, %c18, %c0_53] : memref<1x324x128xf32, #tpu.memory_space<vmem>>, vector<1x288x128xf32>
    %72 = vector.shape_cast %71 : vector<1x288x128xf32> to vector<288x128xf32>
    %73 = arith.addf %70, %72 : vector<288x128xf32>
    %cst_54 = arith.constant 0.000000e+00 : f32
    %74 = vector.broadcast %cst_54 : f32 to vector<288x128xf32>
    %75 = arith.maximumf %73, %74 : vector<288x128xf32>
    %c0_55 = arith.constant 0 : index
    %c0_56 = arith.constant 0 : index
    %c0_57 = arith.constant 0 : index
    %76 = vector.load %arg7[%c0_55, %c0_56, %c0_57] : memref<1x288x128xf32, #tpu.memory_space<vmem>>, vector<1x288x128xf32>
    %77 = vector.shape_cast %76 : vector<1x288x128xf32> to vector<288x128xf32>
    %78 = vector.shape_cast %75 : vector<288x128xf32> to vector<1x288x128xf32>
    tpu.vector_store %arg7[%c0_55, %c0_56, %c0_57], %78 {strides = array<i32>} : memref<1x288x128xf32, #tpu.memory_space<vmem>>, vector<1x288x128xf32>,
    return
  }
  func.func @transform_0(%arg0: i32) -> (i32, i32, i32) {
    %c0_i32 = arith.constant 0 : i32
    %c0_i32_0 = arith.constant 0 : i32
    %c0_i32_1 = arith.constant 0 : i32
    return %arg0, %c0_i32, %c0_i32_0 : i32, i32, i32
  }
  func.func @transform_1(%arg0: i32) -> (i32, i32, i32) {
    %c0_i32 = arith.constant 0 : i32
    %c0_i32_0 = arith.constant 0 : i32
    %c0_i32_1 = arith.constant 0 : i32
    return %arg0, %c0_i32, %c0_i32_0 : i32, i32, i32
  }
  func.func @transform_2(%arg0: i32) -> (i32, i32) {
    %c0_i32 = arith.constant 0 : i32
    %c0_i32_0 = arith.constant 0 : i32
    %c0_i32_1 = arith.constant 0 : i32
    return %c0_i32, %c0_i32_0 : i32, i32
  }
  func.func @transform_3(%arg0: i32) -> (i32, i32) {
    %c0_i32 = arith.constant 0 : i32
    %c0_i32_0 = arith.constant 0 : i32
    %c0_i32_1 = arith.constant 0 : i32
    return %c0_i32, %c0_i32_0 : i32, i32
  }
  func.func @transform_4(%arg0: i32) -> (i32, i32) {
    %c0_i32 = arith.constant 0 : i32
    %c0_i32_0 = arith.constant 0 : i32
    %c0_i32_1 = arith.constant 0 : i32
    return %c0_i32, %c0_i32_0 : i32, i32
  }
  func.func @transform_5(%arg0: i32) -> (i32, i32, i32) {
    %c0_i32 = arith.constant 0 : i32
    %c0_i32_0 = arith.constant 0 : i32
    %c0_i32_1 = arith.constant 0 : i32
    %c0_i32_2 = arith.constant 0 : i32
    return %c0_i32, %c0_i32_0, %c0_i32_1 : i32, i32, i32
  }
  func.func @transform_6(%arg0: i32) -> (i32, i32, i32) {
    %c0_i32 = arith.constant 0 : i32
    %c0_i32_0 = arith.constant 0 : i32
    %c0_i32_1 = arith.constant 0 : i32
    return %arg0, %c0_i32, %c0_i32_0 : i32, i32, i32
  }
}

</mosaic_0001>

<bundles_post_ra>
// kernel: resblock_pallas.2
= control target key start
LH: loop header
LB: loop body
LE: loop exit
PB: predicated region body
PF: predicated region fallthrough
CT: control target
= control target key end

     0   :  { %s3611_s18 = smov 0   ;;  %s4440_s0 = inlined_call_operand.vmem [shape: f32[2,324,128], index: 0, kind: input, shape index: {}]   ;;  %s4441_s1 = inlined_call_operand.vmem [shape: f32[1,128], index: 1, kind: input, shape index: {}]   ;;  %s4442_s2 = inlined_call_operand.vmem [shape: f32[1,128], index: 2, kind: input, shape index: {}]   ;;  %s4443_s3 = inlined_call_operand.vmem [shape: f32[324,1], index: 3, kind: input, shape index: {}]   ;;  %s4444_s4 = inlined_call_operand.vmem [shape: bf16[9,128,128], index: 4, kind: input, shape index: {}]   ;;  %s4445_s5 = inlined_call_operand.vmem [shape: f32[2,288,128], index: 5, kind: output, shape index: {}]  }
   0x1 LB: > { %s3033_s19 = sadd.s32 4294967295, %s3577_s18   ;;  %p3037_p0 = scmp.ge.s32.totalorder %s3577_s18, 1  ;;  %s3577_s18 = sphi %s3611_s18, %s15_s18  }
   0x2   : > { %p187_p1 = scmp.lt.s32.totalorder %s3577_s18, 3 }
   0x4   : > { %p188_p2 = pnand %p3037_p0, %p187_p1 }
   0x5   : > { %p215_p3 = scmp.lt.s32.totalorder (!%p188_p2), %s3033_s19, 1 }
   0x6   : > { %191 = sbr.rel (%p188_p2) target bundleno = 940 (0x3ac), region = 40 }
   0xb   : > { %v421_v0 = vld [vmem:[%s4443_s3 + $0xa0] sm:$0xff]  ;;  %v411_v1 = vld [vmem:[%s4443_s3 + $0x50] sm:$0xff]  ;;  %v3579_v3 = vmov 0   ;;  %v412_v4 = vld [vmem:[%s4443_s3 + $0x58] sm:$0xff]  ;;  %s4447_s19 = smov (!%p215_p3, %s3033_s19), 1  ;;  %v3580_v60 = vmov 0.0  }
   0xc   : > { %v401_v2 = vld [vmem:[%s4443_s3] sm:$0xff]  ;;  %3568 = vset.pattern.permute.xlu2 %v3579_v3  ;;  %3567 = vset.pattern.permute.xlu1 %v3579_v3  ;;  %v422_v5 = vld [vmem:[%s4443_s3 + $0xa8] sm:$0xff]  ;;  %v424_v7 = vld [vmem:[%s4443_s3 + $0xb8] sm:$0xff]  ;;  %s3554_s21 = smul.u32 328, %s4447_s19  ;;  %226 = vst [vmem:[#allocation2 + $0x8] sm:$0xff] %v3580_v60 }
   0xd   : > { %3566 = vset.pattern.permute.xlu0 %v3579_v3  ;;  %494 = vperm.xlu1 %3567, %v411_v1   ;;  %v402_v6 = vld [vmem:[%s4443_s3 + $0x8] sm:$0xff]  ;;  %v423_v8 = vld [vmem:[%s4443_s3 + $0xb0] sm:$0xff]  ;;  %v413_v9 = vld [vmem:[%s4443_s3 + $0x60] sm:$0xff]  ;;  %227 = vst [vmem:[#allocation2 + $0x154] sm:$0xff] %v3580_v60  ;;  %s3555_s28 = smul.u32 288, %s4447_s19 }
   0xe   : > { %544 = vperm.xlu0 %3566, %v421_v0   ;;  %444 = vperm.xlu2 %3568, %v401_v2   ;;  %v403_v10 = vld [vmem:[%s4443_s3 + $0x10] sm:$0xff]  ;;  %v414_v11 = vld [vmem:[%s4443_s3 + $0x68] sm:$0xff]  ;;  %v404_v12 = vld [vmem:[%s4443_s3 + $0x18] sm:$0xff]  ;;  %s3737_s26 = scalar_lea.vmem %s4440_s0, %s3554_s21 }
   0xf   : > { %v426_v13 = vld [vmem:[%s4443_s3 + $0xc8] sm:$0xff]  ;;  %v425_v14 = vld [vmem:[%s4443_s3 + $0xc0] sm:$0xff]  ;;  %v431_v15 = vld [vmem:[%s4443_s3 + $0xf0] sm:$0xff]  ;;  %s4338_s6 = scalar_lea.vmem %s4445_s5, %s3555_s28 }
  0x10   : > { %v415_v16 = vld [vmem:[%s4443_s3 + $0x70] sm:$0xff]  ;;  %v432_v17 = vld [vmem:[%s4443_s3 + $0xf8] sm:$0xff]  ;;  %v406_v19 = vld [vmem:[%s4443_s3 + $0x28] sm:$0xff] }
  0x11   : > { %v416_v18 = vld [vmem:[%s4443_s3 + $0x78] sm:$0xff]  ;;  %v405_v20 = vld [vmem:[%s4443_s3 + $0x20] sm:$0xff]  ;;  %v427_v21 = vld [vmem:[%s4443_s3 + $0xd0] sm:$0xff] }
  0x12   : > { %v433_v22 = vld [vmem:[%s4443_s3 + $0x100] sm:$0xff]  ;;  %v3473_v23 = vld [vmem:[%s4444_s4 + $0x78] sm:$0xff]  ;;  %v434_v25 = vld [vmem:[%s4443_s3 + $0x108] sm:$0xff] }
  0x13   : > { %v428_v24 = vld [vmem:[%s4443_s3 + $0xd8] sm:$0xff]  ;;  %918 = vmatpush.bf16.msra.mxu0 %v3473_v23  ;;  %3530 = vmatpush.bf16.msra.mxu1 %v3473_v23  ;;  %v3472_v26 = vld [vmem:[%s4444_s4 + $0x70] sm:$0xff]  ;;  %v418_v27 = vld [vmem:[%s4443_s3 + $0x88] sm:$0xff] }
  0x14   : > { %3531 = vmatpush.bf16.msra.mxu2 %v3473_v23  ;;  %3532 = vmatpush.bf16.msra.mxu3 %v3473_v23  ;;  %v3471_v28 = vld [vmem:[%s4444_s4 + $0x68] sm:$0xff]  ;;  %v417_v29 = vld [vmem:[%s4443_s3 + $0x80] sm:$0xff]  ;;  %v407_v30 = vld [vmem:[%s4443_s3 + $0x30] sm:$0xff] }
  0x15   : > { %499 = vperm.xlu1 %3567, %v412_v4   ;;  %v3470_v31 = vld [vmem:[%s4444_s4 + $0x60] sm:$0xff]  ;;  %v3469_v33 = vld [vmem:[%s4444_s4 + $0x58] sm:$0xff]  ;;  %v430_v35 = vld [vmem:[%s4443_s3 + $0xe8] sm:$0xff] }
  0x16   : > { %549 = vperm.xlu0 %3566, %v422_v5   ;;  %449 = vperm.xlu2 %3568, %v402_v6   ;;  %v429_v32 = vld [vmem:[%s4443_s3 + $0xe0] sm:$0xff]  ;;  %v408_v34 = vld [vmem:[%s4443_s3 + $0x38] sm:$0xff]  ;;  %v3468_v36 = vld [vmem:[%s4444_s4 + $0x50] sm:$0xff] }
  0x17   : > { %919 = vmatpush.bf16.msra.mxu0 %v3472_v26  ;;  %3533 = vmatpush.bf16.msra.mxu1 %v3472_v26  ;;  %v3742_v37 = vld [vmem:[%s4441_s1] ss:$0 sm:$0xff]  ;;  %v436_v38 = vld [vmem:[%s4443_s3 + $0x118] sm:$0xff]  ;;  %v3467_v40 = vld [vmem:[%s4444_s4 + $0x48] sm:$0xff] }
  0x18   : > { %3534 = vmatpush.bf16.msra.mxu2 %v3472_v26  ;;  %3535 = vmatpush.bf16.msra.mxu3 %v3472_v26  ;;  %v229_v39 = vld [vmem:[%s3737_s26] sm:$0xff]  ;;  %v435_v41 = vld [vmem:[%s4443_s3 + $0x110] sm:$0xff]  ;;  %v230_v48 = vld [vmem:[%s3737_s26 + $0x8] sm:$0xff] }
  0x19   : > { %v419_v42 = vld [vmem:[%s4443_s3 + $0x90] sm:$0xff]  ;;  %v274_v43 = vmul.f32 %v3742_v37, %v229_v39  ;;  %v3761_v44 = vld [vmem:[%s4442_s2] ss:$0 sm:$0xff]  ;;  %v420_v49 = vld [vmem:[%s4443_s3 + $0x98] sm:$0xff]  ;;  %v275_v52 = vmul.f32 %v3742_v37, %v230_v48 }
  0x1a   : > { %v3466_v45 = vld [vmem:[%s4444_s4 + $0x40] sm:$0xff]  ;;  %v410_v50 = vld [vmem:[%s4443_s3 + $0x48] sm:$0xff]  ;;  %v439_v59 = vld [vmem:[%s4443_s3 + $0x130] sm:$0xff] }
  0x1b   : > { %920 = vmatpush.bf16.msra.mxu0 %v3471_v28  ;;  %3536 = vmatpush.bf16.msra.mxu1 %v3471_v28  ;;  %v319_v46 = vadd.f32 %v3761_v44, %v274_v43  ;;  %v409_v47 = vld [vmem:[%s4443_s3 + $0x40] sm:$0xff]  ;;  %v320_v55 = vadd.f32 %v3761_v44, %v275_v52  ;;  %v438_v56 = vld [vmem:[%s4443_s3 + $0x128] sm:$0xff]  ;;  %v239_v2 = vld [vmem:[%s3737_s26 + $0x50] sm:$0xff] }
  0x1c   : > { %3537 = vmatpush.bf16.msra.mxu2 %v3471_v28  ;;  %3538 = vmatpush.bf16.msra.mxu3 %v3471_v28  ;;  %v241_v57 = vld [vmem:[%s3737_s26 + $0x60] sm:$0xff]  ;;  %v232_v5 = vld [vmem:[%s3737_s26 + $0x18] sm:$0xff]  ;;  %v255_v60 = vld [vmem:[%s3737_s26 + $0xd0] sm:$0xff] }
  0x1d   : > { %559 = vperm.xlu1 %3567, %v424_v7   ;;  %v360_v51 = vmax.f32 %v319_v46, 0.0  ;;  %v437_v58 = vld [vmem:[%s4443_s3 + $0x120] sm:$0xff]  ;;  %v361_v61 = vmax.f32 %v320_v55, 0.0  ;;  %v286_v62 = vmul.f32 %v3742_v37, %v241_v57  ;;  %v440_v6 = vld [vmem:[%s4443_s3 + $0x138] sm:$0xff]  ;;  %v231_v57 = vld [vmem:[%s3737_s26 + $0x10] sm:$0xff] }
  0x1e   : > { %554 = vperm.xlu0 %3566, %v423_v8   ;;  %504 = vperm.xlu2 %3568, %v413_v9   ;;  %v441_v3 = vld [vmem:[%s4443_s3 + $0x140] sm:$0xf]  ;;  %v284_v8 = vmul.f32 %v3742_v37, %v239_v2  ;;  %v3464_v2 = vld [vmem:[%s4444_s4 + $0x30] sm:$0xff] }
  0x1f   : > { %921 = vmatpush.bf16.msra.mxu0 %v3470_v31  ;;  %3539 = vmatpush.bf16.msra.mxu1 %v3470_v31  ;;  %v331_v1 = vadd.f32 %v3761_v44, %v286_v62  ;;  %v249_v4 = vld [vmem:[%s3737_s26 + $0xa0] sm:$0xff] }
  0x20   : > { %3540 = vmatpush.bf16.msra.mxu2 %v3470_v31  ;;  %3541 = vmatpush.bf16.msra.mxu3 %v3470_v31 }
  0x21   : > { %v372_v9 = vmax.f32 %v331_v1, 0.0  ;;  %v3497_v1 = vld [vmem:[%s4444_s4 + $0x138] sm:$0xff] }
  0x23   : > { %922 = vmatpush.bf16.msra.mxu0 %v3469_v33  ;;  %3542 = vmatpush.bf16.msra.mxu1 %v3469_v33 }
  0x24   : > { %3543 = vmatpush.bf16.msra.mxu2 %v3469_v33  ;;  %3544 = vmatpush.bf16.msra.mxu3 %v3469_v33 }
  0x25   : > { %454 = vperm.xlu1 %3567, %v403_v10   ;;  %v294_v10 = vmul.f32 %v3742_v37, %v249_v4 }
  0x26   : > { %509 = vperm.xlu0 %3566, %v414_v11   ;;  %459 = vperm.xlu2 %3568, %v404_v12   ;;  %v277_v11 = vmul.f32 %v3742_v37, %v232_v5 }
  0x27   : > { %923 = vmatpush.bf16.msra.mxu0 %v3468_v36  ;;  %3545 = vmatpush.bf16.msra.mxu1 %v3468_v36 }
  0x28   : > { %3546 = vmatpush.bf16.msra.mxu2 %v3468_v36  ;;  %3547 = vmatpush.bf16.msra.mxu3 %v3468_v36  ;;  %v251_v36 = vld [vmem:[%s3737_s26 + $0xb0] sm:$0xff] }
  0x29   : > { %v296_v46 = vmul.f32 %v3742_v37, %v251_v36 }
  0x2b   : > { %924 = vmatpush.bf16.msra.mxu0 %v3467_v40  ;;  %3548 = vmatpush.bf16.msra.mxu1 %v3467_v40  ;;  %v341_v55 = vadd.f32 %v3761_v44, %v296_v46 }
  0x2c   : > { %3549 = vmatpush.bf16.msra.mxu2 %v3467_v40  ;;  %3550 = vmatpush.bf16.msra.mxu3 %v3467_v40 }
  0x2d   : > { %569 = vperm.xlu1 %3567, %v426_v13   ;;  %v329_v13 = vadd.f32 %v3761_v44, %v284_v8 }
  0x2e   : > { %564 = vperm.xlu0 %3566, %v425_v14   ;;  %594 = vperm.xlu2 %3568, %v431_v15   ;;  %v339_v15 = vadd.f32 %v3761_v44, %v294_v10 }
  0x2f   : > { %925 = vmatpush.bf16.msra.mxu0 %v3466_v45  ;;  %3551 = vmatpush.bf16.msra.mxu1 %v3466_v45 }
  0x30   : > { %3552 = vmatpush.bf16.msra.mxu2 %v3466_v45  ;;  %3553 = vmatpush.bf16.msra.mxu3 %v3466_v45 }
  0x33   : > { %1791 = vmatpush.bf16.msrb.mxu0 %v3497_v1  ;;  %v258_v1 = vld [vmem:[%s3737_s26 + $0xe8] sm:$0xff] }
  0x35   : > { %514 = vperm.xlu1 %3567, %v415_v16   ;;  %v322_v16 = vadd.f32 %v3761_v44, %v277_v11 }
  0x36   : > { %599 = vperm.xlu0 %3566, %v432_v17   ;;  %519 = vperm.xlu2 %3568, %v416_v18   ;;  %v240_v17 = vld [vmem:[%s3737_s26 + $0x58] sm:$0xff]  ;;  %v250_v18 = vld [vmem:[%s3737_s26 + $0xa8] sm:$0xff] }
  0x37   : > { %v363_v23 = vmax.f32 %v322_v16, 0.0 }
  0x3d   : > { %469 = vperm.xlu1 %3567, %v406_v19   ;;  %v259_v19 = vld [vmem:[%s3737_s26 + $0xf0] sm:$0xff] }
  0x3e   : > { %464 = vperm.xlu0 %3566, %v405_v20   ;;  %574 = vperm.xlu2 %3568, %v427_v21   ;;  %v370_v20 = vmax.f32 %v329_v13, 0.0  ;;  %v285_v21 = vmul.f32 %v3742_v37, %v240_v17  ;;  %v254_v17 = vld [vmem:[%s3737_s26 + $0xc8] sm:$0xff] }
  0x45   : > { %604 = vperm.xlu1 %3567, %v433_v22   ;;  %v380_v22 = vmax.f32 %v339_v15, 0.0 }
  0x46   : > { %579 = vperm.xlu0 %3566, %v428_v24   ;;  %609 = vperm.xlu2 %3568, %v434_v25   ;;  %v295_v24 = vmul.f32 %v3742_v37, %v250_v18  ;;  %v304_v25 = vmul.f32 %v3742_v37, %v259_v19  ;;  %v253_v18 = vld [vmem:[%s3737_s26 + $0xc0] sm:$0xff]  ;;  %v262_v19 = vld [vmem:[%s3737_s26 + $0x108] sm:$0xff] }
  0x48   : > { %v340_v33 = vadd.f32 %v3761_v44, %v295_v24 }
  0x4a   : > { %v381_v43 = vmax.f32 %v340_v33, 0.0 }
  0x4d   : > { %529 = vperm.xlu1 %3567, %v418_v27  }
  0x4e   : > { %524 = vperm.xlu0 %3566, %v417_v29   ;;  %474 = vperm.xlu2 %3568, %v407_v30   ;;  %v330_v30 = vadd.f32 %v3761_v44, %v285_v21  ;;  %v299_v21 = vmul.f32 %v3742_v37, %v254_v17 }
  0x50   : > { %v371_v39 = vmax.f32 %v330_v30, 0.0  ;;  %v344_v33 = vadd.f32 %v3761_v44, %v299_v21  ;;  %v261_v21 = vld [vmem:[%s3737_s26 + $0x100] sm:$0xff] }
  0x52   : > { %v385_v46 = vmax.f32 %v344_v33, 0.0 }
  0x55   : > { %584 = vperm.xlu1 %3567, %v429_v32  }
  0x56   : > { %479 = vperm.xlu0 %3566, %v408_v34   ;;  %589 = vperm.xlu2 %3568, %v430_v35   ;;  %v349_v34 = vadd.f32 %v3761_v44, %v304_v25  ;;  %v252_v35 = vld [vmem:[%s3737_s26 + $0xb8] sm:$0xff] }
  0x57   : > { %v297_v40 = vmul.f32 %v3742_v37, %v252_v35 }
  0x58   : > { %v390_v45 = vmax.f32 %v349_v34, 0.0 }
  0x59   : > { %v342_v52 = vadd.f32 %v3761_v44, %v297_v40 }
  0x5b   : > { %v383_v62 = vmax.f32 %v342_v52, 0.0 }
  0x5d   : > { %619 = vperm.xlu1 %3567, %v436_v38   ;;  %v244_v38 = vld [vmem:[%s3737_s26 + $0x78] sm:$0xff] }
  0x5e   : > { %614 = vperm.xlu0 %3566, %v435_v41   ;;  %534 = vperm.xlu2 %3568, %v419_v42   ;;  %v3481_v41 = vld [vmem:[%s4444_s4 + $0xb8] sm:$0xff] }
  0x5f   : > { %v3465_v42 = vld [vmem:[%s4444_s4 + $0x38] sm:$0xff]  ;;  %1283 = vmatpush.bf16.msrb.mxu2 %v3481_v41 }
  0x60   : > { %1065 = vmatpush.bf16.msrb.mxu1 %v3465_v42  ;;  %v260_v41 = vld [vmem:[%s3737_s26 + $0xf8] sm:$0xff]  ;;  %v235_v42 = vld [vmem:[%s3737_s26 + $0x30] sm:$0xff] }
  0x61   : > { %v280_v52 = vmul.f32 %v3742_v37, %v235_v42 }
  0x64   : > { %1066 = vmatpush.bf16.msrb.mxu1 %v3464_v2 }
  0x65   : > { %484 = vperm.xlu1 %3567, %v409_v47   ;;  %v289_v47 = vmul.f32 %v3742_v37, %v244_v38 }
  0x66   : > { %539 = vperm.xlu0 %3566, %v420_v49   ;;  %489 = vperm.xlu2 %3568, %v410_v50  }
  0x68   : > { %v445_v53 = vpop.permute.xlu2 %444 }
  0x69   : > { %v647_v54 = vmul.f32 %v445_v53, %v360_v51 }
  0x6b   : > { %688 = vst [vmem:[#allocation2 + $0x10] sm:$0xff] %v647_v54 }
  0x6d   : > { %629 = vperm.xlu1 %3567, %v438_v56   ;;  %v334_v56 = vadd.f32 %v3761_v44, %v289_v47 }
  0x6e   : > { %624 = vperm.xlu0 %3566, %v437_v58   ;;  %634 = vperm.xlu2 %3568, %v439_v59   ;;  %v242_v59 = vld [vmem:[%s3737_s26 + $0x68] sm:$0xff] }
  0x6f   : > { %v375_v4 = vmax.f32 %v334_v56, 0.0  ;;  %v287_v5 = vmul.f32 %v3742_v37, %v242_v59 }
  0x70   : > { %v450_v63 = vpop.permute.xlu2 %449 }
  0x71   : > { %v648_v0 = vmul.f32 %v450_v63, %v361_v61  ;;  %v276_v63 = vmul.f32 %v3742_v37, %v231_v57  ;;  %v332_v15 = vadd.f32 %v3761_v44, %v287_v5  ;;  %v3489_v5 = vld [vmem:[%s4444_s4 + $0xf8] sm:$0xff] }
  0x72   : > { %1537 = vmatpush.bf16.msrb.mxu3 %v3489_v5 }
  0x73   : > { %689 = vst [vmem:[#allocation2 + $0x18] sm:$0xff] %v648_v0  ;;  %v835_v7 = vpack.c.bf16 %v648_v0, %v647_v54  ;;  %v3480_v0 = vld [vmem:[%s4444_s4 + $0xb0] sm:$0xff]  ;;  %v321_v11 = vadd.f32 %v3761_v44, %v276_v63  ;;  %v373_v24 = vmax.f32 %v332_v15, 0.0  ;;  %v234_v63 = vld [vmem:[%s3737_s26 + $0x28] sm:$0xff] }
  0x74   : > { %1284 = vmatpush.bf16.msrb.mxu2 %v3480_v0  ;;  %v233_v0 = vld [vmem:[%s3737_s26 + $0x20] sm:$0xff] }
  0x75   : > { %644 = vperm.xlu1 %3567, %v441_v3   ;;  %926 = vmatmul.bf16.vlgmr.msra.gmra.mxu0 %v835_v7  ;;  %v382_v3 = vmax.f32 %v341_v55, 0.0 }
  0x76   : > { %639 = vperm.xlu0 %3566, %v440_v6   ;;  %v300_v6 = vmul.f32 %v3742_v37, %v255_v60 }
  0x78   : > { %v505_v12 = vpop.permute.xlu2 %504  ;;  %v345_v16 = vadd.f32 %v3761_v44, %v300_v6 }
  0x79   : > { %v3804_v14 = vmul.f32 %v505_v12, %v372_v9 }
  0x7a   : > { %v386_v25 = vmax.f32 %v345_v16, 0.0 }
  0x7b   : > { %700 = vst [vmem:[#allocation2 + $0x70] sm:$0xff] %v3804_v14 }
  0x7f   : > { %v495_v26 = vpop.permute.xlu1 %494 }
  0x80   : > { %v545_v27 = vpop.permute.xlu0 %544  ;;  %v657_v28 = vmul.f32 %v495_v26, %v370_v20  ;;  %v460_v29 = vpop.permute.xlu2 %459  ;;  %v362_v20 = vmax.f32 %v321_v11, 0.0  ;;  %v298_v26 = vmul.f32 %v3742_v37, %v253_v18 }
  0x81   : > { %v667_v31 = vmul.f32 %v545_v27, %v380_v22  ;;  %v3816_v32 = vmul.f32 %v460_v29, %v363_v23  ;;  %v3479_v22 = vld [vmem:[%s4444_s4 + $0xa8] sm:$0xff]  ;;  %v3496_v23 = vld [vmem:[%s4444_s4 + $0x130] sm:$0xff]  ;;  %v307_v27 = vmul.f32 %v3742_v37, %v262_v19 }
  0x82   : > { %698 = vst [vmem:[#allocation2 + $0x60] sm:$0xff] %v657_v28  ;;  %1285 = vmatpush.bf16.msrb.mxu2 %v3479_v22  ;;  %1792 = vmatpush.bf16.msrb.mxu0 %v3496_v23  ;;  %v343_v36 = vadd.f32 %v3761_v44, %v298_v26  ;;  %v3488_v22 = vld [vmem:[%s4444_s4 + $0xf0] sm:$0xff] }
  0x83   : > { %708 = vst [vmem:[#allocation2 + $0xb0] sm:$0xff] %v667_v31  ;;  %v352_v38 = vadd.f32 %v3761_v44, %v307_v27  ;;  %1538 = vmatpush.bf16.msrb.mxu3 %v3488_v22 }
  0x84   : > { %691 = vst [vmem:[#allocation2 + $0x28] sm:$0xff] %v3816_v32 }
  0x87   : > { %v500_v48 = vpop.permute.xlu1 %499 }
  0x88   : > { %v550_v49 = vpop.permute.xlu0 %549  ;;  %v658_v50 = vmul.f32 %v500_v48, %v371_v39  ;;  %v595_v51 = vpop.permute.xlu2 %594  ;;  %v243_v39 = vld [vmem:[%s3737_s26 + $0x70] sm:$0xff]  ;;  %v3463_v48 = vld [vmem:[%s4444_s4 + $0x28] sm:$0xff] }
  0x89   : > { %v668_v53 = vmul.f32 %v550_v49, %v381_v43  ;;  %v3834_v54 = vmul.f32 %v595_v51, %v390_v45  ;;  %v288_v47 = vmul.f32 %v3742_v37, %v243_v39  ;;  %v3495_v49 = vld [vmem:[%s4444_s4 + $0x128] sm:$0xff]  ;;  %v305_v51 = vmul.f32 %v3742_v37, %v260_v41  ;;  %1067 = vmatpush.bf16.msrb.mxu1 %v3463_v48 }
  0x8a   : > { %699 = vst [vmem:[#allocation2 + $0x68] sm:$0xff] %v658_v50  ;;  %v840_v58 = vpack.c.bf16 %v658_v50, %v657_v28  ;;  %v393_v50 = vmax.f32 %v352_v38, 0.0  ;;  %1793 = vmatpush.bf16.msrb.mxu0 %v3495_v49  ;;  %v3487_v38 = vld [vmem:[%s4444_s4 + $0xe8] sm:$0xff]  ;;  %v3476_v49 = vld [vmem:[%s4444_s4 + $0x90] sm:$0xff] }
  0x8b   : > { %709 = vst [vmem:[#allocation2 + $0xb8] sm:$0xff] %v668_v53  ;;  %v845_v61 = vpack.c.bf16 %v668_v53, %v667_v31  ;;  %1539 = vmatpush.bf16.msrb.mxu3 %v3487_v38  ;;  %v263_v38 = vld [vmem:[%s3737_s26 + $0x110] sm:$0xff] }
  0x8c   : > { %718 = vst [vmem:[#allocation2 + $0x100] sm:$0xff] %v3834_v54  ;;  %951 = vmatmul.bf16.vlgmr.msra.gmra.mxu1 %v840_v58  ;;  %v333_v58 = vadd.f32 %v3761_v44, %v288_v47 }
  0x8d   : > { %976 = vmatmul.bf16.vlgmr.msra.gmra.mxu2 %v845_v61  ;;  %v350_v61 = vadd.f32 %v3761_v44, %v305_v51  ;;  %v238_v51 = vld [vmem:[%s3737_s26 + $0x48] sm:$0xff] }
  0x8e   : > { %v374_v2 = vmax.f32 %v333_v58, 0.0 }
  0x8f   : > { %v560_v7 = vpop.permute.xlu1 %559  ;;  %v391_v6 = vmax.f32 %v350_v61, 0.0 }
  0x90   : > { %v555_v8 = vpop.permute.xlu0 %554  ;;  %v670_v9 = vmul.f32 %v560_v7, %v383_v62  ;;  %v520_v10 = vpop.permute.xlu2 %519  ;;  %v325_v62 = vadd.f32 %v3761_v44, %v280_v52 }
  0x91   : > { %v669_v12 = vmul.f32 %v555_v8, %v382_v3  ;;  %v3855_v13 = vmul.f32 %v520_v10, %v375_v4  ;;  %v279_v3 = vmul.f32 %v3742_v37, %v234_v63  ;;  %v3462_v4 = vld [vmem:[%s4444_s4 + $0x20] sm:$0xff]  ;;  %v278_v8 = vmul.f32 %v3742_v37, %v233_v0  ;;  %v3485_v63 = vld [vmem:[%s4444_s4 + $0xd8] sm:$0xff]  ;;  %v3475_v0 = vld [vmem:[%s4444_s4 + $0x88] sm:$0xff] }
  0x92   : > { %711 = vst [vmem:[#allocation2 + $0xc8] sm:$0xff] %v670_v9  ;;  %v366_v7 = vmax.f32 %v325_v62, 0.0  ;;  %1068 = vmatpush.bf16.msrb.mxu1 %v3462_v4  ;;  %v283_v62 = vmul.f32 %v3742_v37, %v238_v51 }
  0x93   : > { %710 = vst [vmem:[#allocation2 + $0xc0] sm:$0xff] %v669_v12  ;;  %v846_v45 = vpack.c.bf16 %v670_v9, %v669_v12  ;;  %v303_v9 = vmul.f32 %v3742_v37, %v258_v1  ;;  %v324_v16 = vadd.f32 %v3761_v44, %v279_v3  ;;  %v323_v19 = vadd.f32 %v3761_v44, %v278_v8 }
  0x94   : > { %703 = vst [vmem:[#allocation2 + $0x88] sm:$0xff] %v3855_v13 }
  0x95   : > { %v364_v33 = vmax.f32 %v323_v19, 0.0 }
  0x97   : > { %v455_v28 = vpop.permute.xlu1 %454 }
  0x98   : > { %v510_v29 = vpop.permute.xlu0 %509  ;;  %v649_v30 = vmul.f32 %v455_v28, %v362_v20  ;;  %v575_v31 = vpop.permute.xlu2 %574  ;;  %v348_v20 = vadd.f32 %v3761_v44, %v303_v9  ;;  %v365_v28 = vmax.f32 %v324_v16, 0.0  ;;  %v328_v9 = vadd.f32 %v3761_v44, %v283_v62  ;;  %v236_v16 = vld [vmem:[%s3737_s26 + $0x38] sm:$0xff] }
  0x99   : > { %v660_v34 = vmul.f32 %v510_v29, %v373_v24  ;;  %v3873_v35 = vmul.f32 %v575_v31, %v386_v25  ;;  %v256_v24 = vld [vmem:[%s3737_s26 + $0xd8] sm:$0xff]  ;;  %v247_v25 = vld [vmem:[%s3737_s26 + $0x90] sm:$0xff]  ;;  %v306_v29 = vmul.f32 %v3742_v37, %v261_v21 }
  0x9a   : > { %690 = vst [vmem:[#allocation2 + $0x20] sm:$0xff] %v649_v30  ;;  %v836_v40 = vpack.c.bf16 %v3816_v32, %v649_v30  ;;  %v3478_v32 = vld [vmem:[%s4444_s4 + $0xa0] sm:$0xff]  ;;  %v3477_v30 = vld [vmem:[%s4444_s4 + $0x98] sm:$0xff] }
  0x9b   : > { %701 = vst [vmem:[#allocation2 + $0x78] sm:$0xff] %v660_v34  ;;  %v841_v43 = vpack.c.bf16 %v660_v34, %v3804_v14  ;;  %v384_v14 = vmax.f32 %v343_v36, 0.0  ;;  %1286 = vmatpush.bf16.msrb.mxu2 %v3478_v32  ;;  %v3461_v31 = vld [vmem:[%s4444_s4 + $0x18] sm:$0xff]  ;;  %v301_v34 = vmul.f32 %v3742_v37, %v256_v24  ;;  %v292_v36 = vmul.f32 %v3742_v37, %v247_v25  ;;  %v246_v32 = vld [vmem:[%s3737_s26 + $0x88] sm:$0xff] }
  0x9c   : > { %714 = vst [vmem:[#allocation2 + $0xe0] sm:$0xff] %v3873_v35  ;;  %931 = vmatmul.bf16.gmra.mxu0 %v836_v40  ;;  %1069 = vmatpush.bf16.msrb.mxu1 %v3461_v31  ;;  %v369_v24 = vmax.f32 %v328_v9, 0.0 }
  0x9d   : > { %956 = vmatmul.bf16.gmra.mxu1 %v841_v43  ;;  %981 = vmatmul.bf16.gmra.mxu2 %v846_v45  ;;  %v351_v43 = vadd.f32 %v3761_v44, %v306_v29  ;;  %v346_v47 = vadd.f32 %v3761_v44, %v301_v34  ;;  %v337_v48 = vadd.f32 %v3761_v44, %v292_v36  ;;  %v264_v34 = vld [vmem:[%s3737_s26 + $0x118] sm:$0xff]  ;;  %v3482_v36 = vld [vmem:[%s4444_s4 + $0xc0] sm:$0xff] }
  0x9f   : > { %v570_v53 = vpop.permute.xlu1 %569  ;;  %1287 = vmatpush.bf16.msrb.mxu2 %v3477_v30  ;;  %v387_v58 = vmax.f32 %v346_v47, 0.0 }
  0xa0   : > { %v565_v55 = vpop.permute.xlu0 %564  ;;  %v672_v56 = vmul.f32 %v570_v53, %v385_v46  ;;  %v610_v57 = vpop.permute.xlu2 %609  ;;  %v3493_v53 = vld [vmem:[%s4444_s4 + $0x118] sm:$0xff] }
  0xa1   : > { %v671_v59 = vmul.f32 %v565_v55, %v384_v14  ;;  %v3896_v60 = vmul.f32 %v610_v57, %v393_v50  ;;  %v3486_v14 = vld [vmem:[%s4444_s4 + $0xe0] sm:$0xff]  ;;  %v3460_v55 = vld [vmem:[%s4444_s4 + $0x10] sm:$0xff]  ;;  %v291_v57 = vmul.f32 %v3742_v37, %v246_v32 }
  0xa2   : > { %713 = vst [vmem:[#allocation2 + $0xd8] sm:$0xff] %v672_v56  ;;  %v245_v50 = vld [vmem:[%s3737_s26 + $0x80] sm:$0xff]  ;;  %1540 = vmatpush.bf16.msrb.mxu3 %v3486_v14  ;;  %1070 = vmatpush.bf16.msrb.mxu1 %v3460_v55 }
  0xa3   : > { %712 = vst [vmem:[#allocation2 + $0xd0] sm:$0xff] %v671_v59  ;;  %v847_v26 = vpack.c.bf16 %v672_v56, %v671_v59  ;;  %1288 = vmatpush.bf16.msrb.mxu2 %v3476_v49  ;;  %v392_v56 = vmax.f32 %v351_v43, 0.0  ;;  %v378_v59 = vmax.f32 %v337_v48, 0.0  ;;  %v290_v61 = vmul.f32 %v3742_v37, %v245_v50 }
  0xa4   : > { %721 = vst [vmem:[#allocation2 + $0x118] sm:$0xff] %v3896_v60  ;;  %v336_v5 = vadd.f32 %v3761_v44, %v291_v57  ;;  %v309_v43 = vmul.f32 %v3742_v37, %v264_v34  ;;  %v308_v48 = vmul.f32 %v3742_v37, %v263_v38  ;;  %v3458_v57 = vld [vmem:[%s4444_s4] sm:$0xff] }
  0xa5   : > { %v335_v8 = vadd.f32 %v3761_v44, %v290_v61  ;;  %v248_v61 = vld [vmem:[%s3737_s26 + $0x98] sm:$0xff] }
  0xa6   : > { %1541 = vmatpush.bf16.msrb.mxu3 %v3485_v63  ;;  %v377_v21 = vmax.f32 %v336_v5, 0.0  ;;  %v354_v51 = vadd.f32 %v3761_v44, %v309_v43  ;;  %v353_v55 = vadd.f32 %v3761_v44, %v308_v48  ;;  %v3513_v63 = vld [vmem:[%s4444_s4 + $0x1b8] sm:$0xff] }
  0xa7   : > { %v515_v10 = vpop.permute.xlu1 %514  ;;  %1289 = vmatpush.bf16.msrb.mxu2 %v3475_v0  ;;  %v3521_v0 = vld [vmem:[%s4444_s4 + $0x1f8] sm:$0xff] }
  0xa8   : > { %v600_v11 = vpop.permute.xlu0 %599  ;;  %v661_v12 = vmul.f32 %v515_v10, %v374_v2  ;;  %v475_v15 = vpop.permute.xlu2 %474  ;;  %v257_v10 = vld [vmem:[%s3737_s26 + $0xe0] sm:$0xff] }
  0xa9   : > { %v678_v17 = vmul.f32 %v600_v11, %v391_v6  ;;  %v3914_v18 = vmul.f32 %v475_v15, %v366_v7  ;;  %v3484_v11 = vld [vmem:[%s4444_s4 + $0xd0] sm:$0xff]  ;;  %v302_v22 = vmul.f32 %v3742_v37, %v257_v10 }
  0xaa   : > { %702 = vst [vmem:[#allocation2 + $0x80] sm:$0xff] %v661_v12  ;;  %v842_v23 = vpack.c.bf16 %v3855_v13, %v661_v12  ;;  %v3494_v13 = vld [vmem:[%s4444_s4 + $0x120] sm:$0xff]  ;;  %1542 = vmatpush.bf16.msrb.mxu3 %v3484_v11 }
  0xab   : > { %719 = vst [vmem:[#allocation2 + $0x108] sm:$0xff] %v678_v17  ;;  %v850_v27 = vpack.c.bf16 %v678_v17, %v3834_v54  ;;  %v389_v54 = vmax.f32 %v348_v20, 0.0  ;;  %1794 = vmatpush.bf16.msrb.mxu0 %v3494_v13  ;;  %v3474_v12 = vld [vmem:[%s4444_s4 + $0x80] sm:$0xff]  ;;  %v267_v17 = vld [vmem:[%s3737_s26 + $0x130] sm:$0xff]  ;;  %v347_v30 = vadd.f32 %v3761_v44, %v302_v22 }
  0xac   : > { %694 = vst [vmem:[#allocation2 + $0x40] sm:$0xff] %v3914_v18  ;;  %v3492_v20 = vld [vmem:[%s4444_s4 + $0x110] sm:$0xff]  ;;  %1290 = vmatpush.bf16.msrb.mxu2 %v3474_v12  ;;  %v312_v25 = vmul.f32 %v3742_v37, %v267_v17  ;;  %v266_v12 = vld [vmem:[%s3737_s26 + $0x128] sm:$0xff] }
  0xad   : > { %961 = vmatmul.bf16.gmra.mxu1 %v842_v23  ;;  %986 = vmatmul.bf16.gmra.mxu2 %v847_v26  ;;  %v376_v23 = vmax.f32 %v335_v8, 0.0 }
  0xae   : > { %1001 = vmatmul.bf16.vlgmr.msra.gmra.mxu3 %v850_v27 }
  0xaf   : > { %v470_v39 = vpop.permute.xlu1 %469  ;;  %1795 = vmatpush.bf16.msrb.mxu0 %v3493_v53 }
  0xb0   : > { %v465_v40 = vpop.permute.xlu0 %464  ;;  %v652_v41 = vmul.f32 %v470_v39, %v365_v28  ;;  %v590_v42 = vpop.permute.xlu2 %589  ;;  %2299 = vmatpush.bf16.msra.mxu2 %v3513_v63 }
  0xb1   : > { %v651_v45 = vmul.f32 %v465_v40, %v364_v33  ;;  %v3943_v46 = vmul.f32 %v590_v42, %v389_v54  ;;  %v357_v54 = vadd.f32 %v3761_v44, %v312_v25  ;;  %v3459_v40 = vld [vmem:[%s4444_s4 + $0x8] sm:$0xff]  ;;  %v388_v42 = vmax.f32 %v347_v30, 0.0 }
  0xb2   : > { %693 = vst [vmem:[#allocation2 + $0x38] sm:$0xff] %v652_v41  ;;  %1071 = vmatpush.bf16.msrb.mxu1 %v3459_v40 }
  0xb3   : > { %692 = vst [vmem:[#allocation2 + $0x30] sm:$0xff] %v651_v45  ;;  %v837_v52 = vpack.c.bf16 %v652_v41, %v651_v45  ;;  %1796 = vmatpush.bf16.msrb.mxu0 %v3492_v20  ;;  %v3491_v41 = vld [vmem:[%s4444_s4 + $0x108] sm:$0xff]  ;;  %v398_v47 = vmax.f32 %v357_v54, 0.0 }
  0xb4   : > { %717 = vst [vmem:[#allocation2 + $0xf8] sm:$0xff] %v3943_v46 }
  0xb5   : > { %936 = vmatmul.bf16.gmra.mxu0 %v837_v52 }
  0xb6   : > { %1072 = vmatpush.bf16.msrb.mxu1 %v3458_v57 }
  0xb7   : > { %v605_v1 = vpop.permute.xlu1 %604  ;;  %1797 = vmatpush.bf16.msrb.mxu0 %v3491_v41 }
  0xb8   : > { %v580_v2 = vpop.permute.xlu0 %579  ;;  %v679_v3 = vmul.f32 %v605_v1, %v392_v56  ;;  %v535_v4 = vpop.permute.xlu2 %534  ;;  %v237_v56 = vld [vmem:[%s3737_s26 + $0x40] sm:$0xff]  ;;  %v395_v1 = vmax.f32 %v354_v51, 0.0  ;;  %v730_v51 = vld [vmem:[#allocation2 + $0x17] sm:$0xff] }
  0xb9   : > { %v674_v6 = vmul.f32 %v580_v2, %v387_v58  ;;  %v3973_v7 = vmul.f32 %v535_v4, %v378_v59  ;;  %v3490_v58 = vld [vmem:[%s4444_s4 + $0x100] sm:$0xff]  ;;  %v282_v2 = vmul.f32 %v3742_v37, %v237_v56  ;;  %v3529_v4 = vld [vmem:[%s4444_s4 + $0x238] sm:$0xff] }
  0xba   : > { %720 = vst [vmem:[#allocation2 + $0x110] sm:$0xff] %v679_v3  ;;  %v851_v15 = vpack.c.bf16 %v3896_v60, %v679_v3  ;;  %v281_v60 = vmul.f32 %v3742_v37, %v236_v16  ;;  %v394_v3 = vmax.f32 %v353_v55, 0.0  ;;  %v1672_v55 = vld [vmem:[#allocation2 + $0x22] sm:$0xff] }
  0xbb   : > { %715 = vst [vmem:[#allocation2 + $0xe8] sm:$0xff] %v674_v6  ;;  %v848_v19 = vpack.c.bf16 %v674_v6, %v3873_v35  ;;  %v3483_v35 = vld [vmem:[%s4444_s4 + $0xc8] sm:$0xff]  ;;  %1798 = vmatpush.bf16.msrb.mxu0 %v3490_v58  ;;  %v327_v9 = vadd.f32 %v3761_v44, %v282_v2  ;;  %v3520_v58 = vld [vmem:[%s4444_s4 + $0x1f0] sm:$0xff] }
  0xbc   : > { %706 = vst [vmem:[#allocation2 + $0xa0] sm:$0xff] %v3973_v7  ;;  %1543 = vmatpush.bf16.msrb.mxu3 %v3483_v35  ;;  %v326_v33 = vadd.f32 %v3761_v44, %v281_v60  ;;  %v732_v2 = vld [vmem:[#allocation2 + $0x27] sm:$0xff] }
  0xbd   : > { %991 = vmatmul.bf16.gmra.mxu2 %v848_v19  ;;  %v368_v17 = vmax.f32 %v327_v9, 0.0  ;;  %v311_v19 = vmul.f32 %v3742_v37, %v266_v12  ;;  %v733_v9 = vld [vmem:[#allocation2 + $0x2f] sm:$0xff] }
  0xbe   : > { %1006 = vmatmul.bf16.gmra.mxu3 %v851_v15  ;;  %v367_v45 = vmax.f32 %v326_v33, 0.0  ;;  %v265_v15 = vld [vmem:[%s3737_s26 + $0x120] sm:$0xff] }
  0xbf   : > { %v530_v26 = vpop.permute.xlu1 %529  ;;  %2807 = vmatpush.bf16.msra.mxu0 %v3529_v4  ;;  %v356_v60 = vadd.f32 %v3761_v44, %v311_v19 }
  0xc0   : > { %v525_v27 = vpop.permute.xlu0 %524  ;;  %v664_v28 = vmul.f32 %v530_v26, %v377_v21  ;;  %v490_v29 = vpop.permute.xlu2 %489  ;;  %1544 = vmatpush.bf16.msrb.mxu3 %v3482_v36  ;;  %v310_v21 = vmul.f32 %v3742_v37, %v265_v15  ;;  %v1165_v26 = vld [vmem:[#allocation2 + $0x19] sm:$0xff] }
  0xc1   : > { %v663_v13 = vmul.f32 %v525_v27, %v376_v23  ;;  %v3999_v31 = vmul.f32 %v490_v29, %v369_v24  ;;  %v269_v27 = vld [vmem:[%s3737_s26 + $0x140] sm:$0xf]  ;;  %v268_v29 = vld [vmem:[%s3737_s26 + $0x138] sm:$0xff]  ;;  %v397_v33 = vmax.f32 %v356_v60, 0.0 }
  0xc2   : > { %705 = vst [vmem:[#allocation2 + $0x98] sm:$0xff] %v664_v28  ;;  %v355_v35 = vadd.f32 %v3761_v44, %v310_v21  ;;  %v314_v34 = vmul.f32 %v3742_v37, %v269_v27  ;;  %v313_v38 = vmul.f32 %v3742_v37, %v268_v29  ;;  %v3511_v21 = vld [vmem:[%s4444_s4 + $0x1a8] sm:$0xff]  ;;  %v735_v29 = vld [vmem:[#allocation2 + $0x3f] sm:$0xff] }
  0xc3   : > { %704 = vst [vmem:[#allocation2 + $0x90] sm:$0xff] %v663_v13  ;;  %v843_v39 = vpack.c.bf16 %v664_v28, %v663_v13  ;;  %v1164_v13 = vld [vmem:[#allocation2 + $0x11] sm:$0xff] }
  0xc4   : > { %697 = vst [vmem:[#allocation2 + $0x58] sm:$0xff] %v3999_v31  ;;  %2553 = vmatpush.bf16.msra.mxu3 %v3521_v0  ;;  %v1200_v54 = vpack.c.bf16 %v1165_v26, %v1164_v13  ;;  %v396_v36 = vmax.f32 %v355_v35, 0.0  ;;  %v3528_v0 = vld [vmem:[%s4444_s4 + $0x230] sm:$0xff]  ;;  %v3527_v13 = vld [vmem:[%s4444_s4 + $0x228] sm:$0xff] }
  0xc5   : > { %966 = vmatmul.bf16.gmra.mxu1 %v843_v39  ;;  %2808 = vmatpush.bf16.msra.mxu0 %v3528_v0  ;;  %v1682_v0 = vld [vmem:[#allocation2 + $0x72] sm:$0xff] }
  0xc7   : > { %v585_v32 = vpop.permute.xlu1 %584 }
  0xc8   : > { %v480_v49 = vpop.permute.xlu0 %479  ;;  %v675_v14 = vmul.f32 %v585_v32, %v388_v42  ;;  %v635_v50 = vpop.permute.xlu2 %634  ;;  %v1419_v42 = vld [vmem:[#allocation2 + $0x29] sm:$0xff]  ;;  %2554 = vmatpush.bf16.msra.mxu3 %v3520_v58 }
  0xc9   : > { %v654_v52 = vmul.f32 %v480_v49, %v367_v45  ;;  %v685_v53 = vmul.f32 %v635_v50, %v398_v47  ;;  %v1418_v45 = vld [vmem:[#allocation2 + $0x21] sm:$0xff]  ;;  %v729_v50 = vld [vmem:[#allocation2 + $0xf] sm:$0xff]  ;;  %2809 = vmatpush.bf16.msra.mxu0 %v3527_v13 }
  0xca   : > { %716 = vst [vmem:[#allocation2 + $0xf0] sm:$0xff] %v675_v14  ;;  %v849_v59 = vpack.c.bf16 %v3943_v46, %v675_v14  ;;  %v3505_v46 = vld [vmem:[%s4444_s4 + $0x178] sm:$0xff]  ;;  %v1454_v47 = vpack.c.bf16 %v1419_v42, %v1418_v45  ;;  %v765_v56 = vpack.c.bf16 %v730_v51, %v729_v50  ;;  %v1680_v42 = vld [vmem:[#allocation2 + $0x62] sm:$0xff] }
  0xcb   : > { %695 = vst [vmem:[#allocation2 + $0x48] sm:$0xff] %v654_v52  ;;  %v838_v62 = vpack.c.bf16 %v654_v52, %v3914_v18  ;;  %v293_v18 = vmul.f32 %v3742_v37, %v248_v61  ;;  %2045 = vmatpush.bf16.msra.mxu1 %v3505_v46  ;;  %v1673_v52 = vld [vmem:[#allocation2 + $0x2a] sm:$0xff]  ;;  %v1421_v61 = vld [vmem:[#allocation2 + $0x39] sm:$0xff] }
  0xcc   : > { %726 = vst [vmem:[#allocation2 + $0x140] sm:$0xff] %v685_v53  ;;  %v1708_v57 = vpack.c.bf16 %v1673_v52, %v1672_v55  ;;  %v1429_v50 = vld [vmem:[#allocation2 + $0x79] sm:$0xff]  ;;  %v1428_v52 = vld [vmem:[#allocation2 + $0x71] sm:$0xff] }
  0xcd   : > { %941 = vmatmul.bf16.gmra.mxu0 %v838_v62  ;;  %996 = vmatmul.bf16.gmra.mxu2 %v849_v59  ;;  %v338_v11 = vadd.f32 %v3761_v44, %v293_v18  ;;  %v1420_v59 = vld [vmem:[#allocation2 + $0x31] sm:$0xff]  ;;  %v1675_v18 = vld [vmem:[#allocation2 + $0x3a] sm:$0xff] }
  0xce   : > { %v3504_v62 = vld [vmem:[%s4444_s4 + $0x170] sm:$0xff]  ;;  %v1455_v63 = vpack.c.bf16 %v1421_v61, %v1420_v59  ;;  %v3510_v55 = vld [vmem:[%s4444_s4 + $0x1a0] sm:$0xff] }
  0xcf   : > { %v620_v5 = vpop.permute.xlu1 %619  ;;  %v379_v20 = vmax.f32 %v338_v11, 0.0  ;;  %2046 = vmatpush.bf16.msra.mxu1 %v3504_v62  ;;  %v739_v59 = vld [vmem:[#allocation2 + $0x5f] sm:$0xff] }
  0xd0   : > { %v615_v6 = vpop.permute.xlu0 %614  ;;  %v682_v8 = vmul.f32 %v620_v5, %v395_v1  ;;  %v731_v1 = vld [vmem:[#allocation2 + $0x1f] sm:$0xff] }
  0xd1   : > { %v681_v10 = vmul.f32 %v615_v6, %v394_v3  ;;  %v1674_v3 = vld [vmem:[#allocation2 + $0x32] sm:$0xff]  ;;  %v766_v46 = vpack.c.bf16 %v732_v2, %v731_v1  ;;  %v1683_v61 = vld [vmem:[#allocation2 + $0x7a] sm:$0xff] }
  0xd2   : > { %723 = vst [vmem:[#allocation2 + $0x128] sm:$0xff] %v682_v8  ;;  %v1709_v4 = vpack.c.bf16 %v1675_v18, %v1674_v3  ;;  %v1422_v6 = vld [vmem:[#allocation2 + $0x41] sm:$0xff]  ;;  %v1713_v2 = vpack.c.bf16 %v1683_v61, %v1682_v0  ;;  %v3501_v61 = vld [vmem:[%s4444_s4 + $0x158] sm:$0xff] }
  0xd3   : > { %722 = vst [vmem:[#allocation2 + $0x120] sm:$0xff] %v681_v10  ;;  %v852_v16 = vpack.c.bf16 %v682_v8, %v681_v10  ;;  %v734_v10 = vld [vmem:[#allocation2 + $0x37] sm:$0xff]  ;;  %v1676_v12 = vld [vmem:[#allocation2 + $0x42] sm:$0xff] }
  0xd4   : > { %v767_v15 = vpack.c.bf16 %v734_v10, %v733_v9  ;;  %v736_v27 = vld [vmem:[#allocation2 + $0x47] sm:$0xff] }
  0xd5   : > { %1011 = vmatmul.bf16.gmra.mxu3 %v852_v16  ;;  %v3502_v62 = vld [vmem:[%s4444_s4 + $0x160] sm:$0xff] }
  0xd6   : > { %v3526_v18 = vld [vmem:[%s4444_s4 + $0x220] sm:$0xff] }
  0xd7   : > { %v485_v22 = vpop.permute.xlu1 %484  ;;  %2810 = vmatpush.bf16.msra.mxu0 %v3526_v18  ;;  %v746_v18 = vld [vmem:[#allocation2 + $0x97] sm:$0xff] }
  0xd8   : > { %v540_v23 = vpop.permute.xlu0 %539  ;;  %v655_v24 = vmul.f32 %v485_v22, %v368_v17  ;;  %v1425_v22 = vld [vmem:[#allocation2 + $0x59] sm:$0xff] }
  0xd9   : > { %v666_v25 = vmul.f32 %v540_v23, %v379_v20  ;;  %v3519_v23 = vld [vmem:[%s4444_s4 + $0x1e8] sm:$0xff] }
  0xda   : > { %696 = vst [vmem:[#allocation2 + $0x50] sm:$0xff] %v655_v24  ;;  %v839_v28 = vpack.c.bf16 %v3999_v31, %v655_v24  ;;  %v359_v31 = vadd.f32 %v3761_v44, %v314_v34  ;;  %2555 = vmatpush.bf16.msra.mxu3 %v3519_v23 }
  0xdb   : > { %707 = vst [vmem:[#allocation2 + $0xa8] sm:$0xff] %v666_v25  ;;  %v844_v30 = vpack.c.bf16 %v666_v25, %v3973_v7  ;;  %v358_v7 = vadd.f32 %v3761_v44, %v313_v38  ;;  %v3512_v44 = vld [vmem:[%s4444_s4 + $0x1b0] sm:$0xff]  ;;  %v3503_v25 = vld [vmem:[%s4444_s4 + $0x168] sm:$0xff] }
  0xdc   : > { %v400_v48 = vmax.f32 %v359_v31, 0.0  ;;  %2300 = vmatpush.bf16.msra.mxu2 %v3512_v44  ;;  %2047 = vmatpush.bf16.msra.mxu1 %v3503_v25  ;;  %v1426_v38 = vld [vmem:[#allocation2 + $0x61] sm:$0xff] }
  0xdd   : > { %946 = vmatmul.bf16.gmra.mxu0 %v839_v28  ;;  %971 = vmatmul.bf16.gmra.mxu1 %v844_v30  ;;  %v399_v32 = vmax.f32 %v358_v7, 0.0  ;;  %v1679_v30 = vld [vmem:[#allocation2 + $0x5a] sm:$0xff] }
  0xde   : > { %1291 = vmatmul.bf16.vlgmr.msrb.gmra.mxu2 %v1200_v54 }
  0xdf   : > { %v630_v39 = vpop.permute.xlu1 %629 }
  0xe0   : > { %v625_v40 = vpop.permute.xlu0 %624  ;;  %v684_v41 = vmul.f32 %v630_v39, %v397_v33  ;;  %2301 = vmatpush.bf16.msra.mxu2 %v3511_v21  ;;  %v768_v33 = vpack.c.bf16 %v736_v27, %v735_v29  ;;  %v1427_v39 = vld [vmem:[#allocation2 + $0x69] sm:$0xff]  ;;  %2048 = vmatpush.bf16.msra.mxu1 %v3502_v62  ;;  %v1433_v29 = vld [vmem:[#allocation2 + $0x99] sm:$0xff] }
  0xe1   : > { %v683_v43 = vmul.f32 %v625_v40, %v396_v36  ;;  %v1423_v5 = vld [vmem:[#allocation2 + $0x49] sm:$0xff]  ;;  %v1424_v20 = vld [vmem:[#allocation2 + $0x51] sm:$0xff] }
  0xe2   : > { %725 = vst [vmem:[#allocation2 + $0x138] sm:$0xff] %v684_v41  ;;  %v1456_v8 = vpack.c.bf16 %v1423_v5, %v1422_v6  ;;  %v1677_v11 = vld [vmem:[#allocation2 + $0x4a] sm:$0xff]  ;;  %v1457_v24 = vpack.c.bf16 %v1425_v22, %v1424_v20  ;;  %v1678_v28 = vld [vmem:[#allocation2 + $0x52] sm:$0xff]  ;;  %v1458_v41 = vpack.c.bf16 %v1427_v39, %v1426_v38  ;;  %v1684_v22 = vld [vmem:[#allocation2 + $0x82] sm:$0xff] }
  0xe3   : > { %724 = vst [vmem:[#allocation2 + $0x130] sm:$0xff] %v683_v43  ;;  %v1710_v16 = vpack.c.bf16 %v1677_v11, %v1676_v12  ;;  %v1711_v54 = vpack.c.bf16 %v1679_v30, %v1678_v28  ;;  %v737_v7 = vld [vmem:[#allocation2 + $0x4f] sm:$0xff]  ;;  %v738_v45 = vld [vmem:[#allocation2 + $0x57] sm:$0xff] }
  0xe4   : > { %2302 = vmatpush.bf16.msra.mxu2 %v3510_v55  ;;  %v1431_v5 = vld [vmem:[#allocation2 + $0x89] sm:$0xff]  ;;  %v1432_v28 = vld [vmem:[#allocation2 + $0x91] sm:$0xff]  ;;  %2049 = vmatpush.bf16.msra.mxu1 %v3501_v61  ;;  %v1691_v61 = vld [vmem:[#allocation2 + $0xba] sm:$0xff] }
  0xe5   : > { %1545 = vmatmul.bf16.vlgmr.msrb.gmra.mxu3 %v1454_v47  ;;  %v741_v21 = vld [vmem:[#allocation2 + $0x6f] sm:$0xff] }
  0xe6   : > { %v1435_v55 = vld [vmem:[#allocation2 + $0xa9] sm:$0xff] }
  0xe7   : > { %v645_v49 = vpop.permute.xlu1 %644 }
  0xe8   : > { %v640_v14 = vpop.permute.xlu0 %639  ;;  %v687_v37 = vmul.f32 %v645_v49, %v400_v48  ;;  %v769_v48 = vpack.c.bf16 %v738_v45, %v737_v7  ;;  %v1687_v7 = vld [vmem:[#allocation2 + $0x9a] sm:$0xff] }
  0xe9   : > { %v686_v53 = vmul.f32 %v640_v14, %v399_v32  ;;  %v3509_v45 = vld [vmem:[%s4444_s4 + $0x198] sm:$0xff] }
  0xea   : > { %728 = vst [vmem:[#allocation2 + $0x150] sm:$0xf] %v687_v37  ;;  %2303 = vmatpush.bf16.msra.mxu2 %v3509_v45 }
  0xeb   : > { %727 = vst [vmem:[#allocation2 + $0x148] sm:$0xff] %v686_v53  ;;  %v1459_v53 = vpack.c.bf16 %v1429_v50, %v1428_v52 }
  0xed   : > { %1073 = vmatmul.bf16.vlgmr.msrb.gmra.mxu1 %v765_v56  ;;  %1799 = vmatmul.bf16.vlgmr.msrb.gmra.mxu0 %v1708_v57  ;;  %v3518_v56 = vld [vmem:[%s4444_s4 + $0x1e0] sm:$0xff] }
  0xee   : > { %1296 = vmatmul.bf16.gmra.mxu2 %v1454_v47  ;;  %v1681_v47 = vld [vmem:[#allocation2 + $0x6a] sm:$0xff]  ;;  %2556 = vmatpush.bf16.msra.mxu3 %v3518_v56 }
  0xef   : > { %v1712_v32 = vpack.c.bf16 %v1681_v47, %v1680_v42  ;;  %v1686_v42 = vld [vmem:[#allocation2 + $0x92] sm:$0xff] }
  0xf0   : > { %v1715_v50 = vpack.c.bf16 %v1687_v7, %v1686_v42 }
  0xf2   : > { %v4081_v60 = vpop.f32.mrf.mxu0 }
  0xf5   : > { %1550 = vmatmul.bf16.gmra.mxu3 %v1455_v63 }
  0xfa   : > { %v4093_v34 = vpop.f32.mrf.mxu0 }
  0xfd   : > { %1078 = vmatmul.bf16.gmra.mxu1 %v766_v46  ;;  %1804 = vmatmul.bf16.gmra.mxu0 %v1709_v4 }
  0xfe   : > { %1301 = vmatmul.bf16.gmra.mxu2 %v1455_v63  ;;  %v740_v63 = vld [vmem:[#allocation2 + $0x67] sm:$0xff] }
  0xff   : > { %v770_v1 = vpack.c.bf16 %v740_v63, %v739_v59  ;;  %v3517_v59 = vld [vmem:[%s4444_s4 + $0x1d8] sm:$0xff] }
 0x100   : > { %2557 = vmatpush.bf16.msra.mxu3 %v3517_v59 }
 0x105   : > { %1555 = vmatmul.bf16.gmra.mxu3 %v1456_v8 }
 0x109   : > { %v4071_v17 = vpop.f32.mrf.mxu1 }
 0x10d   : > { %1083 = vmatmul.bf16.gmra.mxu1 %v767_v15  ;;  %1809 = vmatmul.bf16.gmra.mxu0 %v1710_v16  ;;  %v742_v15 = vld [vmem:[#allocation2 + $0x77] sm:$0xff]  ;;  %v1685_v16 = vld [vmem:[#allocation2 + $0x8a] sm:$0xff] }
 0x10e   : > { %1306 = vmatmul.bf16.gmra.mxu2 %v1456_v8  ;;  %v1430_v8 = vld [vmem:[#allocation2 + $0x81] sm:$0xff]  ;;  %v771_v23 = vpack.c.bf16 %v742_v15, %v741_v21  ;;  %v3525_v15 = vld [vmem:[%s4444_s4 + $0x218] sm:$0xff] }
 0x10f   : > { %v1460_v9 = vpack.c.bf16 %v1431_v5, %v1430_v8  ;;  %v1688_v5 = vld [vmem:[#allocation2 + $0xa2] sm:$0xff]  ;;  %v1689_v8 = vld [vmem:[#allocation2 + $0xaa] sm:$0xff]  ;;  %2811 = vmatpush.bf16.msra.mxu0 %v3525_v15 }
 0x110   : > { %v4073_v19 = vpop.f32.mrf.mxu2 }
 0x111   : > { %v4086_v35 = vpop.f32.mrf.mxu1 }
 0x115   : > { %1560 = vmatmul.bf16.gmra.mxu3 %v1457_v24 }
 0x118   : > { %v4088_v26 = vpop.f32.mrf.mxu2 }
 0x119   : > { %v4099_v31 = vpop.f32.mrf.mxu0 }
 0x11a   : > { %v4097_v40 = vpop.f32.mrf.mxu1 }
 0x11d   : > { %1088 = vmatmul.bf16.gmra.mxu1 %v768_v33  ;;  %1814 = vmatmul.bf16.gmra.mxu0 %v1711_v54  ;;  %v1461_v33 = vpack.c.bf16 %v1433_v29, %v1432_v28  ;;  %v743_v54 = vld [vmem:[#allocation2 + $0x7f] sm:$0xff] }
 0x11e   : > { %1311 = vmatmul.bf16.gmra.mxu2 %v1457_v24  ;;  %v1714_v24 = vpack.c.bf16 %v1685_v16, %v1684_v22 }
 0x120   : > { %v4095_v36 = vpop.f32.mrf.mxu2 }
 0x121   : > { %v4105_v14 = vpop.f32.mrf.mxu0 }
 0x122   : > { %v4103_v49 = vpop.f32.mrf.mxu1 }
 0x125   : > { %1565 = vmatmul.bf16.gmra.mxu3 %v1458_v41 }
 0x128   : > { %v4101_v43 = vpop.f32.mrf.mxu2 }
 0x12a   : > { %v4117_v57 = vpop.f32.mrf.mxu1 }
 0x12d   : > { %1093 = vmatmul.bf16.gmra.mxu1 %v769_v48  ;;  %1819 = vmatmul.bf16.gmra.mxu0 %v1712_v32 }
 0x12e   : > { %1316 = vmatmul.bf16.gmra.mxu2 %v1458_v41  ;;  %v744_v41 = vld [vmem:[#allocation2 + $0x87] sm:$0xff] }
 0x12f   : > { %v772_v32 = vpack.c.bf16 %v744_v41, %v743_v54  ;;  %v1437_v54 = vld [vmem:[#allocation2 + $0xb9] sm:$0xff] }
 0x130   : > { %v4107_v37 = vpop.f32.mrf.mxu2 }
 0x131   : > { %v4109_v51 = vpop.f32.mrf.mxu3 }
 0x132   : > { %v4119_v44 = vpop.f32.mrf.mxu0  ;;  %v4131_v46 = vpop.f32.mrf.mxu1 }
 0x135   : > { %1570 = vmatmul.bf16.gmra.mxu3 %v1459_v53 }
 0x138   : > { %v4121_v58 = vpop.f32.mrf.mxu2 }
 0x139   : > { %v4126_v3 = vpop.f32.mrf.mxu3 }
 0x13a   : > { %v4135_v6 = vpop.f32.mrf.mxu0 }
 0x13d   : > { %1098 = vmatmul.bf16.gmra.mxu1 %v770_v1  ;;  %1824 = vmatmul.bf16.gmra.mxu0 %v1713_v2  ;;  %v745_v1 = vld [vmem:[#allocation2 + $0x8f] sm:$0xff] }
 0x13e   : > { %1321 = vmatmul.bf16.gmra.mxu2 %v1459_v53  ;;  %v1434_v53 = vld [vmem:[#allocation2 + $0xa1] sm:$0xff] }
 0x13f   : > { %v1462_v0 = vpack.c.bf16 %v1435_v55, %v1434_v53 }
 0x140   : > { %v4133_v4 = vpop.f32.mrf.mxu2 }
 0x141   : > { %v4137_v10 = vpop.f32.mrf.mxu3 }
 0x142   : > { %v4139_v11 = vpop.f32.mrf.mxu1 }
 0x145   : > { %1575 = vmatmul.bf16.gmra.mxu3 %v1460_v9 }
 0x148   : > { %v4141_v12 = vpop.f32.mrf.mxu2 }
 0x149   : > { %v4145_v25 = vpop.f32.mrf.mxu3 }
 0x14a   : > { %v4143_v20 = vpop.f32.mrf.mxu0  ;;  %v4149_v30 = vpop.f32.mrf.mxu1 }
 0x14d   : > { %1103 = vmatmul.bf16.gmra.mxu1 %v771_v23  ;;  %1829 = vmatmul.bf16.gmra.mxu0 %v1714_v24  ;;  %v773_v23 = vpack.c.bf16 %v746_v18, %v745_v1  ;;  %v1716_v24 = vpack.c.bf16 %v1689_v8, %v1688_v5  ;;  %v747_v5 = vld [vmem:[#allocation2 + $0x9f] sm:$0xff]  ;;  %v1690_v8 = vld [vmem:[#allocation2 + $0xb2] sm:$0xff] }
 0x14e   : > { %1326 = vmatmul.bf16.gmra.mxu2 %v1460_v9 }
 0x150   : > { %v4147_v27 = vpop.f32.mrf.mxu2 }
 0x152   : > { %v4151_v13 = vpop.f32.mrf.mxu0 }
 0x155   : > { %1580 = vmatmul.bf16.gmra.mxu3 %v1461_v33 }
 0x158   : > { %v4153_v38 = vpop.f32.mrf.mxu2  ;;  %v4155_v39 = vpop.f32.mrf.mxu3 }
 0x15a   : > { %v4160_v47 = vpop.f32.mrf.mxu0  ;;  %v4162_v48 = vpop.f32.mrf.mxu1 }
 0x15d   : > { %1108 = vmatmul.bf16.gmra.mxu1 %v772_v32  ;;  %1834 = vmatmul.bf16.gmra.mxu0 %v1715_v50  ;;  %v1436_v32 = vld [vmem:[#allocation2 + $0xb1] sm:$0xff] }
 0x15e   : > { %1331 = vmatmul.bf16.gmra.mxu2 %v1461_v33  ;;  %v1463_v53 = vpack.c.bf16 %v1437_v54, %v1436_v32 }
 0x160   : > { %v4164_v52 = vpop.f32.mrf.mxu3 }
 0x161   : > { %v1292_v56 = vpop.f32.mrf.mxu2 }
 0x162   : > { %v4172_v62 = vpop.f32.mrf.mxu0  ;;  %v4174_v63 = vpop.f32.mrf.mxu1 }
 0x165   : > { %1585 = vmatmul.bf16.gmra.mxu3 %v1462_v0 }
 0x168   : > { %v1546_v2 = vpop.f32.mrf.mxu3 }
 0x169   : > { %v1294_v9 = vpop.f32.mrf.mxu2 }
 0x16a   : > { %v1074_v16 = vpop.f32.mrf.mxu1  ;;  %v1800_v21 = vpop.f32.mrf.mxu0 }
 0x16b   : > { %v1075_v22 = vadd.f32 %v1074_v16, %v4081_v60 }
 0x16d   : > { %v1382_v28 = vadd.f32 %v1292_v56, %v1075_v22  ;;  %1113 = vmatmul.bf16.gmra.mxu1 %v773_v23  ;;  %1839 = vmatmul.bf16.gmra.mxu0 %v1716_v24  ;;  %v748_v56 = vld [vmem:[#allocation2 + $0xa7] sm:$0xff] }
 0x16e   : > { %1336 = vmatmul.bf16.gmra.mxu2 %v1462_v0  ;;  %v774_v16 = vpack.c.bf16 %v748_v56, %v747_v5  ;;  %v1439_v23 = vld [vmem:[#allocation2 + $0xc9] sm:$0xff] }
 0x16f   : > { %v1636_v29 = vadd.f32 %v1546_v2, %v1382_v28 }
 0x170   : > { %v1548_v33 = vpop.f32.mrf.mxu3 }
 0x171   : > { %v4180_v41 = vadd.f32 %v1800_v21, %v1636_v29  ;;  %v1297_v42 = vpop.f32.mrf.mxu2  ;;  %v1717_v21 = vpack.c.bf16 %v1691_v61, %v1690_v8  ;;  %v3508_v29 = vld [vmem:[%s4444_s4 + $0x190] sm:$0xff]  ;;  %v1692_v8 = vld [vmem:[#allocation2 + $0xc2] sm:$0xff] }
 0x172   : > { %v1076_v7 = vpop.f32.mrf.mxu1  ;;  %v1802_v45 = vpop.f32.mrf.mxu0  ;;  %2304 = vmatpush.bf16.msra.mxu2 %v3508_v29 }
 0x173   : > { %v1077_v50 = vadd.f32 %v1076_v7, %v4093_v34  ;;  %v1438_v7 = vld [vmem:[#allocation2 + $0xc1] sm:$0xff] }
 0x174   : > { %v1464_v32 = vpack.c.bf16 %v1439_v23, %v1438_v7  ;;  %v1441_v23 = vld [vmem:[#allocation2 + $0xd9] sm:$0xff] }
 0x175   : > { %v1383_v60 = vadd.f32 %v1294_v9, %v1077_v50  ;;  %1590 = vmatmul.bf16.gmra.mxu3 %v1463_v53 }
 0x177   : > { %v1637_v55 = vadd.f32 %v1548_v33, %v1383_v60  ;;  %v3500_v33 = vld [vmem:[%s4444_s4 + $0x150] sm:$0xff] }
 0x178   : > { %v1551_v59 = vpop.f32.mrf.mxu3  ;;  %2050 = vmatpush.bf16.msra.mxu1 %v3500_v33 }
 0x179   : > { %v4183_v1 = vadd.f32 %v1802_v45, %v1637_v55  ;;  %v1299_v0 = vpop.f32.mrf.mxu2  ;;  %v749_v55 = vld [vmem:[#allocation2 + $0xaf] sm:$0xff] }
 0x17a   : > { %v1079_v2 = vpop.f32.mrf.mxu1  ;;  %v1805_v18 = vpop.f32.mrf.mxu0 }
 0x17b   : > { %v1080_v15 = vadd.f32 %v1079_v2, %v4099_v31  ;;  %v3516_v31 = vld [vmem:[%s4444_s4 + $0x1d0] sm:$0xff] }
 0x17c   : > { %2558 = vmatpush.bf16.msra.mxu3 %v3516_v31  ;;  %v3524_v2 = vld [vmem:[%s4444_s4 + $0x210] sm:$0xff] }
 0x17d   : > { %v1384_v22 = vadd.f32 %v1297_v42, %v1080_v15  ;;  %1118 = vmatmul.bf16.gmra.mxu1 %v774_v16  ;;  %1844 = vmatmul.bf16.gmra.mxu0 %v1717_v21 }
 0x17e   : > { %1341 = vmatmul.bf16.gmra.mxu2 %v1463_v53  ;;  %2812 = vmatpush.bf16.msra.mxu0 %v3524_v2 }
 0x17f   : > { %v1638_v34 = vadd.f32 %v1551_v59, %v1384_v22  ;;  %v1693_v59 = vld [vmem:[#allocation2 + $0xca] sm:$0xff] }
 0x180   : > { %v1553_v9 = vpop.f32.mrf.mxu3 }
 0x181   : > { %v4186_v24 = vadd.f32 %v1805_v18, %v1638_v34  ;;  %v1302_v28 = vpop.f32.mrf.mxu2 }
 0x182   : > { %v1081_v54 = vpop.f32.mrf.mxu1  ;;  %v1807_v42 = vpop.f32.mrf.mxu0 }
 0x183   : > { %v1082_v45 = vadd.f32 %v1081_v54, %v4105_v14  ;;  %v750_v14 = vld [vmem:[#allocation2 + $0xb7] sm:$0xff] }
 0x184   : > { %v775_v16 = vpack.c.bf16 %v750_v14, %v749_v55  ;;  %v1694_v55 = vld [vmem:[#allocation2 + $0xd2] sm:$0xff] }
 0x185   : > { %v1385_v50 = vadd.f32 %v1299_v0, %v1082_v45  ;;  %1595 = vmatmul.bf16.gmra.mxu3 %v1464_v32  ;;  %v1718_v0 = vpack.c.bf16 %v1693_v59, %v1692_v8 }
 0x187   : > { %v1639_v53 = vadd.f32 %v1553_v9, %v1385_v50  ;;  %v1440_v9 = vld [vmem:[#allocation2 + $0xd1] sm:$0xff]  ;;  %v751_v50 = vld [vmem:[#allocation2 + $0xbf] sm:$0xff] }
 0x188   : > { %v1556_v60 = vpop.f32.mrf.mxu3  ;;  %v1465_v7 = vpack.c.bf16 %v1441_v23, %v1440_v9  ;;  %v1442_v23 = vld [vmem:[#allocation2 + $0xe1] sm:$0xff] }
 0x189   : > { %v4198_v56 = vadd.f32 %v1807_v42, %v1639_v53  ;;  %v1304_v61 = vpop.f32.mrf.mxu2  ;;  %v752_v53 = vld [vmem:[#allocation2 + $0xc7] sm:$0xff] }
 0x18a   : > { %v1084_v18 = vpop.f32.mrf.mxu1  ;;  %v1810_v5 = vpop.f32.mrf.mxu0  ;;  %v776_v14 = vpack.c.bf16 %v752_v53, %v751_v50  ;;  %v3515_v53 = vld [vmem:[%s4444_s4 + $0x1c8] sm:$0xff] }
 0x18b   : > { %v1085_v15 = vadd.f32 %v1084_v18, %v4119_v44  ;;  %2559 = vmatpush.bf16.msra.mxu3 %v3515_v53 }
 0x18d   : > { %v1386_v21 = vadd.f32 %v1302_v28, %v1085_v15  ;;  %1123 = vmatmul.bf16.gmra.mxu1 %v775_v16  ;;  %1849 = vmatmul.bf16.gmra.mxu0 %v1718_v0  ;;  %v1443_v16 = vld [vmem:[#allocation2 + $0xe9] sm:$0xff] }
 0x18e   : > { %1346 = vmatmul.bf16.gmra.mxu2 %v1464_v32  ;;  %v1695_v32 = vld [vmem:[#allocation2 + $0xda] sm:$0xff] }
 0x18f   : > { %v1640_v22 = vadd.f32 %v1556_v60, %v1386_v21  ;;  %v1719_v8 = vpack.c.bf16 %v1695_v32, %v1694_v55 }
 0x190   : > { %v1558_v34 = vpop.f32.mrf.mxu3 }
 0x191   : > { %v4204_v29 = vadd.f32 %v1810_v5, %v1640_v22  ;;  %v1307_v31 = vpop.f32.mrf.mxu2  ;;  %v3507_v22 = vld [vmem:[%s4444_s4 + $0x188] sm:$0xff] }
 0x192   : > { %v1086_v33 = vpop.f32.mrf.mxu1  ;;  %v1812_v54 = vpop.f32.mrf.mxu0  ;;  %2305 = vmatpush.bf16.msra.mxu2 %v3507_v22  ;;  %v3523_v22 = vld [vmem:[%s4444_s4 + $0x208] sm:$0xff] }
 0x193   : > { %v1087_v42 = vadd.f32 %v1086_v33, %v4135_v6  ;;  %v1466_v33 = vpack.c.bf16 %v1443_v16, %v1442_v23  ;;  %2813 = vmatpush.bf16.msra.mxu0 %v3523_v22  ;;  %v1446_v22 = vld [vmem:[#allocation2 + $0x101] sm:$0xff] }
 0x195   : > { %v1387_v44 = vadd.f32 %v1304_v61, %v1087_v42  ;;  %1600 = vmatmul.bf16.gmra.mxu3 %v1465_v7 }
 0x197   : > { %v1641_v45 = vadd.f32 %v1558_v34, %v1387_v44  ;;  %v754_v44 = vld [vmem:[#allocation2 + $0xd7] sm:$0xff] }
 0x198   : > { %v1561_v28 = vpop.f32.mrf.mxu3 }
 0x199   : > { %v4207_v60 = vadd.f32 %v1812_v54, %v1641_v45  ;;  %v1309_v59 = vpop.f32.mrf.mxu2  ;;  %v1697_v45 = vld [vmem:[#allocation2 + $0xea] sm:$0xff] }
 0x19a   : > { %v1089_v2 = vpop.f32.mrf.mxu1  ;;  %v1815_v18 = vpop.f32.mrf.mxu0 }
 0x19b   : > { %v1090_v5 = vadd.f32 %v1089_v2, %v4143_v20 }
 0x19d   : > { %v1388_v15 = vadd.f32 %v1307_v31, %v1090_v5  ;;  %1128 = vmatmul.bf16.gmra.mxu1 %v776_v14  ;;  %1854 = vmatmul.bf16.gmra.mxu0 %v1719_v8 }
 0x19e   : > { %1351 = vmatmul.bf16.gmra.mxu2 %v1465_v7  ;;  %v753_v7 = vld [vmem:[#allocation2 + $0xcf] sm:$0xff] }
 0x19f   : > { %v1642_v6 = vadd.f32 %v1561_v28, %v1388_v15 }
 0x1a0   : > { %v1563_v61 = vpop.f32.mrf.mxu3 }
 0x1a1   : > { %v4210_v0 = vadd.f32 %v1815_v18, %v1642_v6  ;;  %v1312_v21 = vpop.f32.mrf.mxu2  ;;  %v777_v18 = vpack.c.bf16 %v754_v44, %v753_v7  ;;  %v1444_v6 = vld [vmem:[#allocation2 + $0xf1] sm:$0xff] }
 0x1a2   : > { %v1091_v34 = vpop.f32.mrf.mxu1  ;;  %v1817_v9 = vpop.f32.mrf.mxu0 }
 0x1a3   : > { %v1092_v20 = vadd.f32 %v1091_v34, %v4151_v13  ;;  %v3499_v13 = vld [vmem:[%s4444_s4 + $0x148] sm:$0xff] }
 0x1a4   : > { %2051 = vmatpush.bf16.msra.mxu1 %v3499_v13  ;;  %v755_v13 = vld [vmem:[#allocation2 + $0xdf] sm:$0xff] }
 0x1a5   : > { %v1389_v31 = vadd.f32 %v1309_v59, %v1092_v20  ;;  %1605 = vmatmul.bf16.gmra.mxu3 %v1466_v33  ;;  %v1696_v59 = vld [vmem:[#allocation2 + $0xe2] sm:$0xff] }
 0x1a6   : > { %v1720_v5 = vpack.c.bf16 %v1697_v45, %v1696_v59 }
 0x1a7   : > { %v1643_v54 = vadd.f32 %v1563_v61, %v1389_v31 }
 0x1a8   : > { %v1566_v42 = vpop.f32.mrf.mxu3 }
 0x1a9   : > { %v4216_v50 = vadd.f32 %v1817_v9, %v1643_v54  ;;  %v1314_v28 = vpop.f32.mrf.mxu2  ;;  %v1445_v9 = vld [vmem:[#allocation2 + $0xf9] sm:$0xff]  ;;  %v756_v54 = vld [vmem:[#allocation2 + $0xe7] sm:$0xff] }
 0x1aa   : > { %v1094_v55 = vpop.f32.mrf.mxu1  ;;  %v1820_v32 = vpop.f32.mrf.mxu0  ;;  %v1467_v20 = vpack.c.bf16 %v1445_v9, %v1444_v6  ;;  %v778_v59 = vpack.c.bf16 %v756_v54, %v755_v13  ;;  %v3506_v54 = vld [vmem:[%s4444_s4 + $0x180] sm:$0xff] }
 0x1ab   : > { %v1095_v2 = vadd.f32 %v1094_v55, %v4160_v47  ;;  %v1699_v55 = vld [vmem:[#allocation2 + $0xfa] sm:$0xff]  ;;  %2306 = vmatpush.bf16.msra.mxu2 %v3506_v54 }
 0x1ad   : > { %v1390_v14 = vadd.f32 %v1312_v21, %v1095_v2  ;;  %1133 = vmatmul.bf16.gmra.mxu1 %v777_v18  ;;  %1859 = vmatmul.bf16.gmra.mxu0 %v1720_v5  ;;  %v1447_v5 = vld [vmem:[#allocation2 + $0x109] sm:$0xff] }
 0x1ae   : > { %1356 = vmatmul.bf16.gmra.mxu2 %v1466_v33 }
 0x1af   : > { %v1644_v8 = vadd.f32 %v1566_v42, %v1390_v14  ;;  %v1698_v42 = vld [vmem:[#allocation2 + $0xf2] sm:$0xff] }
 0x1b0   : > { %v1568_v15 = vpop.f32.mrf.mxu3  ;;  %v1721_v2 = vpack.c.bf16 %v1699_v55, %v1698_v42  ;;  %v3514_v42 = vld [vmem:[%s4444_s4 + $0x1c0] sm:$0xff] }
 0x1b1   : > { %v4225_v61 = vadd.f32 %v1820_v32, %v1644_v8  ;;  %v1317_v16 = vpop.f32.mrf.mxu2  ;;  %2560 = vmatpush.bf16.msra.mxu3 %v3514_v42 }
 0x1b2   : > { %v1096_v34 = vpop.f32.mrf.mxu1  ;;  %v1822_v47 = vpop.f32.mrf.mxu0 }
 0x1b3   : > { %v1097_v23 = vadd.f32 %v1096_v34, %v4172_v62 }
 0x1b5   : > { %v1391_v21 = vadd.f32 %v1314_v28, %v1097_v23  ;;  %1610 = vmatmul.bf16.gmra.mxu3 %v1467_v20 }
 0x1b7   : > { %v1645_v33 = vadd.f32 %v1568_v15, %v1391_v21  ;;  %v758_v21 = vld [vmem:[#allocation2 + $0xf7] sm:$0xff] }
 0x1b8   : > { %v1571_v31 = vpop.f32.mrf.mxu3 }
 0x1b9   : > { %v4231_v7 = vadd.f32 %v1822_v47, %v1645_v33  ;;  %v1319_v44 = vpop.f32.mrf.mxu2  ;;  %v1468_v47 = vpack.c.bf16 %v1447_v5, %v1446_v22  ;;  %v1701_v33 = vld [vmem:[#allocation2 + $0x10a] sm:$0xff] }
 0x1ba   : > { %v1099_v45 = vpop.f32.mrf.mxu1  ;;  %v1825_v53 = vpop.f32.mrf.mxu0  ;;  %v1448_v22 = vld [vmem:[#allocation2 + $0x111] sm:$0xff] }
 0x1bb   : > { %v1100_v32 = vadd.f32 %v1099_v45, %v4071_v17 }
 0x1bd   : > { %v1392_v62 = vadd.f32 %v1317_v16, %v1100_v32  ;;  %1138 = vmatmul.bf16.gmra.mxu1 %v778_v59  ;;  %1864 = vmatmul.bf16.gmra.mxu0 %v1721_v2  ;;  %v757_v16 = vld [vmem:[#allocation2 + $0xef] sm:$0xff] }
 0x1be   : > { %1361 = vmatmul.bf16.gmra.mxu2 %v1467_v20  ;;  %v779_v55 = vpack.c.bf16 %v758_v21, %v757_v16  ;;  %v1703_v16 = vld [vmem:[#allocation2 + $0x11a] sm:$0xff] }
 0x1bf   : > { %v1646_v28 = vadd.f32 %v1571_v31, %v1392_v62 }
 0x1c0   : > { %v1573_v18 = vpop.f32.mrf.mxu3 }
 0x1c1   : > { %v4234_v14 = vadd.f32 %v1825_v53, %v1646_v28  ;;  %v1322_v8 = vpop.f32.mrf.mxu2  ;;  %v1700_v53 = vld [vmem:[#allocation2 + $0x102] sm:$0xff]  ;;  %v1449_v28 = vld [vmem:[#allocation2 + $0x119] sm:$0xff] }
 0x1c2   : > { %v1101_v15 = vpop.f32.mrf.mxu1  ;;  %v1827_v6 = vpop.f32.mrf.mxu0  ;;  %v1722_v32 = vpack.c.bf16 %v1701_v33, %v1700_v53 }
 0x1c3   : > { %v1102_v34 = vadd.f32 %v1101_v15, %v4086_v35  ;;  %v3498_v35 = vld [vmem:[%s4444_s4 + $0x140] sm:$0xff] }
 0x1c4   : > { %2052 = vmatpush.bf16.msra.mxu1 %v3498_v35  ;;  %v3522_v15 = vld [vmem:[%s4444_s4 + $0x200] sm:$0xff] }
 0x1c5   : > { %v1393_v9 = vadd.f32 %v1319_v44, %v1102_v34  ;;  %1615 = vmatmul.bf16.gmra.mxu3 %v1468_v47  ;;  %2814 = vmatpush.bf16.msra.mxu0 %v3522_v15  ;;  %v760_v35 = vld [vmem:[#allocation2 + $0x107] sm:$0xff] }
 0x1c6   : > { %v1450_v15 = vld [vmem:[#allocation2 + $0x121] sm:$0xff] }
 0x1c7   : > { %v1647_v17 = vadd.f32 %v1573_v18, %v1393_v9  ;;  %v1469_v9 = vpack.c.bf16 %v1449_v28, %v1448_v22 }
 0x1c8   : > { %v1576_v23 = vpop.f32.mrf.mxu3 }
 0x1c9   : > { %v4237_v20 = vadd.f32 %v1827_v6, %v1647_v17  ;;  %v1324_v31 = vpop.f32.mrf.mxu2 }
 0x1ca   : > { %v1104_v44 = vpop.f32.mrf.mxu1  ;;  %v1830_v45 = vpop.f32.mrf.mxu0 }
 0x1cb   : > { %v1105_v13 = vadd.f32 %v1104_v44, %v4097_v40  ;;  %v1702_v44 = vld [vmem:[#allocation2 + $0x112] sm:$0xff] }
 0x1cd   : > { %v1394_v59 = vadd.f32 %v1322_v8, %v1105_v13  ;;  %1143 = vmatmul.bf16.gmra.mxu1 %v779_v55  ;;  %1869 = vmatmul.bf16.gmra.mxu0 %v1722_v32  ;;  %v1723_v13 = vpack.c.bf16 %v1703_v16, %v1702_v44  ;;  %v1451_v32 = vld [vmem:[#allocation2 + $0x129] sm:$0xff] }
 0x1ce   : > { %1366 = vmatmul.bf16.gmra.mxu2 %v1468_v47 }
 0x1cf   : > { %v1648_v2 = vadd.f32 %v1576_v23, %v1394_v59  ;;  %v759_v23 = vld [vmem:[#allocation2 + $0xff] sm:$0xff] }
 0x1d0   : > { %v1578_v62 = vpop.f32.mrf.mxu3  ;;  %v780_v53 = vpack.c.bf16 %v760_v35, %v759_v23 }
 0x1d1   : > { %v4249_v18 = vadd.f32 %v1830_v45, %v1648_v2  ;;  %v1327_v5 = vpop.f32.mrf.mxu2 }
 0x1d2   : > { %v1106_v40 = vpop.f32.mrf.mxu1  ;;  %v1832_v6 = vpop.f32.mrf.mxu0 }
 0x1d3   : > { %v1107_v34 = vadd.f32 %v1106_v40, %v4103_v49 }
 0x1d5   : > { %v1395_v8 = vadd.f32 %v1324_v31, %v1107_v34  ;;  %1620 = vmatmul.bf16.gmra.mxu3 %v1469_v9 }
 0x1d7   : > { %v1649_v47 = vadd.f32 %v1578_v62, %v1395_v8  ;;  %v762_v8 = vld [vmem:[#allocation2 + $0x117] sm:$0xff] }
 0x1d8   : > { %v1581_v17 = vpop.f32.mrf.mxu3 }
 0x1d9   : > { %v4255_v21 = vadd.f32 %v1832_v6, %v1649_v47  ;;  %v1329_v33 = vpop.f32.mrf.mxu2  ;;  %v1470_v6 = vpack.c.bf16 %v1451_v32, %v1450_v15  ;;  %v1705_v47 = vld [vmem:[#allocation2 + $0x12a] sm:$0xff] }
 0x1da   : > { %v1109_v54 = vpop.f32.mrf.mxu1  ;;  %v1835_v42 = vpop.f32.mrf.mxu0 }
 0x1db   : > { %v1110_v45 = vadd.f32 %v1109_v54, %v4117_v57  ;;  %v1704_v54 = vld [vmem:[#allocation2 + $0x122] sm:$0xff] }
 0x1dc   : > { %v1724_v44 = vpack.c.bf16 %v1705_v47, %v1704_v54  ;;  %v2181_v47 = vld [vmem:[#allocation2 + $0x3b] sm:$0xff] }
 0x1dd   : > { %v1396_v49 = vadd.f32 %v1327_v5, %v1110_v45  ;;  %1148 = vmatmul.bf16.gmra.mxu1 %v780_v53  ;;  %1874 = vmatmul.bf16.gmra.mxu0 %v1723_v13  ;;  %v761_v5 = vld [vmem:[#allocation2 + $0x10f] sm:$0xff]  ;;  %v1453_v13 = vld [vmem:[#allocation2 + $0x139] sm:$0xff] }
 0x1de   : > { %1371 = vmatmul.bf16.gmra.mxu2 %v1469_v9  ;;  %v781_v35 = vpack.c.bf16 %v762_v8, %v761_v5  ;;  %v1452_v53 = vld [vmem:[#allocation2 + $0x131] sm:$0xff] }
 0x1df   : > { %v1650_v31 = vadd.f32 %v1581_v17, %v1396_v49  ;;  %v2180_v8 = vld [vmem:[#allocation2 + $0x33] sm:$0xff] }
 0x1e0   : > { %v1583_v55 = vpop.f32.mrf.mxu3 }
 0x1e1   : > { %v4258_v59 = vadd.f32 %v1835_v42, %v1650_v31  ;;  %v1332_v2 = vpop.f32.mrf.mxu2 }
 0x1e2   : > { %v1111_v62 = vpop.f32.mrf.mxu1  ;;  %v1837_v28 = vpop.f32.mrf.mxu0 }
 0x1e3   : > { %v1112_v40 = vadd.f32 %v1111_v62, %v4131_v46 }
 0x1e5   : > { %v1397_v22 = vadd.f32 %v1329_v33, %v1112_v40  ;;  %1625 = vmatmul.bf16.gmra.mxu3 %v1470_v6  ;;  %v763_v40 = vld [vmem:[#allocation2 + $0x11f] sm:$0xff] }
 0x1e7   : > { %v1651_v57 = vadd.f32 %v1583_v55, %v1397_v22  ;;  %v764_v22 = vld [vmem:[#allocation2 + $0x127] sm:$0xff] }
 0x1e8   : > { %v1586_v34 = vpop.f32.mrf.mxu3 }
 0x1e9   : > { %v4261_v9 = vadd.f32 %v1837_v28, %v1651_v57  ;;  %v1334_v17 = vpop.f32.mrf.mxu2  ;;  %v1471_v28 = vpack.c.bf16 %v1453_v13, %v1452_v53  ;;  %v1706_v57 = vld [vmem:[#allocation2 + $0x132] sm:$0xff] }
 0x1ea   : > { %v1114_v23 = vpop.f32.mrf.mxu1  ;;  %v1840_v16 = vpop.f32.mrf.mxu0 }
 0x1eb   : > { %v1115_v42 = vadd.f32 %v1114_v23, %v4139_v11 }
 0x1ed   : > { %v1398_v45 = vadd.f32 %v1332_v2, %v1115_v42  ;;  %1153 = vmatmul.bf16.gmra.mxu1 %v781_v35  ;;  %1879 = vmatmul.bf16.gmra.mxu0 %v1724_v44  ;;  %v782_v42 = vpack.c.bf16 %v764_v22, %v763_v40  ;;  %v4270_v35 = vpack.c.bf16 %v2181_v47, %v2180_v8  ;;  %v2688_v40 = vld [vmem:[#allocation2 + $0x35] sm:$0xff]  ;;  %v2689_v22 = vld [vmem:[#allocation2 + $0x3d] sm:$0xff] }
 0x1ee   : > { %1376 = vmatmul.bf16.gmra.mxu2 %v1470_v6  ;;  %v1707_v6 = vld [vmem:[#allocation2 + $0x13a] sm:$0xff] }
 0x1ef   : > { %v1652_v46 = vadd.f32 %v1586_v34, %v1398_v45 }
 0x1f0   : > { %v1588_v33 = vpop.f32.mrf.mxu3 }
 0x1f1   : > { %v4264_v49 = vadd.f32 %v1840_v16, %v1652_v46  ;;  %v1337_v31 = vpop.f32.mrf.mxu2  ;;  %v2434_v46 = vld [vmem:[#allocation2 + $0x34] sm:$0xff] }
 0x1f2   : > { %v1116_v55 = vpop.f32.mrf.mxu1  ;;  %v1842_v32 = vpop.f32.mrf.mxu0 }
 0x1f3   : > { %v1117_v62 = vadd.f32 %v1116_v55, %v4149_v30  ;;  %v1725_v30 = vpack.c.bf16 %v1707_v6, %v1706_v57  ;;  %v2183_v6 = vld [vmem:[#allocation2 + $0x4b] sm:$0xff] }
 0x1f5   : > { %v1399_v15 = vadd.f32 %v1334_v17, %v1117_v62  ;;  %1630 = vmatmul.bf16.gmra.mxu3 %v1471_v28 }
 0x1f7   : > { %v1653_v11 = vadd.f32 %v1588_v33, %v1399_v15  ;;  %v2435_v33 = vld [vmem:[#allocation2 + $0x3c] sm:$0xff] }
 0x1f8   : > { %v1591_v2 = vpop.f32.mrf.mxu3  ;;  %v2470_v62 = vpack.c.bf16 %v2435_v33, %v2434_v46 }
 0x1f9   : > { %v4267_v34 = vadd.f32 %v1842_v32, %v1653_v11  ;;  %v1339_v5 = vpop.f32.mrf.mxu2  ;;  %v1927_v11 = vld [vmem:[#allocation2 + $0x2b] sm:$0xff] }
 0x1fa   : > { %v1119_v23 = vpop.f32.mrf.mxu1  ;;  %v1845_v16 = vpop.f32.mrf.mxu0 }
 0x1fb   : > { %v1120_v54 = vadd.f32 %v1119_v23, %v4162_v48  ;;  %v1926_v23 = vld [vmem:[#allocation2 + $0x23] sm:$0xff] }
 0x1fd   : > { %v1400_v17 = vadd.f32 %v1337_v31, %v1120_v54  ;;  %1158 = vmatmul.bf16.gmra.mxu1 %v782_v42  ;;  %1884 = vmatmul.bf16.gmra.mxu0 %v1725_v30  ;;  %v1962_v54 = vpack.c.bf16 %v1927_v11, %v1926_v23  ;;  %v2182_v42 = vld [vmem:[#allocation2 + $0x43] sm:$0xff] }
 0x1fe   : > { %2307 = vmatmul.bf16.vlgmr.msra.gmra.mxu2 %v4270_v35  ;;  %v2217_v30 = vpack.c.bf16 %v2183_v6, %v2182_v42 }
 0x1ff   : > { %v1654_v44 = vadd.f32 %v1591_v2, %v1400_v17 }
 0x200   : > { %v1593_v45 = vpop.f32.mrf.mxu3 }
 0x201   : > { %v4273_v53 = vadd.f32 %v1845_v16, %v1654_v44  ;;  %v1342_v13 = vpop.f32.mrf.mxu2 }
 0x202   : > { %v1121_v55 = vpop.f32.mrf.mxu1  ;;  %v1847_v32 = vpop.f32.mrf.mxu0 }
 0x203   : > { %v1122_v48 = vadd.f32 %v1121_v55, %v4174_v63  ;;  %v2724_v63 = vpack.c.bf16 %v2689_v22, %v2688_v40 }
 0x205   : > { %v1401_v28 = vadd.f32 %v1339_v5, %v1122_v48  ;;  %2561 = vmatmul.bf16.vlgmr.msra.gmra.mxu3 %v2470_v62  ;;  %v2436_v48 = vld [vmem:[#allocation2 + $0x44] sm:$0xff] }
 0x207   : > { %v1655_v15 = vadd.f32 %v1593_v45, %v1401_v28  ;;  %v2437_v45 = vld [vmem:[#allocation2 + $0x4c] sm:$0xff] }
 0x208   : > { %v1596_v31 = vpop.f32.mrf.mxu3 }
 0x209   : > { %v4276_v57 = vadd.f32 %v1847_v32, %v1655_v15  ;;  %v1344_v2 = vpop.f32.mrf.mxu2 }
 0x20a   : > { %v1124_v8 = vpop.f32.mrf.mxu1  ;;  %v1850_v47 = vpop.f32.mrf.mxu0 }
 0x20b   : > { %v1125_v16 = vadd.f32 %v1124_v8, %v4073_v19  ;;  %v2471_v19 = vpack.c.bf16 %v2437_v45, %v2436_v48 }
 0x20d   : > { %v1402_v5 = vadd.f32 %v1342_v13, %v1125_v16  ;;  %2053 = vmatmul.bf16.vlgmr.msra.gmra.mxu1 %v1962_v54  ;;  %2815 = vmatmul.bf16.vlgmr.msra.gmra.mxu0 %v2724_v63  ;;  %v2691_v13 = vld [vmem:[#allocation2 + $0x4d] sm:$0xff]  ;;  %v2185_v16 = vld [vmem:[#allocation2 + $0x5b] sm:$0xff] }
 0x20e   : > { %2312 = vmatmul.bf16.gmra.mxu2 %v2217_v30 }
 0x20f   : > { %v1656_v17 = vadd.f32 %v1596_v31, %v1402_v5  ;;  %v2184_v31 = vld [vmem:[#allocation2 + $0x53] sm:$0xff] }
 0x210   : > { %v1598_v44 = vpop.f32.mrf.mxu3  ;;  %v2218_v42 = vpack.c.bf16 %v2185_v16, %v2184_v31  ;;  %v2438_v5 = vld [vmem:[#allocation2 + $0x54] sm:$0xff] }
 0x211   : > { %v4279_v46 = vadd.f32 %v1850_v47, %v1656_v17  ;;  %v1347_v33 = vpop.f32.mrf.mxu2  ;;  %v2690_v47 = vld [vmem:[#allocation2 + $0x45] sm:$0xff] }
 0x212   : > { %v1126_v55 = vpop.f32.mrf.mxu1  ;;  %v1852_v32 = vpop.f32.mrf.mxu0  ;;  %v2725_v54 = vpack.c.bf16 %v2691_v13, %v2690_v47  ;;  %v2187_v13 = vld [vmem:[#allocation2 + $0x6b] sm:$0xff] }
 0x213   : > { %v1127_v62 = vadd.f32 %v1126_v55, %v4088_v26 }
 0x215   : > { %v1403_v28 = vadd.f32 %v1344_v2, %v1127_v62  ;;  %2566 = vmatmul.bf16.gmra.mxu3 %v2471_v19 }
 0x217   : > { %v1657_v15 = vadd.f32 %v1598_v44, %v1403_v28  ;;  %v2692_v28 = vld [vmem:[#allocation2 + $0x55] sm:$0xff] }
 0x218   : > { %v1601_v11 = vpop.f32.mrf.mxu3 }
 0x219   : > { %v4282_v40 = vadd.f32 %v1852_v32, %v1657_v15  ;;  %v1349_v22 = vpop.f32.mrf.mxu2  ;;  %v2439_v32 = vld [vmem:[#allocation2 + $0x5c] sm:$0xff] }
 0x21a   : > { %v1129_v6 = vpop.f32.mrf.mxu1  ;;  %v1855_v8 = vpop.f32.mrf.mxu0 }
 0x21b   : > { %v1130_v23 = vadd.f32 %v1129_v6, %v4095_v36  ;;  %v2472_v36 = vpack.c.bf16 %v2439_v32, %v2438_v5 }
 0x21d   : > { %v1404_v63 = vadd.f32 %v1347_v33, %v1130_v23  ;;  %2058 = vmatmul.bf16.gmra.mxu1 %v4270_v35  ;;  %2820 = vmatmul.bf16.gmra.mxu0 %v2725_v54 }
 0x21e   : > { %2317 = vmatmul.bf16.gmra.mxu2 %v2218_v42 }
 0x21f   : > { %v1658_v26 = vadd.f32 %v1601_v11, %v1404_v63  ;;  %v2186_v11 = vld [vmem:[#allocation2 + $0x63] sm:$0xff] }
 0x220   : > { %v1603_v2 = vpop.f32.mrf.mxu3  ;;  %v2219_v16 = vpack.c.bf16 %v2187_v13, %v2186_v11  ;;  %v2440_v63 = vld [vmem:[#allocation2 + $0x64] sm:$0xff] }
 0x221   : > { %v4286_v17 = vadd.f32 %v1855_v8, %v1658_v26  ;;  %v1352_v44 = vpop.f32.mrf.mxu2  ;;  %v2693_v8 = vld [vmem:[#allocation2 + $0x5d] sm:$0xff]  ;;  %v2441_v26 = vld [vmem:[#allocation2 + $0x6c] sm:$0xff] }
 0x222   : > { %v1131_v45 = vpop.f32.mrf.mxu1  ;;  %v1857_v55 = vpop.f32.mrf.mxu0  ;;  %v2726_v23 = vpack.c.bf16 %v2693_v8, %v2692_v28  ;;  %v2189_v28 = vld [vmem:[#allocation2 + $0x7b] sm:$0xff] }
 0x223   : > { %v1132_v48 = vadd.f32 %v1131_v45, %v4101_v43 }
 0x225   : > { %v1405_v62 = vadd.f32 %v1349_v22, %v1132_v48  ;;  %2571 = vmatmul.bf16.gmra.mxu3 %v2472_v36  ;;  %v2473_v48 = vpack.c.bf16 %v2441_v26, %v2440_v63 }
 0x227   : > { %v1659_v19 = vadd.f32 %v1603_v2, %v1405_v62 }
 0x228   : > { %v1606_v33 = vpop.f32.mrf.mxu3 }
 0x229   : > { %v4289_v35 = vadd.f32 %v1857_v55, %v1659_v19  ;;  %v1354_v15 = vpop.f32.mrf.mxu2 }
 0x22a   : > { %v1134_v31 = vpop.f32.mrf.mxu1  ;;  %v1860_v6 = vpop.f32.mrf.mxu0 }
 0x22b   : > { %v1135_v47 = vadd.f32 %v1134_v31, %v4107_v37 }
 0x22d   : > { %v1406_v54 = vadd.f32 %v1352_v44, %v1135_v47  ;;  %2063 = vmatmul.bf16.gmra.mxu1 %v2217_v30  ;;  %2825 = vmatmul.bf16.gmra.mxu0 %v2726_v23  ;;  %v2694_v44 = vld [vmem:[#allocation2 + $0x65] sm:$0xff]  ;;  %v2695_v30 = vld [vmem:[#allocation2 + $0x6d] sm:$0xff] }
 0x22e   : > { %2322 = vmatmul.bf16.gmra.mxu2 %v2219_v16  ;;  %v2727_v8 = vpack.c.bf16 %v2695_v30, %v2694_v44 }
 0x22f   : > { %v1660_v43 = vadd.f32 %v1606_v33, %v1406_v54  ;;  %v2443_v54 = vld [vmem:[#allocation2 + $0x7c] sm:$0xff] }
 0x230   : > { %v1608_v22 = vpop.f32.mrf.mxu3 }
 0x231   : > { %v4292_v2 = vadd.f32 %v1860_v6, %v1660_v43  ;;  %v1357_v5 = vpop.f32.mrf.mxu2  ;;  %v2188_v6 = vld [vmem:[#allocation2 + $0x73] sm:$0xff] }
 0x232   : > { %v1136_v45 = vpop.f32.mrf.mxu1  ;;  %v1862_v55 = vpop.f32.mrf.mxu0  ;;  %v2220_v47 = vpack.c.bf16 %v2189_v28, %v2188_v6  ;;  %v2696_v28 = vld [vmem:[#allocation2 + $0x75] sm:$0xff] }
 0x233   : > { %v1137_v32 = vadd.f32 %v1136_v45, %v4121_v58  ;;  %v2442_v45 = vld [vmem:[#allocation2 + $0x74] sm:$0xff] }
 0x235   : > { %v1407_v36 = vadd.f32 %v1354_v15, %v1137_v32  ;;  %2576 = vmatmul.bf16.gmra.mxu3 %v2473_v48  ;;  %v2474_v32 = vpack.c.bf16 %v2443_v54, %v2442_v45 }
 0x237   : > { %v1661_v37 = vadd.f32 %v1608_v22, %v1407_v36 }
 0x238   : > { %v1611_v62 = vpop.f32.mrf.mxu3 }
 0x239   : > { %v4295_v19 = vadd.f32 %v1862_v55, %v1661_v37  ;;  %v1359_v33 = vpop.f32.mrf.mxu2 }
 0x23a   : > { %v1139_v11 = vpop.f32.mrf.mxu1  ;;  %v1865_v13 = vpop.f32.mrf.mxu0 }
 0x23b   : > { %v1140_v31 = vadd.f32 %v1139_v11, %v4133_v4 }
 0x23d   : > { %v1408_v23 = vadd.f32 %v1357_v5, %v1140_v31  ;;  %2068 = vmatmul.bf16.gmra.mxu1 %v2218_v42  ;;  %2830 = vmatmul.bf16.gmra.mxu0 %v2727_v8  ;;  %v2697_v5 = vld [vmem:[#allocation2 + $0x7d] sm:$0xff] }
 0x23e   : > { %2327 = vmatmul.bf16.gmra.mxu2 %v2220_v47  ;;  %v2728_v31 = vpack.c.bf16 %v2697_v5, %v2696_v28  ;;  %v2193_v5 = vld [vmem:[#allocation2 + $0x9b] sm:$0xff] }
 0x23f   : > { %v1662_v58 = vadd.f32 %v1611_v62, %v1408_v23  ;;  %v2191_v62 = vld [vmem:[#allocation2 + $0x8b] sm:$0xff] }
 0x240   : > { %v1613_v15 = vpop.f32.mrf.mxu3  ;;  %v2445_v23 = vld [vmem:[#allocation2 + $0x8c] sm:$0xff] }
 0x241   : > { %v4298_v43 = vadd.f32 %v1865_v13, %v1662_v58  ;;  %v1362_v22 = vpop.f32.mrf.mxu2  ;;  %v2190_v13 = vld [vmem:[#allocation2 + $0x83] sm:$0xff] }
 0x242   : > { %v1141_v63 = vpop.f32.mrf.mxu1  ;;  %v1867_v26 = vpop.f32.mrf.mxu0  ;;  %v2221_v6 = vpack.c.bf16 %v2191_v62, %v2190_v13 }
 0x243   : > { %v1142_v55 = vadd.f32 %v1141_v63, %v4141_v12 }
 0x245   : > { %v1409_v4 = vadd.f32 %v1359_v33, %v1142_v55  ;;  %2581 = vmatmul.bf16.gmra.mxu3 %v2474_v32 }
 0x247   : > { %v1663_v48 = vadd.f32 %v1613_v15, %v1409_v4 }
 0x248   : > { %v1616_v36 = vpop.f32.mrf.mxu3 }
 0x249   : > { %v4301_v42 = vadd.f32 %v1867_v26, %v1663_v48  ;;  %v1364_v37 = vpop.f32.mrf.mxu2  ;;  %v2444_v26 = vld [vmem:[#allocation2 + $0x84] sm:$0xff] }
 0x24a   : > { %v1144_v44 = vpop.f32.mrf.mxu1  ;;  %v1870_v30 = vpop.f32.mrf.mxu0  ;;  %v2475_v55 = vpack.c.bf16 %v2445_v23, %v2444_v26 }
 0x24b   : > { %v1145_v11 = vadd.f32 %v1144_v44, %v4147_v27 }
 0x24d   : > { %v1410_v8 = vadd.f32 %v1362_v22, %v1145_v11  ;;  %2073 = vmatmul.bf16.gmra.mxu1 %v2219_v16  ;;  %2835 = vmatmul.bf16.gmra.mxu0 %v2728_v31  ;;  %v2699_v22 = vld [vmem:[#allocation2 + $0x8d] sm:$0xff] }
 0x24e   : > { %2332 = vmatmul.bf16.gmra.mxu2 %v2221_v6 }
 0x24f   : > { %v1664_v12 = vadd.f32 %v1616_v36, %v1410_v8  ;;  %v2192_v36 = vld [vmem:[#allocation2 + $0x93] sm:$0xff] }
 0x250   : > { %v1618_v33 = vpop.f32.mrf.mxu3  ;;  %v2222_v13 = vpack.c.bf16 %v2193_v5, %v2192_v36  ;;  %v2446_v8 = vld [vmem:[#allocation2 + $0x94] sm:$0xff]  ;;  %v2195_v36 = vld [vmem:[#allocation2 + $0xab] sm:$0xff] }
 0x251   : > { %v4304_v58 = vadd.f32 %v1870_v30, %v1664_v12  ;;  %v1367_v15 = vpop.f32.mrf.mxu2  ;;  %v2698_v30 = vld [vmem:[#allocation2 + $0x85] sm:$0xff]  ;;  %v2447_v12 = vld [vmem:[#allocation2 + $0x9c] sm:$0xff] }
 0x252   : > { %v1146_v54 = vpop.f32.mrf.mxu1  ;;  %v1872_v63 = vpop.f32.mrf.mxu0  ;;  %v2729_v11 = vpack.c.bf16 %v2699_v22, %v2698_v30  ;;  %v2194_v22 = vld [vmem:[#allocation2 + $0xa3] sm:$0xff] }
 0x253   : > { %v1147_v45 = vadd.f32 %v1146_v54, %v4153_v38 }
 0x255   : > { %v1411_v27 = vadd.f32 %v1364_v37, %v1147_v45  ;;  %2586 = vmatmul.bf16.gmra.mxu3 %v2475_v55  ;;  %v2476_v45 = vpack.c.bf16 %v2447_v12, %v2446_v8 }
 0x257   : > { %v1665_v32 = vadd.f32 %v1618_v33, %v1411_v27 }
 0x258   : > { %v1621_v4 = vpop.f32.mrf.mxu3 }
 0x259   : > { %v4307_v16 = vadd.f32 %v1872_v63, %v1665_v32  ;;  %v1369_v48 = vpop.f32.mrf.mxu2 }
 0x25a   : > { %v1149_v62 = vpop.f32.mrf.mxu1  ;;  %v1875_v44 = vpop.f32.mrf.mxu0 }
 0x25b   : > { %v1150_v28 = vadd.f32 %v1149_v62, %v4109_v51 }
 0x25d   : > { %v1412_v31 = vadd.f32 %v1367_v15, %v1150_v28  ;;  %2078 = vmatmul.bf16.gmra.mxu1 %v2220_v47  ;;  %2840 = vmatmul.bf16.gmra.mxu0 %v2729_v11  ;;  %v2700_v15 = vld [vmem:[#allocation2 + $0x95] sm:$0xff]  ;;  %v2701_v47 = vld [vmem:[#allocation2 + $0x9d] sm:$0xff]  ;;  %v2223_v28 = vpack.c.bf16 %v2195_v36, %v2194_v22 }
 0x25e   : > { %2337 = vmatmul.bf16.gmra.mxu2 %v2222_v13  ;;  %v2730_v30 = vpack.c.bf16 %v2701_v47, %v2700_v15  ;;  %v2197_v15 = vld [vmem:[#allocation2 + $0xbb] sm:$0xff] }
 0x25f   : > { %v1666_v38 = vadd.f32 %v1621_v4, %v1412_v31  ;;  %v2448_v31 = vld [vmem:[#allocation2 + $0xa4] sm:$0xff] }
 0x260   : > { %v1623_v37 = vpop.f32.mrf.mxu3 }
 0x261   : > { %v4310_v33 = vadd.f32 %v1875_v44, %v1666_v38  ;;  %v1372_v23 = vpop.f32.mrf.mxu2  ;;  %v2449_v38 = vld [vmem:[#allocation2 + $0xac] sm:$0xff] }
 0x262   : > { %v1151_v54 = vpop.f32.mrf.mxu1  ;;  %v1877_v63 = vpop.f32.mrf.mxu0 }
 0x263   : > { %v1152_v26 = vadd.f32 %v1151_v54, %v4126_v3 }
 0x265   : > { %v1413_v55 = vadd.f32 %v1369_v48, %v1152_v26  ;;  %2591 = vmatmul.bf16.gmra.mxu3 %v2476_v45  ;;  %v2477_v26 = vpack.c.bf16 %v2449_v38, %v2448_v31 }
 0x267   : > { %v1667_v51 = vadd.f32 %v1623_v37, %v1413_v55 }
 0x268   : > { %v1626_v27 = vpop.f32.mrf.mxu3 }
 0x269   : > { %v4313_v32 = vadd.f32 %v1877_v63, %v1667_v51  ;;  %v1374_v4 = vpop.f32.mrf.mxu2 }
 0x26a   : > { %v1154_v5 = vpop.f32.mrf.mxu1  ;;  %v1880_v62 = vpop.f32.mrf.mxu0 }
 0x26b   : > { %v1155_v44 = vadd.f32 %v1154_v5, %v4137_v10  ;;  %v2196_v5 = vld [vmem:[#allocation2 + $0xb3] sm:$0xff] }
 0x26d   : > { %v1414_v11 = vadd.f32 %v1372_v23, %v1155_v44  ;;  %2083 = vmatmul.bf16.gmra.mxu1 %v2221_v6  ;;  %2845 = vmatmul.bf16.gmra.mxu0 %v2730_v30  ;;  %v2702_v23 = vld [vmem:[#allocation2 + $0xa5] sm:$0xff]  ;;  %v2703_v6 = vld [vmem:[#allocation2 + $0xad] sm:$0xff]  ;;  %v4322_v44 = vpack.c.bf16 %v2197_v15, %v2196_v5  ;;  %v2704_v15 = vld [vmem:[#allocation2 + $0xb5] sm:$0xff] }
 0x26e   : > { %2342 = vmatmul.bf16.gmra.mxu2 %v2223_v28 }
 0x26f   : > { %v1668_v3 = vadd.f32 %v1626_v27, %v1414_v11  ;;  %v2451_v11 = vld [vmem:[#allocation2 + $0xbc] sm:$0xff] }
 0x270   : > { %v1628_v48 = vpop.f32.mrf.mxu3 }
 0x271   : > { %v4316_v37 = vadd.f32 %v1880_v62, %v1668_v3  ;;  %v1377_v8 = vpop.f32.mrf.mxu2  ;;  %v2731_v62 = vpack.c.bf16 %v2703_v6, %v2702_v23 }
 0x272   : > { %v1156_v12 = vpop.f32.mrf.mxu1  ;;  %v1882_v54 = vpop.f32.mrf.mxu0 }
 0x273   : > { %v1157_v63 = vadd.f32 %v1156_v12, %v4145_v25  ;;  %v2450_v12 = vld [vmem:[#allocation2 + $0xb4] sm:$0xff] }
 0x275   : > { %v1415_v45 = vadd.f32 %v1374_v4, %v1157_v63  ;;  %2596 = vmatmul.bf16.gmra.mxu3 %v2477_v26  ;;  %v2705_v26 = vld [vmem:[#allocation2 + $0xbd] sm:$0xff] }
 0x277   : > { %v1669_v10 = vadd.f32 %v1628_v48, %v1415_v45 }
 0x278   : > { %v1631_v55 = vpop.f32.mrf.mxu3 }
 0x279   : > { %v4319_v51 = vadd.f32 %v1882_v54, %v1669_v10  ;;  %v1379_v27 = vpop.f32.mrf.mxu2  ;;  %v2478_v54 = vpack.c.bf16 %v2451_v11, %v2450_v12 }
 0x27a   : > { %v1159_v47 = vpop.f32.mrf.mxu1  ;;  %v1885_v22 = vpop.f32.mrf.mxu0 }
 0x27b   : > { %v1160_v36 = vadd.f32 %v1159_v47, %v4155_v39 }
 0x27d   : > { %v1416_v25 = vadd.f32 %v1377_v8, %v1160_v36  ;;  %2088 = vmatmul.bf16.gmra.mxu1 %v2222_v13  ;;  %2850 = vmatmul.bf16.gmra.mxu0 %v2731_v62  ;;  %v2732_v36 = vpack.c.bf16 %v2705_v26, %v2704_v15  ;;  %v2201_v26 = vld [vmem:[#allocation2 + $0xdb] sm:$0xff] }
 0x27e   : > { %2347 = vmatmul.bf16.gmra.mxu2 %v4322_v44 }
 0x27f   : > { %v1670_v4 = vadd.f32 %v1631_v55, %v1416_v25  ;;  %v2199_v55 = vld [vmem:[#allocation2 + $0xcb] sm:$0xff] }
 0x280   : > { %v1633_v30 = vpop.f32.mrf.mxu3  ;;  %v2453_v25 = vld [vmem:[#allocation2 + $0xcc] sm:$0xff] }
 0x281   : > { %v4325_v3 = vadd.f32 %v1885_v22, %v1670_v4  ;;  %v2308_v48 = vpop.f32.mrf.mxu2  ;;  %v2198_v22 = vld [vmem:[#allocation2 + $0xc3] sm:$0xff] }
 0x282   : > { %v1161_v31 = vpop.f32.mrf.mxu1  ;;  %v1887_v38 = vpop.f32.mrf.mxu0 }
 0x283   : > { %v1162_v39 = vadd.f32 %v1161_v31, %v4164_v52  ;;  %v4332_v52 = vpack.c.bf16 %v2199_v55, %v2198_v22  ;;  %v2452_v31 = vld [vmem:[#allocation2 + $0xc4] sm:$0xff] }
 0x285   : > { %v1417_v63 = vadd.f32 %v1379_v27, %v1162_v39  ;;  %2601 = vmatmul.bf16.gmra.mxu3 %v2478_v54  ;;  %v2707_v54 = vld [vmem:[#allocation2 + $0xcd] sm:$0xff] }
 0x287   : > { %v1671_v8 = vadd.f32 %v1633_v30, %v1417_v63 }
 0x288   : > { %v2562_v13 = vpop.f32.mrf.mxu3 }
 0x289   : > { %v4328_v45 = vadd.f32 %v1887_v38, %v1671_v8  ;;  %v2310_v10 = vpop.f32.mrf.mxu2 }
 0x28a   : > { %v2054_v23 = vpop.f32.mrf.mxu1  ;;  %v2816_v6 = vpop.f32.mrf.mxu0 }
 0x28b   : > { %v2144_v47 = vadd.f32 %v2054_v23, %v4180_v41 }
 0x28d   : > { %v2398_v5 = vadd.f32 %v2308_v48, %v2144_v47  ;;  %2093 = vmatmul.bf16.gmra.mxu1 %v2223_v28  ;;  %2855 = vmatmul.bf16.gmra.mxu0 %v2732_v36  ;;  %v2479_v48 = vpack.c.bf16 %v2453_v25, %v2452_v31 }
 0x28e   : > { %2352 = vmatmul.bf16.gmra.mxu2 %v4332_v52 }
 0x28f   : > { %v2652_v27 = vadd.f32 %v2562_v13, %v2398_v5  ;;  %v2200_v13 = vld [vmem:[#allocation2 + $0xd3] sm:$0xff] }
 0x290   : > { %v2564_v62 = vpop.f32.mrf.mxu3  ;;  %v4344_v22 = vpack.c.bf16 %v2201_v26, %v2200_v13  ;;  %v2454_v5 = vld [vmem:[#allocation2 + $0xd4] sm:$0xff]  ;;  %v2202_v26 = vld [vmem:[#allocation2 + $0xe3] sm:$0xff] }
 0x291   : > { %v2906_v41 = vadd.f32 %v2816_v6, %v2652_v27  ;;  %v2313_v4 = vpop.f32.mrf.mxu2  ;;  %v2706_v6 = vld [vmem:[#allocation2 + $0xc5] sm:$0xff]  ;;  %v2455_v27 = vld [vmem:[#allocation2 + $0xdc] sm:$0xff] }
 0x292   : > { %v2056_v30 = vpop.f32.mrf.mxu1  ;;  %v2818_v11 = vpop.f32.mrf.mxu0  ;;  %v2733_v47 = vpack.c.bf16 %v2707_v54, %v2706_v6 }
 0x293   : > { %2942 = vst [vmem:[%s4338_s6] sm:$0xff] %v2906_v41  ;;  %v2145_v28 = vadd.f32 %v2056_v30, %v4183_v1 }
 0x295   : > { %v2399_v38 = vadd.f32 %v2310_v10, %v2145_v28  ;;  %2606 = vmatmul.bf16.gmra.mxu3 %v2479_v48  ;;  %v2708_v28 = vld [vmem:[#allocation2 + $0xd5] sm:$0xff]  ;;  %v2709_v48 = vld [vmem:[#allocation2 + $0xdd] sm:$0xff] }
 0x297   : > { %v2653_v12 = vadd.f32 %v2564_v62, %v2399_v38 }
 0x298   : > { %v2567_v39 = vpop.f32.mrf.mxu3 }
 0x299   : > { %v2907_v63 = vadd.f32 %v2818_v11, %v2653_v12  ;;  %v2315_v8 = vpop.f32.mrf.mxu2  ;;  %v2480_v11 = vpack.c.bf16 %v2455_v27, %v2454_v5 }
 0x29a   : > { %v2059_v55 = vpop.f32.mrf.mxu1  ;;  %v2821_v23 = vpop.f32.mrf.mxu0 }
 0x29b   : > { %2943 = vst [vmem:[%s4338_s6 + $0x8] sm:$0xff] %v2907_v63  ;;  %v2146_v15 = vadd.f32 %v2059_v55, %v4186_v24  ;;  %v2734_v55 = vpack.c.bf16 %v2709_v48, %v2708_v28  ;;  %v2205_v48 = vld [vmem:[#allocation2 + $0xfb] sm:$0xff] }
 0x29d   : > { %v2400_v1 = vadd.f32 %v2313_v4, %v2146_v15  ;;  %2098 = vmatmul.bf16.gmra.mxu1 %v4322_v44  ;;  %2860 = vmatmul.bf16.gmra.mxu0 %v2733_v47  ;;  %v2457_v15 = vld [vmem:[#allocation2 + $0xec] sm:$0xff] }
 0x29e   : > { %2357 = vmatmul.bf16.gmra.mxu2 %v4344_v22 }
 0x29f   : > { %v2654_v10 = vadd.f32 %v2567_v39, %v2400_v1  ;;  %v2203_v39 = vld [vmem:[#allocation2 + $0xeb] sm:$0xff] }
 0x2a0   : > { %v2569_v36 = vpop.f32.mrf.mxu3 }
 0x2a1   : > { %v2908_v62 = vadd.f32 %v2821_v23, %v2654_v10  ;;  %v2318_v25 = vpop.f32.mrf.mxu2  ;;  %v4352_v23 = vpack.c.bf16 %v2203_v39, %v2202_v26 }
 0x2a2   : > { %v2061_v41 = vpop.f32.mrf.mxu1  ;;  %v2823_v30 = vpop.f32.mrf.mxu0 }
 0x2a3   : > { %2944 = vst [vmem:[%s4338_s6 + $0x10] sm:$0xff] %v2908_v62  ;;  %v2147_v24 = vadd.f32 %v2061_v41, %v4198_v56  ;;  %v2711_v41 = vld [vmem:[#allocation2 + $0xed] sm:$0xff] }
 0x2a5   : > { %v2401_v31 = vadd.f32 %v2315_v8, %v2147_v24  ;;  %2611 = vmatmul.bf16.gmra.mxu3 %v2480_v11  ;;  %v2204_v11 = vld [vmem:[#allocation2 + $0xf3] sm:$0xff] }
 0x2a6   : > { %v4360_v39 = vpack.c.bf16 %v2205_v48, %v2204_v11 }
 0x2a7   : > { %v2655_v4 = vadd.f32 %v2569_v36, %v2401_v31 }
 0x2a8   : > { %v2572_v44 = vpop.f32.mrf.mxu3 }
 0x2a9   : > { %v2909_v38 = vadd.f32 %v2823_v30, %v2655_v4  ;;  %v2320_v12 = vpop.f32.mrf.mxu2 }
 0x2aa   : > { %v2064_v54 = vpop.f32.mrf.mxu1  ;;  %v2826_v63 = vpop.f32.mrf.mxu0 }
 0x2ab   : > { %2945 = vst [vmem:[%s4338_s6 + $0x18] sm:$0xff] %v2909_v38  ;;  %v2148_v13 = vadd.f32 %v2064_v54, %v4204_v29  ;;  %v2456_v29 = vld [vmem:[#allocation2 + $0xe4] sm:$0xff] }
 0x2ac   : > { %v2481_v27 = vpack.c.bf16 %v2457_v15, %v2456_v29  ;;  %v2207_v29 = vld [vmem:[#allocation2 + $0x10b] sm:$0xff] }
 0x2ad   : > { %v2402_v56 = vadd.f32 %v2318_v25, %v2148_v13  ;;  %2103 = vmatmul.bf16.gmra.mxu1 %v4332_v52  ;;  %2865 = vmatmul.bf16.gmra.mxu0 %v2734_v55 }
 0x2ae   : > { %2362 = vmatmul.bf16.gmra.mxu2 %v4352_v23 }
 0x2af   : > { %v2656_v8 = vadd.f32 %v2572_v44, %v2402_v56  ;;  %v2710_v44 = vld [vmem:[#allocation2 + $0xe5] sm:$0xff] }
 0x2b0   : > { %v2574_v6 = vpop.f32.mrf.mxu3  ;;  %v2735_v38 = vpack.c.bf16 %v2711_v41, %v2710_v44 }
 0x2b1   : > { %v2910_v47 = vadd.f32 %v2826_v63, %v2656_v8  ;;  %v2323_v1 = vpop.f32.mrf.mxu2  ;;  %v2458_v63 = vld [vmem:[#allocation2 + $0xf4] sm:$0xff] }
 0x2b2   : > { %v2066_v10 = vpop.f32.mrf.mxu1  ;;  %v2828_v36 = vpop.f32.mrf.mxu0 }
 0x2b3   : > { %2946 = vst [vmem:[%s4338_s6 + $0x20] sm:$0xff] %v2910_v47  ;;  %v2149_v5 = vadd.f32 %v2066_v10, %v4207_v60 }
 0x2b5   : > { %v2403_v62 = vadd.f32 %v2320_v12, %v2149_v5  ;;  %2616 = vmatmul.bf16.gmra.mxu3 %v2481_v27 }
 0x2b7   : > { %v2657_v25 = vadd.f32 %v2574_v6, %v2403_v62  ;;  %v2713_v62 = vld [vmem:[#allocation2 + $0xfd] sm:$0xff] }
 0x2b8   : > { %v2577_v52 = vpop.f32.mrf.mxu3 }
 0x2b9   : > { %v2911_v30 = vadd.f32 %v2828_v36, %v2657_v25  ;;  %v2325_v24 = vpop.f32.mrf.mxu2 }
 0x2ba   : > { %v2069_v31 = vpop.f32.mrf.mxu1  ;;  %v2831_v4 = vpop.f32.mrf.mxu0 }
 0x2bb   : > { %2947 = vst [vmem:[%s4338_s6 + $0x28] sm:$0xff] %v2911_v30  ;;  %v2150_v28 = vadd.f32 %v2069_v31, %v4210_v0  ;;  %v2459_v0 = vld [vmem:[#allocation2 + $0xfc] sm:$0xff]  ;;  %v2461_v31 = vld [vmem:[#allocation2 + $0x10c] sm:$0xff] }
 0x2bc   : > { %v2482_v6 = vpack.c.bf16 %v2459_v0, %v2458_v63  ;;  %v2715_v63 = vld [vmem:[#allocation2 + $0x10d] sm:$0xff] }
 0x2bd   : > { %v2404_v60 = vadd.f32 %v2323_v1, %v2150_v28  ;;  %2108 = vmatmul.bf16.gmra.mxu1 %v4344_v22  ;;  %2870 = vmatmul.bf16.gmra.mxu0 %v2735_v38  ;;  %v2712_v1 = vld [vmem:[#allocation2 + $0xf5] sm:$0xff] }
 0x2be   : > { %2367 = vmatmul.bf16.gmra.mxu2 %v4360_v39  ;;  %v2736_v41 = vpack.c.bf16 %v2713_v62, %v2712_v1 }
 0x2bf   : > { %v2658_v12 = vadd.f32 %v2577_v52, %v2404_v60  ;;  %v2206_v52 = vld [vmem:[#allocation2 + $0x103] sm:$0xff] }
 0x2c0   : > { %v2579_v54 = vpop.f32.mrf.mxu3  ;;  %v4368_v30 = vpack.c.bf16 %v2207_v29, %v2206_v52 }
 0x2c1   : > { %v2912_v13 = vadd.f32 %v2831_v4, %v2658_v12  ;;  %v2328_v26 = vpop.f32.mrf.mxu2 }
 0x2c2   : > { %v2071_v55 = vpop.f32.mrf.mxu1  ;;  %v2833_v56 = vpop.f32.mrf.mxu0 }
 0x2c3   : > { %2948 = vst [vmem:[%s4338_s6 + $0x30] sm:$0xff] %v2912_v13  ;;  %v2151_v8 = vadd.f32 %v2071_v55, %v4216_v50  ;;  %v2209_v55 = vld [vmem:[#allocation2 + $0x11b] sm:$0xff] }
 0x2c5   : > { %v2405_v15 = vadd.f32 %v2325_v24, %v2151_v8  ;;  %2621 = vmatmul.bf16.gmra.mxu3 %v2482_v6  ;;  %v2714_v8 = vld [vmem:[#allocation2 + $0x105] sm:$0xff] }
 0x2c7   : > { %v2659_v47 = vadd.f32 %v2579_v54, %v2405_v15  ;;  %v2208_v15 = vld [vmem:[#allocation2 + $0x113] sm:$0xff] }
 0x2c8   : > { %v2582_v22 = vpop.f32.mrf.mxu3 }
 0x2c9   : > { %v2913_v10 = vadd.f32 %v2833_v56, %v2659_v47  ;;  %v2330_v36 = vpop.f32.mrf.mxu2  ;;  %v2737_v47 = vpack.c.bf16 %v2715_v63, %v2714_v8  ;;  %v2465_v63 = vld [vmem:[#allocation2 + $0x12c] sm:$0xff] }
 0x2ca   : > { %v2074_v5 = vpop.f32.mrf.mxu1  ;;  %v2836_v27 = vpop.f32.mrf.mxu0 }
 0x2cb   : > { %2949 = vst [vmem:[%s4338_s6 + $0x38] sm:$0xff] %v2913_v10  ;;  %v2152_v25 = vadd.f32 %v2074_v5, %v4225_v61  ;;  %v2460_v61 = vld [vmem:[#allocation2 + $0x104] sm:$0xff] }
 0x2cc   : > { %v2483_v60 = vpack.c.bf16 %v2461_v31, %v2460_v61 }
 0x2cd   : > { %v2406_v50 = vadd.f32 %v2328_v26, %v2152_v25  ;;  %2113 = vmatmul.bf16.gmra.mxu1 %v4352_v23  ;;  %2875 = vmatmul.bf16.gmra.mxu0 %v2736_v41 }
 0x2ce   : > { %2372 = vmatmul.bf16.gmra.mxu2 %v4368_v30 }
 0x2cf   : > { %v2660_v24 = vadd.f32 %v2582_v22, %v2406_v50  ;;  %v4376_v22 = vpack.c.bf16 %v2209_v55, %v2208_v15 }
 0x2d0   : > { %v2584_v11 = vpop.f32.mrf.mxu3 }
 0x2d1   : > { %v2914_v4 = vadd.f32 %v2836_v27, %v2660_v24  ;;  %v2333_v44 = vpop.f32.mrf.mxu2  ;;  %v2717_v24 = vld [vmem:[#allocation2 + $0x11d] sm:$0xff] }
 0x2d2   : > { %v2076_v28 = vpop.f32.mrf.mxu1  ;;  %v2838_v48 = vpop.f32.mrf.mxu0 }
 0x2d3   : > { %2950 = vst [vmem:[%s4338_s6 + $0x40] sm:$0xff] %v2914_v4  ;;  %v2153_v38 = vadd.f32 %v2076_v28, %v4231_v7  ;;  %v2211_v4 = vld [vmem:[#allocation2 + $0x12b] sm:$0xff] }
 0x2d5   : > { %v2407_v12 = vadd.f32 %v2330_v36, %v2153_v38  ;;  %2626 = vmatmul.bf16.gmra.mxu3 %v2483_v60  ;;  %v2463_v36 = vld [vmem:[#allocation2 + $0x11c] sm:$0xff] }
 0x2d6   : > { %v2210_v38 = vld [vmem:[#allocation2 + $0x123] sm:$0xff] }
 0x2d7   : > { %v2661_v54 = vadd.f32 %v2584_v11, %v2407_v12  ;;  %v4384_v12 = vpack.c.bf16 %v2211_v4, %v2210_v38  ;;  %v2721_v38 = vld [vmem:[#allocation2 + $0x13d] sm:$0xff] }
 0x2d8   : > { %v2587_v23 = vpop.f32.mrf.mxu3 }
 0x2d9   : > { %v2915_v13 = vadd.f32 %v2838_v48, %v2661_v54  ;;  %v2335_v26 = vpop.f32.mrf.mxu2  ;;  %v2716_v48 = vld [vmem:[#allocation2 + $0x115] sm:$0xff] }
 0x2da   : > { %v2079_v56 = vpop.f32.mrf.mxu1  ;;  %v2841_v0 = vpop.f32.mrf.mxu0  ;;  %v2738_v60 = vpack.c.bf16 %v2717_v24, %v2716_v48 }
 0x2db   : > { %2951 = vst [vmem:[%s4338_s6 + $0x48] sm:$0xff] %v2915_v13  ;;  %v2154_v6 = vadd.f32 %v2079_v56, %v4234_v14  ;;  %v2462_v14 = vld [vmem:[#allocation2 + $0x114] sm:$0xff] }
 0x2dc   : > { %v2484_v52 = vpack.c.bf16 %v2463_v36, %v2462_v14  ;;  %v2213_v36 = vld [vmem:[#allocation2 + $0x13b] sm:$0xff] }
 0x2dd   : > { %v2408_v7 = vadd.f32 %v2333_v44, %v2154_v6  ;;  %2118 = vmatmul.bf16.gmra.mxu1 %v4360_v39  ;;  %2880 = vmatmul.bf16.gmra.mxu0 %v2737_v47  ;;  %v2719_v47 = vld [vmem:[#allocation2 + $0x12d] sm:$0xff] }
 0x2de   : > { %2377 = vmatmul.bf16.gmra.mxu2 %v4376_v22 }
 0x2df   : > { %v2662_v1 = vadd.f32 %v2587_v23, %v2408_v7 }
 0x2e0   : > { %v2589_v10 = vpop.f32.mrf.mxu3 }
 0x2e1   : > { %v2916_v29 = vadd.f32 %v2841_v0, %v2662_v1  ;;  %v2338_v5 = vpop.f32.mrf.mxu2  ;;  %v2464_v0 = vld [vmem:[#allocation2 + $0x124] sm:$0xff] }
 0x2e2   : > { %v2081_v27 = vpop.f32.mrf.mxu1  ;;  %v2843_v62 = vpop.f32.mrf.mxu0  ;;  %v2485_v8 = vpack.c.bf16 %v2465_v63, %v2464_v0 }
 0x2e3   : > { %2952 = vst [vmem:[%s4338_s6 + $0x50] sm:$0xff] %v2916_v29  ;;  %v2155_v25 = vadd.f32 %v2081_v27, %v4237_v20  ;;  %v2718_v27 = vld [vmem:[#allocation2 + $0x125] sm:$0xff] }
 0x2e4   : > { %v2739_v14 = vpack.c.bf16 %v2719_v47, %v2718_v27 }
 0x2e5   : > { %v2409_v41 = vadd.f32 %v2335_v26, %v2155_v25  ;;  %2631 = vmatmul.bf16.gmra.mxu3 %v2484_v52 }
 0x2e7   : > { %v2663_v50 = vadd.f32 %v2589_v10, %v2409_v41  ;;  %v2212_v10 = vld [vmem:[#allocation2 + $0x133] sm:$0xff] }
 0x2e8   : > { %v2592_v39 = vpop.f32.mrf.mxu3  ;;  %v2232_v25 = vpack.c.bf16 %v2213_v36, %v2212_v10 }
 0x2e9   : > { %v2917_v11 = vadd.f32 %v2843_v62, %v2663_v50  ;;  %v2340_v31 = vpop.f32.mrf.mxu2  ;;  %v2466_v50 = vld [vmem:[#allocation2 + $0x134] sm:$0xff] }
 0x2ea   : > { %v2084_v44 = vpop.f32.mrf.mxu1  ;;  %v2846_v28 = vpop.f32.mrf.mxu0 }
 0x2eb   : > { %2953 = vst [vmem:[%s4338_s6 + $0x58] sm:$0xff] %v2917_v11  ;;  %v2156_v61 = vadd.f32 %v2084_v44, %v4249_v18 }
 0x2ed   : > { %v2410_v20 = vadd.f32 %v2338_v5, %v2156_v61  ;;  %2123 = vmatmul.bf16.gmra.mxu1 %v4368_v30  ;;  %2885 = vmatmul.bf16.gmra.mxu0 %v2738_v60 }
 0x2ee   : > { %2382 = vmatmul.bf16.gmra.mxu2 %v4384_v12 }
 0x2ef   : > { %v2664_v54 = vadd.f32 %v2592_v39, %v2410_v20  ;;  %v2467_v39 = vld [vmem:[#allocation2 + $0x13c] sm:$0xff] }
 0x2f0   : > { %v2594_v23 = vpop.f32.mrf.mxu3 }
 0x2f1   : > { %v2918_v13 = vadd.f32 %v2846_v28, %v2664_v54  ;;  %v2343_v26 = vpop.f32.mrf.mxu2  ;;  %v2214_v54 = vld [vmem:[#allocation2 + $0x143] sm:$0xff] }
 0x2f2   : > { %v2086_v55 = vpop.f32.mrf.mxu1  ;;  %v2848_v56 = vpop.f32.mrf.mxu0 }
 0x2f3   : > { %2954 = vst [vmem:[%s4338_s6 + $0x60] sm:$0xff] %v2918_v13  ;;  %v2157_v18 = vadd.f32 %v2086_v55, %v4255_v21 }
 0x2f5   : > { %v2411_v6 = vadd.f32 %v2340_v31, %v2157_v18  ;;  %2636 = vmatmul.bf16.gmra.mxu3 %v2485_v8  ;;  %v2468_v8 = vld [vmem:[#allocation2 + $0x144] sm:$0xff] }
 0x2f7   : > { %v2665_v15 = vadd.f32 %v2594_v23, %v2411_v6  ;;  %v2215_v23 = vld [vmem:[#allocation2 + $0x14b] sm:$0xff] }
 0x2f8   : > { %v2597_v30 = vpop.f32.mrf.mxu3  ;;  %v2469_v6 = vld [vmem:[#allocation2 + $0x14c] sm:$0xff] }
 0x2f9   : > { %v2919_v7 = vadd.f32 %v2848_v56, %v2665_v15  ;;  %v2345_v1 = vpop.f32.mrf.mxu2  ;;  %v2233_v56 = vpack.c.bf16 %v2215_v23, %v2214_v54 }
 0x2fa   : > { %v2089_v29 = vpop.f32.mrf.mxu1  ;;  %v2851_v5 = vpop.f32.mrf.mxu0 }
 0x2fb   : > { %2955 = vst [vmem:[%s4338_s6 + $0x68] sm:$0xff] %v2919_v7  ;;  %v2158_v62 = vadd.f32 %v2089_v29, %v4258_v59  ;;  %v2486_v59 = vpack.c.bf16 %v2467_v39, %v2466_v50 }
 0x2fd   : > { %v2412_v21 = vadd.f32 %v2343_v26, %v2158_v62  ;;  %2128 = vmatmul.bf16.gmra.mxu1 %v4376_v22  ;;  %2890 = vmatmul.bf16.gmra.mxu0 %v2739_v14  ;;  %v2720_v22 = vld [vmem:[#allocation2 + $0x135] sm:$0xff] }
 0x2fe   : > { %2387 = vmatmul.bf16.gmra.mxu2 %v2232_v25  ;;  %v2740_v55 = vpack.c.bf16 %v2721_v38, %v2720_v22 }
 0x2ff   : > { %v2666_v52 = vadd.f32 %v2597_v30, %v2412_v21 }
 0x300   : > { %v2599_v41 = vpop.f32.mrf.mxu3 }
 0x301   : > { %v2920_v24 = vadd.f32 %v2851_v5, %v2666_v52  ;;  %v2348_v11 = vpop.f32.mrf.mxu2  ;;  %v2723_v5 = vld [vmem:[#allocation2 + $0x14d] sm:$0xff] }
 0x302   : > { %v2091_v31 = vpop.f32.mrf.mxu1  ;;  %v2853_v4 = vpop.f32.mrf.mxu0 }
 0x303   : > { %2956 = vst [vmem:[%s4338_s6 + $0x70] sm:$0xff] %v2920_v24  ;;  %v2159_v44 = vadd.f32 %v2091_v31, %v4261_v9 }
 0x305   : > { %v2413_v28 = vadd.f32 %v2345_v1, %v2159_v44  ;;  %2641 = vmatmul.bf16.gmra.mxu3 %v2486_v59 }
 0x307   : > { %v2667_v48 = vadd.f32 %v2599_v41, %v2413_v28 }
 0x308   : > { %v2602_v61 = vpop.f32.mrf.mxu3 }
 0x309   : > { %v2921_v60 = vadd.f32 %v2853_v4, %v2667_v48  ;;  %v2350_v20 = vpop.f32.mrf.mxu2 }
 0x30a   : > { %v2094_v63 = vpop.f32.mrf.mxu1  ;;  %v2856_v13 = vpop.f32.mrf.mxu0 }
 0x30b   : > { %2957 = vst [vmem:[%s4338_s6 + $0x78] sm:$0xff] %v2921_v60  ;;  %v2160_v26 = vadd.f32 %v2094_v63, %v4264_v49  ;;  %v2487_v49 = vpack.c.bf16 %v2469_v6, %v2468_v8 }
 0x30d   : > { %v2414_v9 = vadd.f32 %v2348_v11, %v2160_v26  ;;  %2133 = vmatmul.bf16.gmra.mxu1 %v4384_v12  ;;  %2895 = vmatmul.bf16.gmra.mxu0 %v2740_v55  ;;  %v2722_v12 = vld [vmem:[#allocation2 + $0x145] sm:$0xff] }
 0x30e   : > { %2392 = vmatmul.bf16.gmra.mxu2 %v2233_v56  ;;  %v2741_v41 = vpack.c.bf16 %v2723_v5, %v2722_v12 }
 0x30f   : > { %v2668_v0 = vadd.f32 %v2602_v61, %v2414_v9 }
 0x310   : > { %v2604_v18 = vpop.f32.mrf.mxu3 }
 0x311   : > { %v2922_v15 = vadd.f32 %v2856_v13, %v2668_v0  ;;  %v2353_v30 = vpop.f32.mrf.mxu2 }
 0x312   : > { %v2096_v47 = vpop.f32.mrf.mxu1  ;;  %v2858_v7 = vpop.f32.mrf.mxu0 }
 0x313   : > { %2958 = vst [vmem:[%s4338_s6 + $0x80] sm:$0xff] %v2922_v15  ;;  %v2161_v1 = vadd.f32 %v2096_v47, %v4267_v34 }
 0x315   : > { %v2415_v10 = vadd.f32 %v2350_v20, %v2161_v1  ;;  %2646 = vmatmul.bf16.gmra.mxu3 %v2487_v49 }
 0x317   : > { %v2669_v36 = vadd.f32 %v2604_v18, %v2415_v10 }
 0x318   : > { %v2607_v29 = vpop.f32.mrf.mxu3 }
 0x319   : > { %v2923_v27 = vadd.f32 %v2858_v7, %v2669_v36  ;;  %v2355_v62 = vpop.f32.mrf.mxu2 }
 0x31a   : > { %v2099_v14 = vpop.f32.mrf.mxu1  ;;  %v2861_v21 = vpop.f32.mrf.mxu0 }
 0x31b   : > { %2959 = vst [vmem:[%s4338_s6 + $0x88] sm:$0xff] %v2923_v27  ;;  %v2162_v52 = vadd.f32 %v2099_v14, %v4273_v53 }
 0x31d   : > { %v2416_v50 = vadd.f32 %v2353_v30, %v2162_v52  ;;  %2138 = vmatmul.bf16.gmra.mxu1 %v2232_v25  ;;  %2900 = vmatmul.bf16.gmra.mxu0 %v2741_v41 }
 0x31f   : > { %v2670_v34 = vadd.f32 %v2607_v29, %v2416_v50 }
 0x320   : > { %v2609_v39 = vpop.f32.mrf.mxu3 }
 0x321   : > { %v2924_v24 = vadd.f32 %v2861_v21, %v2670_v34  ;;  %v2358_v11 = vpop.f32.mrf.mxu2 }
 0x322   : > { %v2101_v31 = vpop.f32.mrf.mxu1  ;;  %v2863_v4 = vpop.f32.mrf.mxu0 }
 0x323   : > { %2960 = vst [vmem:[%s4338_s6 + $0x90] sm:$0xff] %v2924_v24  ;;  %v2163_v44 = vadd.f32 %v2101_v31, %v4276_v57 }
 0x325   : > { %v2417_v59 = vadd.f32 %v2355_v62, %v2163_v44 }
 0x327   : > { %v2671_v28 = vadd.f32 %v2609_v39, %v2417_v59 }
 0x328   : > { %v2612_v48 = vpop.f32.mrf.mxu3 }
 0x329   : > { %v2925_v61 = vadd.f32 %v2863_v4, %v2671_v28  ;;  %v2360_v53 = vpop.f32.mrf.mxu2 }
 0x32a   : > { %v2104_v22 = vpop.f32.mrf.mxu1  ;;  %v2866_v38 = vpop.f32.mrf.mxu0 }
 0x32b   : > { %2961 = vst [vmem:[%s4338_s6 + $0x98] sm:$0xff] %v2925_v61  ;;  %v2164_v25 = vadd.f32 %v2104_v22, %v4279_v46 }
 0x32d   : > { %v2418_v60 = vadd.f32 %v2358_v11, %v2164_v25 }
 0x32f   : > { %v2672_v20 = vadd.f32 %v2612_v48, %v2418_v60 }
 0x330   : > { %v2614_v54 = vpop.f32.mrf.mxu3 }
 0x331   : > { %v2926_v23 = vadd.f32 %v2866_v38, %v2672_v20  ;;  %v2363_v63 = vpop.f32.mrf.mxu2 }
 0x332   : > { %v2106_v13 = vpop.f32.mrf.mxu1  ;;  %v2868_v26 = vpop.f32.mrf.mxu0 }
 0x333   : > { %2962 = vst [vmem:[%s4338_s6 + $0xa0] sm:$0xff] %v2926_v23  ;;  %v2165_v57 = vadd.f32 %v2106_v13, %v4282_v40 }
 0x335   : > { %v2419_v55 = vadd.f32 %v2360_v53, %v2165_v57 }
 0x337   : > { %v2673_v56 = vadd.f32 %v2614_v54, %v2419_v55 }
 0x338   : > { %v2617_v9 = vpop.f32.mrf.mxu3 }
 0x339   : > { %v2927_v0 = vadd.f32 %v2868_v26, %v2673_v56  ;;  %v2365_v18 = vpop.f32.mrf.mxu2 }
 0x33a   : > { %v2109_v8 = vpop.f32.mrf.mxu1  ;;  %v2871_v6 = vpop.f32.mrf.mxu0 }
 0x33b   : > { %2963 = vst [vmem:[%s4338_s6 + $0xa8] sm:$0xff] %v2927_v0  ;;  %v2166_v46 = vadd.f32 %v2109_v8, %v4286_v17 }
 0x33d   : > { %v2420_v15 = vadd.f32 %v2363_v63, %v2166_v46 }
 0x33f   : > { %v2674_v30 = vadd.f32 %v2617_v9, %v2420_v15 }
 0x340   : > { %v2619_v47 = vpop.f32.mrf.mxu3 }
 0x341   : > { %v2928_v7 = vadd.f32 %v2871_v6, %v2674_v30  ;;  %v2368_v1 = vpop.f32.mrf.mxu2 }
 0x342   : > { %v2111_v49 = vpop.f32.mrf.mxu1  ;;  %v2873_v10 = vpop.f32.mrf.mxu0 }
 0x343   : > { %2964 = vst [vmem:[%s4338_s6 + $0xb0] sm:$0xff] %v2928_v7  ;;  %v2167_v40 = vadd.f32 %v2111_v49, %v4289_v35 }
 0x345   : > { %v2421_v36 = vadd.f32 %v2365_v18, %v2167_v40 }
 0x347   : > { %v2675_v29 = vadd.f32 %v2619_v47, %v2421_v36 }
 0x348   : > { %v2622_v12 = vpop.f32.mrf.mxu3 }
 0x349   : > { %v2929_v5 = vadd.f32 %v2873_v10, %v2675_v29  ;;  %v2370_v27 = vpop.f32.mrf.mxu2 }
 0x34a   : > { %v2114_v62 = vpop.f32.mrf.mxu1  ;;  %v2876_v14 = vpop.f32.mrf.mxu0 }
 0x34b   : > { %2965 = vst [vmem:[%s4338_s6 + $0xb8] sm:$0xff] %v2929_v5  ;;  %v2168_v17 = vadd.f32 %v2114_v62, %v4292_v2 }
 0x34d   : > { %v2422_v21 = vadd.f32 %v2368_v1, %v2168_v17 }
 0x34f   : > { %v2676_v52 = vadd.f32 %v2622_v12, %v2422_v21 }
 0x350   : > { %v2624_v41 = vpop.f32.mrf.mxu3 }
 0x351   : > { %v2930_v50 = vadd.f32 %v2876_v14, %v2676_v52  ;;  %v2373_v34 = vpop.f32.mrf.mxu2 }
 0x352   : > { %v2116_v39 = vpop.f32.mrf.mxu1  ;;  %v2878_v24 = vpop.f32.mrf.mxu0 }
 0x353   : > { %2966 = vst [vmem:[%s4338_s6 + $0xc0] sm:$0xff] %v2930_v50  ;;  %v2169_v35 = vadd.f32 %v2116_v39, %v4295_v19 }
 0x355   : > { %v2423_v11 = vadd.f32 %v2370_v27, %v2169_v35 }
 0x357   : > { %v2677_v31 = vadd.f32 %v2624_v41, %v2423_v11 }
 0x358   : > { %v2627_v4 = vpop.f32.mrf.mxu3 }
 0x359   : > { %v2931_v44 = vadd.f32 %v2878_v24, %v2677_v31  ;;  %v2375_v59 = vpop.f32.mrf.mxu2 }
 0x35a   : > { %v2119_v28 = vpop.f32.mrf.mxu1  ;;  %v2881_v48 = vpop.f32.mrf.mxu0 }
 0x35b   : > { %2967 = vst [vmem:[%s4338_s6 + $0xc8] sm:$0xff] %v2931_v44  ;;  %v2170_v2 = vadd.f32 %v2119_v28, %v4298_v43 }
 0x35d   : > { %v2424_v61 = vadd.f32 %v2373_v34, %v2170_v2 }
 0x35f   : > { %v2678_v53 = vadd.f32 %v2627_v4, %v2424_v61 }
 0x360   : > { %v2629_v22 = vpop.f32.mrf.mxu3 }
 0x361   : > { %v2932_v38 = vadd.f32 %v2881_v48, %v2678_v53  ;;  %v2378_v25 = vpop.f32.mrf.mxu2 }
 0x362   : > { %v2121_v60 = vpop.f32.mrf.mxu1  ;;  %v2883_v20 = vpop.f32.mrf.mxu0 }
 0x363   : > { %2968 = vst [vmem:[%s4338_s6 + $0xd0] sm:$0xff] %v2932_v38  ;;  %v2171_v19 = vadd.f32 %v2121_v60, %v4301_v42 }
 0x365   : > { %v2425_v54 = vadd.f32 %v2375_v59, %v2171_v19 }
 0x367   : > { %v2679_v23 = vadd.f32 %v2629_v22, %v2425_v54 }
 0x368   : > { %v2632_v63 = vpop.f32.mrf.mxu3 }
 0x369   : > { %v2933_v13 = vadd.f32 %v2883_v20, %v2679_v23  ;;  %v2380_v26 = vpop.f32.mrf.mxu2 }
 0x36a   : > { %v2124_v57 = vpop.f32.mrf.mxu1  ;;  %v2886_v55 = vpop.f32.mrf.mxu0 }
 0x36b   : > { %2969 = vst [vmem:[%s4338_s6 + $0xd8] sm:$0xff] %v2933_v13  ;;  %v2172_v43 = vadd.f32 %v2124_v57, %v4304_v58 }
 0x36d   : > { %v2426_v56 = vadd.f32 %v2378_v25, %v2172_v43 }
 0x36f   : > { %v2680_v9 = vadd.f32 %v2632_v63, %v2426_v56 }
 0x370   : > { %v2634_v0 = vpop.f32.mrf.mxu3 }
 0x371   : > { %v2934_v18 = vadd.f32 %v2886_v55, %v2680_v9  ;;  %v2383_v8 = vpop.f32.mrf.mxu2 }
 0x372   : > { %v2126_v6 = vpop.f32.mrf.mxu1  ;;  %v2888_v46 = vpop.f32.mrf.mxu0 }
 0x373   : > { %2970 = vst [vmem:[%s4338_s6 + $0xe0] sm:$0xff] %v2934_v18  ;;  %v2173_v42 = vadd.f32 %v2126_v6, %v4307_v16 }
 0x375   : > { %v2427_v15 = vadd.f32 %v2380_v26, %v2173_v42 }
 0x377   : > { %v2681_v30 = vadd.f32 %v2634_v0, %v2427_v15 }
 0x378   : > { %v2637_v47 = vpop.f32.mrf.mxu3 }
 0x379   : > { %v2935_v7 = vadd.f32 %v2888_v46, %v2681_v30  ;;  %v2385_v10 = vpop.f32.mrf.mxu2 }
 0x37a   : > { %v2129_v1 = vpop.f32.mrf.mxu1  ;;  %v2891_v49 = vpop.f32.mrf.mxu0 }
 0x37b   : > { %2971 = vst [vmem:[%s4338_s6 + $0xe8] sm:$0xff] %v2935_v7  ;;  %v2174_v58 = vadd.f32 %v2129_v1, %v4310_v33 }
 0x37d   : > { %v2428_v40 = vadd.f32 %v2383_v8, %v2174_v58 }
 0x37f   : > { %v2682_v36 = vadd.f32 %v2637_v47, %v2428_v40 }
 0x380   : > { %v2639_v29 = vpop.f32.mrf.mxu3 }
 0x381   : > { %v2936_v12 = vadd.f32 %v2891_v49, %v2682_v36  ;;  %v2388_v14 = vpop.f32.mrf.mxu2 }
 0x382   : > { %v2131_v5 = vpop.f32.mrf.mxu1  ;;  %v2893_v27 = vpop.f32.mrf.mxu0 }
 0x383   : > { %2972 = vst [vmem:[%s4338_s6 + $0xf0] sm:$0xff] %v2936_v12  ;;  %v2175_v16 = vadd.f32 %v2131_v5, %v4313_v32 }
 0x385   : > { %v2429_v62 = vadd.f32 %v2385_v10, %v2175_v16 }
 0x387   : > { %v2683_v17 = vadd.f32 %v2639_v29, %v2429_v62 }
 0x388   : > { %v2642_v21 = vpop.f32.mrf.mxu3 }
 0x389   : > { %v2937_v52 = vadd.f32 %v2893_v27, %v2683_v17  ;;  %v2390_v24 = vpop.f32.mrf.mxu2 }
 0x38a   : > { %v2134_v41 = vpop.f32.mrf.mxu1  ;;  %v2896_v50 = vpop.f32.mrf.mxu0 }
 0x38b   : > { %2973 = vst [vmem:[%s4338_s6 + $0xf8] sm:$0xff] %v2937_v52  ;;  %v2176_v33 = vadd.f32 %v2134_v41, %v4316_v37 }
 0x38d   : > { %v2430_v34 = vadd.f32 %v2388_v14, %v2176_v33 }
 0x38f   : > { %v2684_v39 = vadd.f32 %v2642_v21, %v2430_v34 }
 0x390   : > { %v2644_v11 = vpop.f32.mrf.mxu3 }
 0x391   : > { %v2938_v35 = vadd.f32 %v2896_v50, %v2684_v39  ;;  %v2393_v48 = vpop.f32.mrf.mxu2 }
 0x392   : > { %v2136_v31 = vpop.f32.mrf.mxu1  ;;  %v2898_v4 = vpop.f32.mrf.mxu0 }
 0x393   : > { %2974 = vst [vmem:[%s4338_s6 + $0x100] sm:$0xff] %v2938_v35  ;;  %v2177_v32 = vadd.f32 %v2136_v31, %v4319_v51 }
 0x395   : > { %v2431_v44 = vadd.f32 %v2390_v24, %v2177_v32 }
 0x397   : > { %v2685_v59 = vadd.f32 %v2644_v11, %v2431_v44 }
 0x398   : > { %v2647_v61 = vpop.f32.mrf.mxu3 }
 0x399   : > { %v2939_v28 = vadd.f32 %v2898_v4, %v2685_v59  ;;  %v2395_v51 = vpop.f32.mrf.mxu2 }
 0x39a   : > { %v2139_v2 = vpop.f32.mrf.mxu1  ;;  %v2901_v22 = vpop.f32.mrf.mxu0 }
 0x39b   : > { %2975 = vst [vmem:[%s4338_s6 + $0x108] sm:$0xff] %v2939_v28  ;;  %v2178_v37 = vadd.f32 %v2139_v2, %v4325_v3 }
 0x39d   : > { %v2432_v53 = vadd.f32 %v2393_v48, %v2178_v37 }
 0x39f   : > { %v2686_v38 = vadd.f32 %v2647_v61, %v2432_v53 }
 0x3a0   : > { %v2649_v54 = vpop.f32.mrf.mxu3 }
 0x3a1   : > { %v2940_v25 = vadd.f32 %v2901_v22, %v2686_v38 }
 0x3a2   : > { %v2141_v60 = vpop.f32.mrf.mxu1  ;;  %v2903_v63 = vpop.f32.mrf.mxu0 }
 0x3a3   : > { %2976 = vst [vmem:[%s4338_s6 + $0x110] sm:$0xff] %v2940_v25  ;;  %v2179_v20 = vadd.f32 %v2141_v60, %v4328_v45 }
 0x3a5   : > { %v2433_v19 = vadd.f32 %v2395_v51, %v2179_v20 }
 0x3a7   : > { %v2687_v23 = vadd.f32 %v2649_v54, %v2433_v19 }
 0x3a9   : > { %v2941_v13 = vadd.f32 %v2903_v63, %v2687_v23 }
 0x3ab   : > { %2977 = vst [vmem:[%s4338_s6 + $0x118] sm:$0xff] %v2941_v13 }
 0x3ac PF: > { %s15_s18 = sadd.s32 1, %s3577_s18  }
 0x3ad   : > { %p12_p4 = scmp.ge.s32.totalorder %s15_s18, 4  }
 0x3af   :  { %14 = sbr.rel (!%p12_p4) target bundleno = 1 (0x1), region = 78 }

// kernel: resblock_pallas.3
= control target key start
LH: loop header
LB: loop body
LE: loop exit
PB: predicated region body
PF: predicated region fallthrough
CT: control target
= control target key end

     0   :  { %s3730_s21 = smov 0   ;;  %s4554_s0 = inlined_call_operand.vmem [shape: f32[2,288,128], index: 0, kind: input, shape index: {}]   ;;  %s4555_s1 = inlined_call_operand.vmem [shape: f32[2,324,128], index: 1, kind: input, shape index: {}]   ;;  %s4556_s2 = inlined_call_operand.vmem [shape: f32[1,128], index: 2, kind: input, shape index: {}]   ;;  %s4557_s3 = inlined_call_operand.vmem [shape: f32[1,128], index: 3, kind: input, shape index: {}]   ;;  %s4558_s4 = inlined_call_operand.vmem [shape: f32[288,1], index: 4, kind: input, shape index: {}]   ;;  %s4559_s5 = inlined_call_operand.vmem [shape: bf16[9,128,128], index: 5, kind: input, shape index: {}]   ;;  %s4560_s6 = inlined_call_operand.vmem [shape: f32[2,288,128], index: 6, kind: output, shape index: {}]  }
   0x1 LB: > { %s3145_s22 = sadd.s32 4294967295, %s3690_s21   ;;  %p3149_p0 = scmp.ge.s32.totalorder %s3690_s21, 1  ;;  %s3690_s21 = sphi %s3730_s21, %s16_s21  }
   0x2   : > { %p222_p1 = scmp.lt.s32.totalorder %s3690_s21, 3 }
   0x4   : > { %p223_p2 = pnand %p3149_p0, %p222_p1 }
   0x5   : > { %p257_p3 = scmp.lt.s32.totalorder (!%p223_p2), %s3145_s22, 1 }
   0x6   : > { %226 = sbr.rel (%p223_p2) target bundleno = 946 (0x3b2), region = 44 }
   0xb   : > { %v452_v0 = vld [vmem:[%s4558_s4 + $0x98] sm:$0xff]  ;;  %v450_v1 = vld [vmem:[%s4558_s4 + $0x88] sm:$0xff]  ;;  %v441_v2 = vld [vmem:[%s4558_s4 + $0x40] sm:$0xff]  ;;  %v3692_v3 = vmov 0   ;;  %s4562_s22 = smov (!%p257_p3, %s3145_s22), 1 }
   0xc   : > { %3681 = vset.pattern.permute.xlu2 %v3692_v3  ;;  %3680 = vset.pattern.permute.xlu1 %v3692_v3  ;;  %v440_v4 = vld [vmem:[%s4558_s4 + $0x38] sm:$0xff]  ;;  %v451_v5 = vld [vmem:[%s4558_s4 + $0x90] sm:$0xff]  ;;  %v442_v6 = vld [vmem:[%s4558_s4 + $0x48] sm:$0xff]  ;;  %s3667_s17 = smul.u32 288, %s4562_s22 }
   0xd   : > { %3679 = vset.pattern.permute.xlu0 %v3692_v3  ;;  %566 = vperm.xlu1 %3680, %v452_v0   ;;  %v454_v7 = vld [vmem:[%s4558_s4 + $0xa8] sm:$0xff]  ;;  %v453_v8 = vld [vmem:[%s4558_s4 + $0xa0] sm:$0xff]  ;;  %v443_v9 = vld [vmem:[%s4558_s4 + $0x50] sm:$0xff]  ;;  %s3668_s14 = smul.u32 328, %s4562_s22 }
   0xe   : > { %556 = vperm.xlu0 %3679, %v450_v1   ;;  %511 = vperm.xlu2 %3681, %v441_v2   ;;  %v433_v10 = vld [vmem:[%s4558_s4] sm:$0xff]  ;;  %v444_v11 = vld [vmem:[%s4558_s4 + $0x58] sm:$0xff]  ;;  %v434_v12 = vld [vmem:[%s4558_s4 + $0x8] sm:$0xff]  ;;  %s3846_s24 = scalar_lea.vmem %s4554_s0, %s3667_s17  ;;  %s4444_s20 = scalar_lea.vmem %s4560_s6, %s3667_s17 }
   0xf   : > { %v456_v13 = vld [vmem:[%s4558_s4 + $0xb8] sm:$0xff]  ;;  %v455_v14 = vld [vmem:[%s4558_s4 + $0xb0] sm:$0xff]  ;;  %v462_v16 = vld [vmem:[%s4558_s4 + $0xe8] sm:$0xff]  ;;  %s4435_s18 = scalar_lea.vmem %s4555_s1, %s3668_s14 }
  0x10   : > { %v460_v15 = vld [vmem:[%s4558_s4 + $0xd8] sm:$0xff]  ;;  %v461_v17 = vld [vmem:[%s4558_s4 + $0xe0] sm:$0xff]  ;;  %v435_v19 = vld [vmem:[%s4558_s4 + $0x10] sm:$0xff] }
  0x11   : > { %v445_v18 = vld [vmem:[%s4558_s4 + $0x60] sm:$0xff]  ;;  %v446_v20 = vld [vmem:[%s4558_s4 + $0x68] sm:$0xff]  ;;  %v436_v21 = vld [vmem:[%s4558_s4 + $0x18] sm:$0xff] }
  0x12   : > { %v458_v22 = vld [vmem:[%s4558_s4 + $0xc8] sm:$0xff]  ;;  %v457_v23 = vld [vmem:[%s4558_s4 + $0xc0] sm:$0xff]  ;;  %v463_v24 = vld [vmem:[%s4558_s4 + $0xf0] sm:$0xff] }
  0x13   : > { %v447_v25 = vld [vmem:[%s4558_s4 + $0x70] sm:$0xff]  ;;  %v464_v26 = vld [vmem:[%s4558_s4 + $0xf8] sm:$0xff]  ;;  %v438_v28 = vld [vmem:[%s4558_s4 + $0x28] sm:$0xff] }
  0x14   : > { %v448_v27 = vld [vmem:[%s4558_s4 + $0x78] sm:$0xff]  ;;  %v437_v29 = vld [vmem:[%s4558_s4 + $0x20] sm:$0xff]  ;;  %v459_v30 = vld [vmem:[%s4558_s4 + $0xd0] sm:$0xff] }
  0x15   : > { %506 = vperm.xlu1 %3680, %v440_v4   ;;  %v3586_v31 = vld [vmem:[%s4559_s5 + $0x78] sm:$0xff]  ;;  %v3585_v32 = vld [vmem:[%s4559_s5 + $0x70] sm:$0xff]  ;;  %v465_v33 = vld [vmem:[%s4558_s4 + $0x100] sm:$0xff] }
  0x16   : > { %561 = vperm.xlu0 %3679, %v451_v5   ;;  %516 = vperm.xlu2 %3681, %v442_v6   ;;  %v466_v34 = vld [vmem:[%s4558_s4 + $0x108] sm:$0xff]  ;;  %v289_v35 = vld [vmem:[%s3846_s24 + $0x40] sm:$0xff]  ;;  %v467_v43 = vld [vmem:[%s4558_s4 + $0x110] sm:$0xff]  ;;  %v3693_v5 = vmov 0.0   ;;  %v3694_v6 = vmov 0.0|0.0  }
  0x17   : > { %910 = vmatpush.bf16.msra.mxu0 %v3586_v31  ;;  %3643 = vmatpush.bf16.msra.mxu1 %v3586_v31  ;;  %v449_v36 = vld [vmem:[%s4558_s4 + $0x80] sm:$0xff]  ;;  %v3584_v38 = vld [vmem:[%s4559_s5 + $0x68] sm:$0xff]  ;;  %v439_v45 = vld [vmem:[%s4558_s4 + $0x30] sm:$0xff]  ;;  %274 = vst [vmem:[#allocation2 + $0x10] sm:$0xff] %v3693_v5 }
  0x18   : > { %3644 = vmatpush.bf16.msra.mxu2 %v3586_v31  ;;  %3645 = vmatpush.bf16.msra.mxu3 %v3586_v31  ;;  %v3861_v37 = vld [vmem:[%s4556_s2] ss:$0 sm:$0xff]  ;;  %v290_v44 = vld [vmem:[%s3846_s24 + $0x48] sm:$0xff]  ;;  %v468_v46 = vld [vmem:[%s4558_s4 + $0x118] sm:$0xff]  ;;  %275 = vst [vmem:[#allocation2 + $0x18] sm:$0xff] %v3693_v5 }
  0x19   : > { %v329_v39 = vmul.f32 %v3861_v37, %v289_v35  ;;  %v3870_v40 = vld [vmem:[%s4557_s3] ss:$0 sm:$0xff]  ;;  %v3582_v47 = vld [vmem:[%s4559_s5 + $0x58] sm:$0xff]  ;;  %v330_v49 = vmul.f32 %v3861_v37, %v290_v44  ;;  %v3581_v53 = vld [vmem:[%s4559_s5 + $0x50] sm:$0xff]  ;;  %273 = vst [vmem:[#allocation2 + $0x8] sm:$0xff] %v3693_v5 }
  0x1a   : > { %v3583_v41 = vld [vmem:[%s4559_s5 + $0x60] sm:$0xff]  ;;  %v291_v54 = vld [vmem:[%s3846_s24 + $0x50] sm:$0xff]  ;;  %v3580_v55 = vld [vmem:[%s4559_s5 + $0x48] sm:$0xff]  ;;  %276 = vst [vmem:[#allocation2 + $0x20] sm:$0x3] %v3693_v5 }
  0x1b   : > { %911 = vmatpush.bf16.msra.mxu0 %v3585_v32  ;;  %3646 = vmatpush.bf16.msra.mxu1 %v3585_v32  ;;  %v369_v42 = vadd.f32 %v3870_v40, %v329_v39  ;;  %v370_v52 = vadd.f32 %v3870_v40, %v330_v49  ;;  %v331_v57 = vmul.f32 %v3861_v37, %v291_v54  ;;  %v300_v61 = vld [vmem:[%s3846_s24 + $0x98] sm:$0xff]  ;;  %v3579_v62 = vld [vmem:[%s4559_s5 + $0x40] sm:$0xff]  ;;  %v298_v63 = vld [vmem:[%s3846_s24 + $0x88] sm:$0xff] }
  0x1c   : > { %3647 = vmatpush.bf16.msra.mxu2 %v3585_v32  ;;  %3648 = vmatpush.bf16.msra.mxu3 %v3585_v32  ;;  %v282_v0 = vld [vmem:[%s3846_s24 + $0x8] sm:$0xff]  ;;  %v340_v1 = vmul.f32 %v3861_v37, %v300_v61  ;;  %v338_v3 = vmul.f32 %v3861_v37, %v298_v63  ;;  %277 = vst [vmem:[#allocation2 + $0x142] sm:$0xff] %v3693_v5  ;;  %v3610_v44 = vld [vmem:[%s4559_s5 + $0x138] sm:$0xff]  ;;  %v281_v54 = vld [vmem:[%s3846_s24] sm:$0xff] }
  0x1d   : > { %576 = vperm.xlu1 %3680, %v454_v7   ;;  %v405_v48 = vmax.f32 %v369_v42, 0.0  ;;  %v406_v56 = vmax.f32 %v370_v52, 0.0  ;;  %v371_v60 = vadd.f32 %v3870_v40, %v331_v57  ;;  %v322_v4 = vmul.f32 %v3861_v37, %v282_v0  ;;  %278 = vst [vmem:[#allocation2 + $0x14a] sm:$0xff] %v3693_v5  ;;  %v302_v32 = vld [vmem:[%s3846_s24 + $0xa8] sm:$0xff]  ;;  %v3609_v61 = vld [vmem:[%s4559_s5 + $0x130] sm:$0xff] }
  0x1e   : > { %571 = vperm.xlu0 %3679, %v453_v8   ;;  %521 = vperm.xlu2 %3681, %v443_v9   ;;  %v380_v8 = vadd.f32 %v3870_v40, %v340_v1  ;;  %279 = vst [vmem:[#allocation2 + $0x152] sm:$0xff] %v3693_v5 }
  0x1f   : > { %912 = vmatpush.bf16.msra.mxu0 %v3584_v38  ;;  %3649 = vmatpush.bf16.msra.mxu1 %v3584_v38  ;;  %v407_v2 = vmax.f32 %v371_v60, 0.0  ;;  %v3592_v60 = vld [vmem:[%s4559_s5 + $0xa8] sm:$0xff] }
  0x20   : > { %3650 = vmatpush.bf16.msra.mxu2 %v3584_v38  ;;  %3651 = vmatpush.bf16.msra.mxu3 %v3584_v38 }
  0x23   : > { %913 = vmatpush.bf16.msra.mxu0 %v3583_v41  ;;  %3652 = vmatpush.bf16.msra.mxu1 %v3583_v41 }
  0x24   : > { %3653 = vmatpush.bf16.msra.mxu2 %v3583_v41  ;;  %3654 = vmatpush.bf16.msra.mxu3 %v3583_v41 }
  0x25   : > { %471 = vperm.xlu1 %3680, %v433_v10   ;;  %v378_v10 = vadd.f32 %v3870_v40, %v338_v3 }
  0x26   : > { %526 = vperm.xlu0 %3679, %v444_v11   ;;  %476 = vperm.xlu2 %3681, %v434_v12   ;;  %v362_v11 = vadd.f32 %v3870_v40, %v322_v4  ;;  %v288_v12 = vld [vmem:[%s3846_s24 + $0x38] sm:$0xff] }
  0x27   : > { %914 = vmatpush.bf16.msra.mxu0 %v3582_v47  ;;  %3655 = vmatpush.bf16.msra.mxu1 %v3582_v47 }
  0x28   : > { %3656 = vmatpush.bf16.msra.mxu2 %v3582_v47  ;;  %3657 = vmatpush.bf16.msra.mxu3 %v3582_v47 }
  0x2b   : > { %915 = vmatpush.bf16.msra.mxu0 %v3581_v53  ;;  %3658 = vmatpush.bf16.msra.mxu1 %v3581_v53 }
  0x2c   : > { %3659 = vmatpush.bf16.msra.mxu2 %v3581_v53  ;;  %3660 = vmatpush.bf16.msra.mxu3 %v3581_v53 }
  0x2d   : > { %586 = vperm.xlu1 %3680, %v456_v13   ;;  %v299_v13 = vld [vmem:[%s3846_s24 + $0x90] sm:$0xff] }
  0x2e   : > { %581 = vperm.xlu0 %3679, %v455_v14   ;;  %606 = vperm.xlu2 %3681, %v460_v15   ;;  %v308_v14 = vld [vmem:[%s3846_s24 + $0xd8] sm:$0xff]  ;;  %v416_v15 = vmax.f32 %v380_v8, 0.0 }
  0x2f   : > { %916 = vmatpush.bf16.msra.mxu0 %v3580_v55  ;;  %3661 = vmatpush.bf16.msra.mxu1 %v3580_v55 }
  0x30   : > { %3662 = vmatpush.bf16.msra.mxu2 %v3580_v55  ;;  %3663 = vmatpush.bf16.msra.mxu3 %v3580_v55  ;;  %v292_v55 = vld [vmem:[%s3846_s24 + $0x58] sm:$0xff] }
  0x31   : > { %v332_v0 = vmul.f32 %v3861_v37, %v292_v55 }
  0x33   : > { %917 = vmatpush.bf16.msra.mxu0 %v3579_v62  ;;  %3664 = vmatpush.bf16.msra.mxu1 %v3579_v62 }
  0x34   : > { %3665 = vmatpush.bf16.msra.mxu2 %v3579_v62  ;;  %3666 = vmatpush.bf16.msra.mxu3 %v3579_v62 }
  0x35   : > { %616 = vperm.xlu1 %3680, %v462_v16   ;;  %v328_v16 = vmul.f32 %v3861_v37, %v288_v12 }
  0x36   : > { %611 = vperm.xlu0 %3679, %v461_v17   ;;  %531 = vperm.xlu2 %3681, %v445_v18   ;;  %v3594_v17 = vld [vmem:[%s4559_s5 + $0xb8] sm:$0xff] }
  0x37   : > { %918 = vmatmul.bf16.vlgmr.msra.gmra.mxu0 %v3694_v6  ;;  %v3578_v18 = vld [vmem:[%s4559_s5 + $0x38] sm:$0xff] }
  0x38   : > { %1275 = vmatpush.bf16.msrb.mxu2 %v3594_v17  ;;  %1057 = vmatpush.bf16.msrb.mxu1 %v3578_v18  ;;  %v311_v18 = vld [vmem:[%s3846_s24 + $0xf0] sm:$0xff] }
  0x39   : > { %1783 = vmatpush.bf16.msrb.mxu0 %v3610_v44 }
  0x3d   : > { %481 = vperm.xlu1 %3680, %v435_v19   ;;  %v414_v19 = vmax.f32 %v378_v10, 0.0  ;;  %1784 = vmatpush.bf16.msrb.mxu0 %v3609_v61 }
  0x3e   : > { %536 = vperm.xlu0 %3679, %v446_v20   ;;  %486 = vperm.xlu2 %3681, %v436_v21   ;;  %v398_v20 = vmax.f32 %v362_v11, 0.0  ;;  %v339_v21 = vmul.f32 %v3861_v37, %v299_v13  ;;  %v372_v11 = vadd.f32 %v3870_v40, %v332_v0  ;;  %v303_v13 = vld [vmem:[%s3846_s24 + $0xb0] sm:$0xff] }
  0x45   : > { %596 = vperm.xlu1 %3680, %v458_v22   ;;  %v348_v22 = vmul.f32 %v3861_v37, %v308_v14  ;;  %v304_v14 = vld [vmem:[%s3846_s24 + $0xb8] sm:$0xff] }
  0x46   : > { %591 = vperm.xlu0 %3679, %v457_v23   ;;  %621 = vperm.xlu2 %3681, %v463_v24  }
  0x47   : > { %v388_v31 = vadd.f32 %v3870_v40, %v348_v22  ;;  %v3576_v22 = vld [vmem:[%s4559_s5 + $0x28] sm:$0xff] }
  0x49   : > { %v424_v39 = vmax.f32 %v388_v31, 0.0 }
  0x4d   : > { %541 = vperm.xlu1 %3680, %v447_v25  }
  0x4e   : > { %626 = vperm.xlu0 %3679, %v464_v26   ;;  %546 = vperm.xlu2 %3681, %v448_v27   ;;  %v368_v27 = vadd.f32 %v3870_v40, %v328_v16 }
  0x50   : > { %v404_v35 = vmax.f32 %v368_v27, 0.0 }
  0x55   : > { %496 = vperm.xlu1 %3680, %v438_v28  }
  0x56   : > { %491 = vperm.xlu0 %3679, %v437_v29   ;;  %601 = vperm.xlu2 %3681, %v459_v30   ;;  %v379_v30 = vadd.f32 %v3870_v40, %v339_v21  ;;  %v344_v21 = vmul.f32 %v3861_v37, %v304_v14  ;;  %v3607_v14 = vld [vmem:[%s4559_s5 + $0x120] sm:$0xff] }
  0x58   : > { %v415_v38 = vmax.f32 %v379_v30, 0.0 }
  0x5d   : > { %636 = vperm.xlu1 %3680, %v466_v34   ;;  %v293_v34 = vld [vmem:[%s3846_s24 + $0x60] sm:$0xff] }
  0x5e   : > { %631 = vperm.xlu0 %3679, %v465_v33   ;;  %551 = vperm.xlu2 %3681, %v449_v36   ;;  %v301_v33 = vld [vmem:[%s3846_s24 + $0xa0] sm:$0xff]  ;;  %v342_v36 = vmul.f32 %v3861_v37, %v302_v32  ;;  %v333_v42 = vmul.f32 %v3861_v37, %v293_v34  ;;  %v384_v32 = vadd.f32 %v3870_v40, %v344_v21 }
  0x5f   : > { %v341_v41 = vmul.f32 %v3861_v37, %v301_v33 }
  0x60   : > { %v382_v49 = vadd.f32 %v3870_v40, %v342_v36  ;;  %v373_v53 = vadd.f32 %v3870_v40, %v333_v42 }
  0x61   : > { %v381_v52 = vadd.f32 %v3870_v40, %v341_v41  ;;  %v296_v41 = vld [vmem:[%s3846_s24 + $0x78] sm:$0xff] }
  0x62   : > { %v418_v57 = vmax.f32 %v382_v49, 0.0  ;;  %v409_v63 = vmax.f32 %v373_v53, 0.0 }
  0x63   : > { %v417_v62 = vmax.f32 %v381_v52, 0.0  ;;  %v3602_v52 = vld [vmem:[%s4559_s5 + $0xf8] sm:$0xff] }
  0x64   : > { %1529 = vmatpush.bf16.msrb.mxu3 %v3602_v52 }
  0x65   : > { %641 = vperm.xlu1 %3680, %v467_v43   ;;  %v3593_v43 = vld [vmem:[%s4559_s5 + $0xb0] sm:$0xff] }
  0x66   : > { %501 = vperm.xlu0 %3679, %v439_v45   ;;  %646 = vperm.xlu2 %3681, %v468_v46  }
  0x67   : > { %1276 = vmatpush.bf16.msrb.mxu2 %v3593_v43  ;;  %v420_v43 = vmax.f32 %v384_v32, 0.0  ;;  %v305_v32 = vld [vmem:[%s3846_s24 + $0xc0] sm:$0xff] }
  0x68   : > { %v512_v50 = vpop.permute.xlu2 %511 }
  0x69   : > { %v657_v51 = vmul.f32 %v512_v50, %v405_v48 }
  0x6b   : > { %693 = vst [vmem:[#allocation2 + $0x62] sm:$0xff] %v657_v51  ;;  %1277 = vmatpush.bf16.msrb.mxu2 %v3592_v60 }
  0x70   : > { %v517_v58 = vpop.permute.xlu2 %516 }
  0x71   : > { %v658_v59 = vmul.f32 %v517_v58, %v406_v56  ;;  %v284_v56 = vld [vmem:[%s3846_s24 + $0x18] sm:$0xff]  ;;  %v321_v58 = vmul.f32 %v3861_v37, %v281_v54 }
  0x72   : > { %v324_v1 = vmul.f32 %v3861_v37, %v284_v56 }
  0x73   : > { %694 = vst [vmem:[#allocation2 + $0x6a] sm:$0xff] %v658_v59  ;;  %v3577_v59 = vld [vmem:[%s4559_s5 + $0x30] sm:$0xff] }
  0x74   : > { %1058 = vmatpush.bf16.msrb.mxu1 %v3577_v59  ;;  %v364_v12 = vadd.f32 %v3870_v40, %v324_v1 }
  0x78   : > { %v522_v7 = vpop.permute.xlu2 %521  ;;  %1059 = vmatpush.bf16.msrb.mxu1 %v3576_v22 }
  0x79   : > { %v659_v9 = vmul.f32 %v522_v7, %v407_v2  ;;  %v361_v7 = vadd.f32 %v3870_v40, %v321_v58 }
  0x7a   : > { %v802_v6 = vld [vmem:[#allocation2 + $0x68] sm:$0xff] }
  0x7b   : > { %695 = vst [vmem:[#allocation2 + $0x72] sm:$0xff] %v659_v9 }
  0x7f   : > { %v567_v23 = vpop.permute.xlu1 %566 }
  0x80   : > { %v668_v24 = vmul.f32 %v567_v23, %v416_v15  ;;  %v557_v25 = vpop.permute.xlu0 %556  ;;  %v477_v26 = vpop.permute.xlu2 %476  ;;  %v408_v23 = vmax.f32 %v372_v11, 0.0 }
  0x81   : > { %v666_v28 = vmul.f32 %v557_v25, %v414_v19  ;;  %v3925_v29 = vmul.f32 %v477_v26, %v398_v20  ;;  %v397_v20 = vmax.f32 %v361_v7, 0.0  ;;  %v343_v25 = vmul.f32 %v3861_v37, %v303_v13  ;;  %v307_v7 = vld [vmem:[%s3846_s24 + $0xd0] sm:$0xff] }
  0x82   : > { %704 = vst [vmem:[#allocation2 + $0xba] sm:$0xff] %v668_v24  ;;  %v400_v24 = vmax.f32 %v364_v12, 0.0  ;;  %v351_v26 = vmul.f32 %v3861_v37, %v311_v18  ;;  %v3590_v12 = vld [vmem:[%s4559_s5 + $0x98] sm:$0xff]  ;;  %v3601_v13 = vld [vmem:[%s4559_s5 + $0xf0] sm:$0xff]  ;;  %v347_v18 = vmul.f32 %v3861_v37, %v307_v7 }
  0x83   : > { %702 = vst [vmem:[#allocation2 + $0xaa] sm:$0xff] %v666_v28  ;;  %1530 = vmatpush.bf16.msrb.mxu3 %v3601_v13 }
  0x84   : > { %686 = vst [vmem:[#allocation2 + $0x2a] sm:$0xff] %v3925_v29  ;;  %v391_v36 = vadd.f32 %v3870_v40, %v351_v26 }
  0x87   : > { %v507_v45 = vpop.permute.xlu1 %506 }
  0x88   : > { %v562_v46 = vpop.permute.xlu0 %561  ;;  %v656_v47 = vmul.f32 %v507_v45, %v404_v35  ;;  %v607_v48 = vpop.permute.xlu2 %606  ;;  %v383_v35 = vadd.f32 %v3870_v40, %v343_v25  ;;  %v3591_v45 = vld [vmem:[%s4559_s5 + $0xa0] sm:$0xff] }
  0x89   : > { %v667_v50 = vmul.f32 %v562_v46, %v415_v38  ;;  %v676_v51 = vmul.f32 %v607_v48, %v424_v39  ;;  %v310_v38 = vld [vmem:[%s3846_s24 + $0xe8] sm:$0xff]  ;;  %v309_v39 = vld [vmem:[%s3846_s24 + $0xe0] sm:$0xff]  ;;  %v427_v48 = vmax.f32 %v391_v36, 0.0  ;;  %1278 = vmatpush.bf16.msrb.mxu2 %v3591_v45  ;;  %v3589_v45 = vld [vmem:[%s4559_s5 + $0x90] sm:$0xff] }
  0x8a   : > { %692 = vst [vmem:[#allocation2 + $0x5a] sm:$0xff] %v656_v47  ;;  %v350_v44 = vmul.f32 %v3861_v37, %v310_v38  ;;  %v3608_v46 = vld [vmem:[%s4559_s5 + $0x128] sm:$0xff]  ;;  %v419_v47 = vmax.f32 %v383_v35, 0.0  ;;  %v349_v49 = vmul.f32 %v3861_v37, %v309_v39 }
  0x8b   : > { %703 = vst [vmem:[#allocation2 + $0xb2] sm:$0xff] %v667_v50  ;;  %v336_v50 = vmul.f32 %v3861_v37, %v296_v41  ;;  %1785 = vmatpush.bf16.msrb.mxu0 %v3608_v46  ;;  %v3600_v35 = vld [vmem:[%s4559_s5 + $0xe8] sm:$0xff]  ;;  %v3606_v46 = vld [vmem:[%s4559_s5 + $0x118] sm:$0xff] }
  0x8c   : > { %712 = vst [vmem:[#allocation2 + $0xfa] sm:$0xff] %v676_v51  ;;  %v3575_v51 = vld [vmem:[%s4559_s5 + $0x20] sm:$0xff]  ;;  %v390_v60 = vadd.f32 %v3870_v40, %v350_v44  ;;  %v389_v1 = vadd.f32 %v3870_v40, %v349_v49  ;;  %1531 = vmatpush.bf16.msrb.mxu3 %v3600_v35  ;;  %v3597_v35 = vld [vmem:[%s4559_s5 + $0xd0] sm:$0xff] }
  0x8d   : > { %1060 = vmatpush.bf16.msrb.mxu1 %v3575_v51  ;;  %1279 = vmatpush.bf16.msrb.mxu2 %v3590_v12  ;;  %v3605_v12 = vld [vmem:[%s4559_s5 + $0x110] sm:$0xff] }
  0x8f   : > { %v577_v2 = vpop.permute.xlu1 %576  ;;  %1786 = vmatpush.bf16.msrb.mxu0 %v3607_v14 }
  0x90   : > { %v572_v3 = vpop.permute.xlu0 %571  ;;  %v670_v4 = vmul.f32 %v577_v2, %v418_v57  ;;  %v532_v5 = vpop.permute.xlu2 %531  ;;  %v803_v57 = vld [vmem:[#allocation2 + $0x70] sm:$0xff]  ;;  %v376_v2 = vadd.f32 %v3870_v40, %v336_v50 }
  0x91   : > { %v669_v8 = vmul.f32 %v572_v3, %v417_v62  ;;  %v661_v9 = vmul.f32 %v532_v5, %v409_v63  ;;  %v801_v10 = vld [vmem:[#allocation2 + $0x60] sm:$0xff]  ;;  %v283_v3 = vld [vmem:[%s3846_s24 + $0x10] sm:$0xff]  ;;  %1280 = vmatpush.bf16.msrb.mxu2 %v3589_v45  ;;  %v3596_v45 = vld [vmem:[%s4559_s5 + $0xc8] sm:$0xff] }
  0x92   : > { %706 = vst [vmem:[#allocation2 + $0xca] sm:$0xff] %v670_v4  ;;  %v832_v15 = vpack.c.bf16 %v802_v6, %v801_v10  ;;  %v811_v16 = vld [vmem:[#allocation2 + $0xb0] sm:$0xff]  ;;  %v812_v17 = vld [vmem:[#allocation2 + $0xb8] sm:$0xff]  ;;  %v294_v6 = vld [vmem:[%s3846_s24 + $0x68] sm:$0xff]  ;;  %v426_v10 = vmax.f32 %v390_v60, 0.0  ;;  %v323_v11 = vmul.f32 %v3861_v37, %v283_v3 }
  0x93   : > { %705 = vst [vmem:[#allocation2 + $0xc2] sm:$0xff] %v669_v8  ;;  %v837_v19 = vpack.c.bf16 %v812_v17, %v811_v16  ;;  %v412_v16 = vmax.f32 %v376_v2, 0.0  ;;  %v334_v17 = vmul.f32 %v3861_v37, %v294_v6  ;;  %1787 = vmatpush.bf16.msrb.mxu0 %v3606_v46  ;;  %v295_v60 = vld [vmem:[%s3846_s24 + $0x70] sm:$0xff]  ;;  %v3604_v46 = vld [vmem:[%s4559_s5 + $0x108] sm:$0xff] }
  0x94   : > { %697 = vst [vmem:[#allocation2 + $0x82] sm:$0xff] %v661_v9  ;;  %943 = vmatmul.bf16.vlgmr.msra.gmra.mxu1 %v832_v15  ;;  %v425_v15 = vmax.f32 %v389_v1, 0.0  ;;  %v3573_v3 = vld [vmem:[%s4559_s5 + $0x10] sm:$0xff] }
  0x95   : > { %968 = vmatmul.bf16.vlgmr.msra.gmra.mxu2 %v837_v19  ;;  %v3574_v19 = vld [vmem:[%s4559_s5 + $0x18] sm:$0xff] }
  0x96   : > { %1061 = vmatpush.bf16.msrb.mxu1 %v3574_v19 }
  0x97   : > { %v472_v27 = vpop.permute.xlu1 %471  ;;  %1788 = vmatpush.bf16.msrb.mxu0 %v3605_v12 }
  0x98   : > { %v527_v28 = vpop.permute.xlu0 %526  ;;  %v487_v30 = vpop.permute.xlu2 %486  ;;  %v3972_v31 = vmul.f32 %v472_v27, %v397_v20  ;;  %v374_v27 = vadd.f32 %v3870_v40, %v334_v17 }
  0x99   : > { %v660_v33 = vmul.f32 %v527_v28, %v408_v23  ;;  %v3975_v34 = vmul.f32 %v487_v30, %v400_v24  ;;  %v363_v24 = vadd.f32 %v3870_v40, %v323_v11  ;;  %v387_v28 = vadd.f32 %v3870_v40, %v347_v18  ;;  %v306_v30 = vld [vmem:[%s3846_s24 + $0xc8] sm:$0xff] }
  0x9a   : > { %685 = vst [vmem:[#allocation2 + $0x22] sm:$0xff] %v3972_v31  ;;  %v1700_v42 = vpack.c.bf16 %v3925_v29, %v3972_v31  ;;  %v813_v58 = vld [vmem:[#allocation2 + $0xc0] sm:$0xff]  ;;  %v814_v59 = vld [vmem:[#allocation2 + $0xc8] sm:$0xff]  ;;  %v346_v38 = vmul.f32 %v3861_v37, %v306_v30  ;;  %v410_v39 = vmax.f32 %v374_v27, 0.0  ;;  %1062 = vmatpush.bf16.msrb.mxu1 %v3573_v3 }
  0x9b   : > { %696 = vst [vmem:[#allocation2 + $0x7a] sm:$0xff] %v660_v33  ;;  %v838_v9 = vpack.c.bf16 %v814_v59, %v813_v58  ;;  %v297_v33 = vld [vmem:[%s3846_s24 + $0x80] sm:$0xff]  ;;  %v399_v36 = vmax.f32 %v363_v24, 0.0  ;;  %v423_v41 = vmax.f32 %v387_v28, 0.0  ;;  %v312_v59 = vld [vmem:[%s3846_s24 + $0xf8] sm:$0xff]  ;;  %v3588_v11 = vld [vmem:[%s4559_s5 + $0x88] sm:$0xff]  ;;  %1789 = vmatpush.bf16.msrb.mxu0 %v3604_v46 }
  0x9c   : > { %688 = vst [vmem:[#allocation2 + $0x3a] sm:$0xff] %v3975_v34  ;;  %v337_v44 = vmul.f32 %v3861_v37, %v297_v33  ;;  %1281 = vmatpush.bf16.msrb.mxu2 %v3588_v11  ;;  %v286_v24 = vld [vmem:[%s3846_s24 + $0x28] sm:$0xff]  ;;  %v285_v30 = vld [vmem:[%s3846_s24 + $0x20] sm:$0xff] }
  0x9d   : > { %v3572_v33 = vld [vmem:[%s4559_s5 + $0x8] sm:$0xff] }
  0x9e   : > { %v377_v58 = vadd.f32 %v3870_v40, %v337_v44  ;;  %v3587_v44 = vld [vmem:[%s4559_s5 + $0x80] sm:$0xff]  ;;  %1063 = vmatpush.bf16.msrb.mxu1 %v3572_v33 }
  0x9f   : > { %v587_v53 = vpop.permute.xlu1 %586 }
  0xa0   : > { %v582_v54 = vpop.permute.xlu0 %581  ;;  %v622_v55 = vpop.permute.xlu2 %621  ;;  %v672_v56 = vmul.f32 %v587_v53, %v420_v43  ;;  %v345_v43 = vmul.f32 %v3861_v37, %v305_v32  ;;  %v413_v7 = vmax.f32 %v377_v58, 0.0  ;;  %1282 = vmatpush.bf16.msrb.mxu2 %v3587_v44 }
  0xa1   : > { %v671_v61 = vmul.f32 %v582_v54, %v419_v47  ;;  %v679_v62 = vmul.f32 %v622_v55, %v427_v48  ;;  %v793_v63 = vld [vmem:[#allocation2 + $0x20] sm:$0xff]  ;;  %v794_v0 = vld [vmem:[#allocation2 + $0x28] sm:$0xff]  ;;  %v386_v54 = vadd.f32 %v3870_v40, %v346_v38  ;;  %v326_v38 = vmul.f32 %v3861_v37, %v286_v24 }
  0xa2   : > { %708 = vst [vmem:[#allocation2 + $0xda] sm:$0xff] %v672_v56  ;;  %v828_v4 = vpack.c.bf16 %v794_v0, %v793_v63  ;;  %v804_v5 = vld [vmem:[#allocation2 + $0x78] sm:$0xff]  ;;  %v3599_v47 = vld [vmem:[%s4559_s5 + $0xe0] sm:$0xff] }
  0xa3   : > { %707 = vst [vmem:[#allocation2 + $0xd2] sm:$0xff] %v671_v61  ;;  %v833_v8 = vpack.c.bf16 %v804_v5, %v803_v57  ;;  %v385_v57 = vadd.f32 %v3870_v40, %v345_v43  ;;  %1532 = vmatpush.bf16.msrb.mxu3 %v3599_v47  ;;  %v316_v63 = vld [vmem:[%s3846_s24 + $0x118] sm:$0xff]  ;;  %v335_v5 = vmul.f32 %v3861_v37, %v295_v60  ;;  %v805_v27 = vld [vmem:[#allocation2 + $0x80] sm:$0xff] }
  0xa4   : > { %715 = vst [vmem:[#allocation2 + $0x112] sm:$0xff] %v679_v62  ;;  %923 = vmatmul.bf16.gmra.mxu0 %v828_v4  ;;  %v422_v4 = vmax.f32 %v386_v54, 0.0  ;;  %v325_v43 = vmul.f32 %v3861_v37, %v285_v30  ;;  %v313_v60 = vld [vmem:[%s3846_s24 + $0x100] sm:$0xff]  ;;  %v3634_v30 = vld [vmem:[%s4559_s5 + $0x1f8] sm:$0xff] }
  0xa5   : > { %948 = vmatmul.bf16.gmra.mxu1 %v833_v8  ;;  %973 = vmatmul.bf16.gmra.mxu2 %v838_v9  ;;  %v421_v6 = vmax.f32 %v385_v57, 0.0  ;;  %v352_v8 = vmul.f32 %v3861_v37, %v312_v59  ;;  %v356_v9 = vmul.f32 %v3861_v37, %v316_v63  ;;  %v375_v17 = vadd.f32 %v3870_v40, %v335_v5  ;;  %v314_v57 = vld [vmem:[%s3846_s24 + $0x108] sm:$0xff]  ;;  %v3595_v5 = vld [vmem:[%s4559_s5 + $0xc0] sm:$0xff] }
  0xa6   : > { %v353_v3 = vmul.f32 %v3861_v37, %v313_v60 }
  0xa7   : > { %v617_v20 = vpop.permute.xlu1 %616 }
  0xa8   : > { %v612_v21 = vpop.permute.xlu0 %611  ;;  %v547_v22 = vpop.permute.xlu2 %546  ;;  %v678_v23 = vmul.f32 %v617_v20, %v426_v10  ;;  %v3598_v10 = vld [vmem:[%s4559_s5 + $0xd8] sm:$0xff] }
  0xa9   : > { %v677_v25 = vmul.f32 %v612_v21, %v425_v15  ;;  %v4023_v26 = vmul.f32 %v547_v22, %v412_v16  ;;  %1533 = vmatpush.bf16.msrb.mxu3 %v3598_v10  ;;  %v392_v22 = vadd.f32 %v3870_v40, %v352_v8 }
  0xaa   : > { %714 = vst [vmem:[#allocation2 + $0x10a] sm:$0xff] %v678_v23  ;;  %v815_v52 = vld [vmem:[#allocation2 + $0xd0] sm:$0xff]  ;;  %v816_v53 = vld [vmem:[#allocation2 + $0xd8] sm:$0xff]  ;;  %v396_v23 = vadd.f32 %v3870_v40, %v356_v9 }
  0xab   : > { %713 = vst [vmem:[#allocation2 + $0x102] sm:$0xff] %v677_v25  ;;  %v839_v1 = vpack.c.bf16 %v816_v53, %v815_v52  ;;  %v366_v52 = vadd.f32 %v3870_v40, %v326_v38 }
  0xac   : > { %700 = vst [vmem:[#allocation2 + $0x9a] sm:$0xff] %v4023_v26 }
  0xad   : > { %1534 = vmatpush.bf16.msrb.mxu3 %v3597_v35  ;;  %v402_v63 = vmax.f32 %v366_v52, 0.0  ;;  %v3642_v52 = vld [vmem:[%s4559_s5 + $0x238] sm:$0xff] }
  0xaf   : > { %v482_v48 = vpop.permute.xlu1 %481 }
  0xb0   : > { %v537_v49 = vpop.permute.xlu0 %536  ;;  %v602_v50 = vpop.permute.xlu2 %601  ;;  %v4046_v51 = vmul.f32 %v482_v48, %v399_v36  ;;  %v411_v36 = vmax.f32 %v375_v17, 0.0 }
  0xb1   : > { %v4049_v55 = vmul.f32 %v537_v49, %v410_v39  ;;  %v675_v56 = vmul.f32 %v602_v50, %v423_v41  ;;  %v428_v39 = vmax.f32 %v392_v22, 0.0  ;;  %v432_v41 = vmax.f32 %v396_v23, 0.0  ;;  %1535 = vmatpush.bf16.msrb.mxu3 %v3596_v45 }
  0xb2   : > { %687 = vst [vmem:[#allocation2 + $0x32] sm:$0xff] %v4046_v51  ;;  %v821_v61 = vld [vmem:[#allocation2 + $0x100] sm:$0xff]  ;;  %v822_v62 = vld [vmem:[#allocation2 + $0x108] sm:$0xff]  ;;  %v1701_v0 = vpack.c.bf16 %v3975_v34, %v4046_v51 }
  0xb3   : > { %698 = vst [vmem:[#allocation2 + $0x8a] sm:$0xff] %v4049_v55  ;;  %v842_v2 = vpack.c.bf16 %v822_v62, %v821_v61  ;;  %v3632_v34 = vld [vmem:[%s4559_s5 + $0x1e8] sm:$0xff] }
  0xb4   : > { %711 = vst [vmem:[#allocation2 + $0xf2] sm:$0xff] %v675_v56  ;;  %v365_v56 = vadd.f32 %v3870_v40, %v325_v43  ;;  %v3616_v51 = vld [vmem:[%s4559_s5 + $0x168] sm:$0xff] }
  0xb5   : > { %978 = vmatmul.bf16.gmra.mxu2 %v839_v1  ;;  %993 = vmatmul.bf16.vlgmr.msra.gmra.mxu3 %v842_v2  ;;  %v354_v1 = vmul.f32 %v3861_v37, %v314_v57 }
  0xb6   : > { %v401_v2 = vmax.f32 %v365_v56, 0.0  ;;  %1536 = vmatpush.bf16.msrb.mxu3 %v3595_v5 }
  0xb7   : > { %v597_v13 = vpop.permute.xlu1 %596  ;;  %v394_v11 = vadd.f32 %v3870_v40, %v354_v1  ;;  %v1156_v1 = vld [vmem:[#allocation2 + $0x11] sm:$0xff] }
  0xb8   : > { %v592_v14 = vpop.permute.xlu0 %591  ;;  %v552_v15 = vpop.permute.xlu2 %551  ;;  %v674_v16 = vmul.f32 %v597_v13, %v422_v4  ;;  %v3571_v4 = vld [vmem:[%s4559_s5] sm:$0xff] }
  0xb9   : > { %v673_v18 = vmul.f32 %v592_v14, %v421_v6  ;;  %v4076_v19 = vmul.f32 %v552_v15, %v413_v7  ;;  %v795_v20 = vld [vmem:[#allocation2 + $0x30] sm:$0xff]  ;;  %v796_v21 = vld [vmem:[#allocation2 + $0x38] sm:$0xff]  ;;  %v3603_v6 = vld [vmem:[%s4559_s5 + $0x100] sm:$0xff]  ;;  %1064 = vmatpush.bf16.msrb.mxu1 %v3571_v4  ;;  %v393_v15 = vadd.f32 %v3870_v40, %v353_v3  ;;  %v430_v24 = vmax.f32 %v394_v11, 0.0 }
  0xba   : > { %710 = vst [vmem:[#allocation2 + $0xea] sm:$0xff] %v674_v16  ;;  %v829_v25 = vpack.c.bf16 %v796_v21, %v795_v20  ;;  %v806_v28 = vld [vmem:[#allocation2 + $0x88] sm:$0xff]  ;;  %v3626_v7 = vld [vmem:[%s4559_s5 + $0x1b8] sm:$0xff]  ;;  %1790 = vmatpush.bf16.msrb.mxu0 %v3603_v6  ;;  %v315_v16 = vld [vmem:[%s3846_s24 + $0x110] sm:$0xff]  ;;  %2545 = vmatpush.bf16.msra.mxu3 %v3634_v30 }
  0xbb   : > { %709 = vst [vmem:[#allocation2 + $0xe2] sm:$0xff] %v673_v18  ;;  %v834_v32 = vpack.c.bf16 %v806_v28, %v805_v27  ;;  %2291 = vmatpush.bf16.msra.mxu2 %v3626_v7  ;;  %v823_v18 = vld [vmem:[#allocation2 + $0x110] sm:$0xff]  ;;  %v429_v27 = vmax.f32 %v393_v15, 0.0  ;;  %v820_v45 = vld [vmem:[#allocation2 + $0xf8] sm:$0xff] }
  0xbc   : > { %701 = vst [vmem:[#allocation2 + $0xa2] sm:$0xff] %v4076_v19  ;;  %928 = vmatmul.bf16.gmra.mxu0 %v829_v25  ;;  %v287_v21 = vld [vmem:[%s3846_s24 + $0x30] sm:$0xff]  ;;  %v355_v25 = vmul.f32 %v3861_v37, %v315_v16 }
  0xbd   : > { %953 = vmatmul.bf16.gmra.mxu1 %v834_v32  ;;  %v327_v28 = vmul.f32 %v3861_v37, %v287_v21  ;;  %v3618_v32 = vld [vmem:[%s4559_s5 + $0x178] sm:$0xff]  ;;  %v721_v7 = vld [vmem:[#allocation2 + $0xf] sm:$0xff] }
  0xbe   : > { %2037 = vmatpush.bf16.msra.mxu1 %v3618_v32  ;;  %2799 = vmatpush.bf16.msra.mxu0 %v3642_v52  ;;  %v1411_v11 = vld [vmem:[#allocation2 + $0x29] sm:$0xff]  ;;  %v1412_v21 = vld [vmem:[#allocation2 + $0x31] sm:$0xff] }
  0xbf   : > { %v542_v47 = vpop.permute.xlu1 %541  ;;  %v367_v43 = vadd.f32 %v3870_v40, %v327_v28  ;;  %v3625_v15 = vld [vmem:[%s4559_s5 + $0x1b0] sm:$0xff] }
  0xc0   : > { %v627_v48 = vpop.permute.xlu0 %626  ;;  %v647_v49 = vpop.permute.xlu2 %646  ;;  %v4100_v50 = vmul.f32 %v542_v47, %v411_v36  ;;  %v3633_v16 = vld [vmem:[%s4559_s5 + $0x1f0] sm:$0xff]  ;;  %2292 = vmatpush.bf16.msra.mxu2 %v3625_v15 }
  0xc1   : > { %v680_v53 = vmul.f32 %v627_v48, %v428_v39  ;;  %v684_v54 = vmul.f32 %v647_v49, %v432_v41  ;;  %v819_v38 = vld [vmem:[#allocation2 + $0xf0] sm:$0xff]  ;;  %v395_v39 = vadd.f32 %v3870_v40, %v355_v25  ;;  %v403_v49 = vmax.f32 %v367_v43, 0.0  ;;  %2546 = vmatpush.bf16.msra.mxu3 %v3633_v16  ;;  %v4185_v43 = vpop.f32.mrf.mxu0 }
  0xc2   : > { %699 = vst [vmem:[#allocation2 + $0x92] sm:$0xff] %v4100_v50  ;;  %v817_v58 = vld [vmem:[#allocation2 + $0xe0] sm:$0xff]  ;;  %v818_v59 = vld [vmem:[#allocation2 + $0xe8] sm:$0xff]  ;;  %v1707_v61 = vpack.c.bf16 %v4023_v26, %v4100_v50  ;;  %v841_v47 = vpack.c.bf16 %v820_v45, %v819_v38  ;;  %v726_v31 = vld [vmem:[#allocation2 + $0x37] sm:$0xff] }
  0xc3   : > { %716 = vst [vmem:[#allocation2 + $0x11a] sm:$0xff] %v680_v53  ;;  %v840_v62 = vpack.c.bf16 %v818_v59, %v817_v58  ;;  %v431_v48 = vmax.f32 %v395_v39, 0.0  ;;  %v809_v40 = vld [vmem:[#allocation2 + $0xa0] sm:$0xff]  ;;  %v810_v57 = vld [vmem:[#allocation2 + $0xa8] sm:$0xff] }
  0xc4   : > { %720 = vst [vmem:[#allocation2 + $0x13a] sm:$0xff] %v684_v54  ;;  %v725_v29 = vld [vmem:[#allocation2 + $0x2f] sm:$0xff]  ;;  %v1671_v45 = vld [vmem:[#allocation2 + $0x5a] sm:$0xff] }
  0xc5   : > { %983 = vmatmul.bf16.gmra.mxu2 %v840_v62  ;;  %v836_v62 = vpack.c.bf16 %v810_v57, %v809_v40  ;;  %v759_v30 = vpack.c.bf16 %v726_v31, %v725_v29  ;;  %2547 = vmatpush.bf16.msra.mxu3 %v3632_v34  ;;  %v734_v31 = vld [vmem:[#allocation2 + $0x77] sm:$0xff] }
  0xc7   : > { %v497_v8 = vpop.permute.xlu1 %496 }
  0xc8   : > { %v492_v9 = vpop.permute.xlu0 %491  ;;  %v4123_v10 = vmul.f32 %v497_v8, %v402_v63  ;;  %v722_v8 = vld [vmem:[#allocation2 + $0x17] sm:$0xff] }
  0xc9   : > { %v4126_v12 = vmul.f32 %v492_v9, %v401_v2  ;;  %v807_v13 = vld [vmem:[#allocation2 + $0x90] sm:$0xff]  ;;  %v808_v14 = vld [vmem:[#allocation2 + $0x98] sm:$0xff]  ;;  %v1410_v9 = vld [vmem:[#allocation2 + $0x21] sm:$0xff] }
  0xca   : > { %690 = vst [vmem:[#allocation2 + $0x4a] sm:$0xff] %v4123_v10  ;;  %v835_v17 = vpack.c.bf16 %v808_v14, %v807_v13  ;;  %v824_v20 = vld [vmem:[#allocation2 + $0x118] sm:$0xff]  ;;  %v757_v13 = vpack.c.bf16 %v722_v8, %v721_v7  ;;  %v1446_v14 = vpack.c.bf16 %v1411_v11, %v1410_v9  ;;  %v3631_v7 = vld [vmem:[%s4559_s5 + $0x1e0] sm:$0xff] }
  0xcb   : > { %689 = vst [vmem:[#allocation2 + $0x42] sm:$0xff] %v4126_v12  ;;  %v843_v22 = vpack.c.bf16 %v824_v20, %v823_v18  ;;  %v1702_v23 = vpack.c.bf16 %v4123_v10, %v4126_v12  ;;  %v1157_v2 = vld [vmem:[#allocation2 + $0x19] sm:$0xff]  ;;  %v724_v20 = vld [vmem:[#allocation2 + $0x27] sm:$0xff]  ;;  %v1420_v11 = vld [vmem:[#allocation2 + $0x71] sm:$0xff]  ;;  %2548 = vmatpush.bf16.msra.mxu3 %v3631_v7 }
  0xcc   : > { %v1192_v3 = vpack.c.bf16 %v1157_v2, %v1156_v1  ;;  %v723_v18 = vld [vmem:[#allocation2 + $0x1f] sm:$0xff]  ;;  %v732_v9 = vld [vmem:[#allocation2 + $0x67] sm:$0xff] }
  0xcd   : > { %958 = vmatmul.bf16.gmra.mxu1 %v835_v17  ;;  %998 = vmatmul.bf16.gmra.mxu3 %v843_v22  ;;  %v3617_v17 = vld [vmem:[%s4559_s5 + $0x170] sm:$0xff]  ;;  %v1413_v22 = vld [vmem:[#allocation2 + $0x39] sm:$0xff]  ;;  %v758_v25 = vpack.c.bf16 %v724_v20, %v723_v18 }
  0xce   : > { %2038 = vmatpush.bf16.msra.mxu1 %v3617_v17  ;;  %v3623_v2 = vld [vmem:[%s4559_s5 + $0x1a0] sm:$0xff] }
  0xcf   : > { %v637_v33 = vpop.permute.xlu1 %636  ;;  %v1675_v20 = vld [vmem:[#allocation2 + $0x7a] sm:$0xff] }
  0xd0   : > { %v632_v35 = vpop.permute.xlu0 %631  ;;  %v682_v36 = vmul.f32 %v637_v33, %v430_v24  ;;  %v3641_v24 = vld [vmem:[%s4559_s5 + $0x230] sm:$0xff]  ;;  %v3624_v33 = vld [vmem:[%s4559_s5 + $0x1a8] sm:$0xff] }
  0xd1   : > { %v681_v41 = vmul.f32 %v632_v35, %v429_v27  ;;  %2800 = vmatpush.bf16.msra.mxu0 %v3641_v24  ;;  %v1447_v27 = vpack.c.bf16 %v1413_v22, %v1412_v21  ;;  %2293 = vmatpush.bf16.msra.mxu2 %v3624_v33  ;;  %v3639_v21 = vld [vmem:[%s4559_s5 + $0x220] sm:$0xff]  ;;  %v1674_v24 = vld [vmem:[#allocation2 + $0x72] sm:$0xff] }
  0xd2   : > { %718 = vst [vmem:[#allocation2 + $0x12a] sm:$0xff] %v682_v36  ;;  %v797_v37 = vld [vmem:[#allocation2 + $0x40] sm:$0xff]  ;;  %v798_v44 = vld [vmem:[#allocation2 + $0x48] sm:$0xff]  ;;  %2039 = vmatpush.bf16.msra.mxu1 %v3616_v51 }
  0xd3   : > { %717 = vst [vmem:[#allocation2 + $0x122] sm:$0xff] %v681_v41  ;;  %v830_v46 = vpack.c.bf16 %v798_v44, %v797_v37  ;;  %v1415_v28 = vld [vmem:[#allocation2 + $0x49] sm:$0xff]  ;;  %v1422_v33 = vld [vmem:[#allocation2 + $0x81] sm:$0xff] }
  0xd4   : > { %v728_v38 = vld [vmem:[#allocation2 + $0x47] sm:$0xff] }
  0xd5   : > { %933 = vmatmul.bf16.gmra.mxu0 %v830_v46  ;;  %988 = vmatmul.bf16.gmra.mxu2 %v841_v47  ;;  %v4195_v47 = vpop.f32.mrf.mxu0 }
  0xd6   : > { %2294 = vmatpush.bf16.msra.mxu2 %v3623_v2 }
  0xd7   : > { %v642_v53 = vpop.permute.xlu1 %641 }
  0xd8   : > { %v502_v54 = vpop.permute.xlu0 %501  ;;  %v683_v56 = vmul.f32 %v642_v53, %v431_v48 }
  0xd9   : > { %v4148_v58 = vmul.f32 %v502_v54, %v403_v49  ;;  %v1418_v54 = vld [vmem:[#allocation2 + $0x61] sm:$0xff] }
  0xda   : > { %719 = vst [vmem:[#allocation2 + $0x132] sm:$0xff] %v683_v56  ;;  %v825_v59 = vld [vmem:[#allocation2 + $0x120] sm:$0xff]  ;;  %v826_v60 = vld [vmem:[#allocation2 + $0x128] sm:$0xff] }
  0xdb   : > { %691 = vst [vmem:[#allocation2 + $0x52] sm:$0xff] %v4148_v58  ;;  %v844_v63 = vpack.c.bf16 %v826_v60, %v825_v59  ;;  %v1703_v46 = vpack.c.bf16 %v1671_v45, %v4148_v58  ;;  %v1419_v56 = vld [vmem:[#allocation2 + $0x69] sm:$0xff] }
  0xdc   : > { %v1450_v57 = vpack.c.bf16 %v1419_v56, %v1418_v54  ;;  %v1672_v58 = vld [vmem:[#allocation2 + $0x62] sm:$0xff] }
  0xdd   : > { %963 = vmatmul.bf16.gmra.mxu1 %v836_v62  ;;  %1003 = vmatmul.bf16.gmra.mxu3 %v844_v63  ;;  %v1673_v62 = vld [vmem:[#allocation2 + $0x6a] sm:$0xff] }
  0xde   : > { %v1704_v1 = vpack.c.bf16 %v1673_v62, %v1672_v58  ;;  %v3630_v62 = vld [vmem:[%s4559_s5 + $0x1d8] sm:$0xff] }
  0xdf   : > { %2549 = vmatpush.bf16.msra.mxu3 %v3630_v62  ;;  %v1429_v62 = vld [vmem:[#allocation2 + $0xb9] sm:$0xff] }
  0xe2   : > { %v799_v4 = vld [vmem:[#allocation2 + $0x50] sm:$0xff]  ;;  %v800_v5 = vld [vmem:[#allocation2 + $0x58] sm:$0xff] }
  0xe3   : > { %v831_v6 = vpack.c.bf16 %v800_v5, %v799_v4  ;;  %v1416_v39 = vld [vmem:[#allocation2 + $0x51] sm:$0xff]  ;;  %v1417_v41 = vld [vmem:[#allocation2 + $0x59] sm:$0xff] }
  0xe4   : > { %v1449_v12 = vpack.c.bf16 %v1417_v41, %v1416_v39  ;;  %v729_v52 = vld [vmem:[#allocation2 + $0x4f] sm:$0xff]  ;;  %v730_v53 = vld [vmem:[#allocation2 + $0x57] sm:$0xff]  ;;  %v731_v5 = vld [vmem:[#allocation2 + $0x5f] sm:$0xff] }
  0xe5   : > { %938 = vmatmul.bf16.gmra.mxu0 %v831_v6  ;;  %1283 = vmatmul.bf16.vlgmr.msrb.gmra.mxu2 %v1192_v3  ;;  %v761_v40 = vpack.c.bf16 %v730_v53, %v729_v52  ;;  %v1421_v6 = vld [vmem:[#allocation2 + $0x79] sm:$0xff]  ;;  %v1424_v52 = vld [vmem:[#allocation2 + $0x91] sm:$0xff] }
  0xe6   : > { %v1451_v15 = vpack.c.bf16 %v1421_v6, %v1420_v11  ;;  %v1425_v53 = vld [vmem:[#allocation2 + $0x99] sm:$0xff]  ;;  %v1426_v11 = vld [vmem:[#allocation2 + $0xa1] sm:$0xff] }
  0xe7   : > { %v1453_v58 = vpack.c.bf16 %v1425_v53, %v1424_v52  ;;  %v1428_v53 = vld [vmem:[#allocation2 + $0xb1] sm:$0xff] }
  0xed   : > { %1065 = vmatmul.bf16.vlgmr.msrb.gmra.mxu1 %v757_v13  ;;  %1537 = vmatmul.bf16.vlgmr.msrb.gmra.mxu3 %v1446_v14  ;;  %v3615_v13 = vld [vmem:[%s4559_s5 + $0x160] sm:$0xff] }
  0xee   : > { %2040 = vmatpush.bf16.msra.mxu1 %v3615_v13 }
  0xf5   : > { %1288 = vmatmul.bf16.gmra.mxu2 %v1446_v14  ;;  %1791 = vmatmul.bf16.vlgmr.msrb.gmra.mxu0 %v1700_v42  ;;  %v1414_v42 = vld [vmem:[#allocation2 + $0x41] sm:$0xff]  ;;  %v762_v14 = vpack.c.bf16 %v732_v9, %v731_v5  ;;  %v3638_v9 = vld [vmem:[%s4559_s5 + $0x218] sm:$0xff] }
  0xf6   : > { %v1448_v32 = vpack.c.bf16 %v1415_v28, %v1414_v42  ;;  %v1423_v42 = vld [vmem:[#allocation2 + $0x89] sm:$0xff] }
  0xf7   : > { %v1452_v51 = vpack.c.bf16 %v1423_v42, %v1422_v33 }
  0xfd   : > { %1070 = vmatmul.bf16.gmra.mxu1 %v758_v25  ;;  %1542 = vmatmul.bf16.gmra.mxu3 %v1447_v27  ;;  %v1705_v25 = vpack.c.bf16 %v1675_v20, %v1674_v24  ;;  %v738_v20 = vld [vmem:[#allocation2 + $0x97] sm:$0xff] }
 0x105   : > { %1293 = vmatmul.bf16.gmra.mxu2 %v1447_v27  ;;  %1796 = vmatmul.bf16.gmra.mxu0 %v1701_v0  ;;  %v727_v0 = vld [vmem:[#allocation2 + $0x3f] sm:$0xff] }
 0x106   : > { %v760_v10 = vpack.c.bf16 %v728_v38, %v727_v0 }
 0x10d   : > { %1075 = vmatmul.bf16.gmra.mxu1 %v759_v30  ;;  %1547 = vmatmul.bf16.gmra.mxu3 %v1448_v32 }
 0x111   : > { %v4172_v35 = vpop.f32.mrf.mxu1 }
 0x115   : > { %1298 = vmatmul.bf16.gmra.mxu2 %v1448_v32  ;;  %1801 = vmatmul.bf16.gmra.mxu0 %v1702_v23  ;;  %v3640_v23 = vld [vmem:[%s4559_s5 + $0x228] sm:$0xff] }
 0x116   : > { %2801 = vmatpush.bf16.msra.mxu0 %v3640_v23  ;;  %v733_v32 = vld [vmem:[#allocation2 + $0x6f] sm:$0xff] }
 0x117   : > { %v763_v34 = vpack.c.bf16 %v734_v31, %v733_v32 }
 0x118   : > { %v4183_v36 = vpop.f32.mrf.mxu2 }
 0x119   : > { %v4190_v37 = vpop.f32.mrf.mxu1 }
 0x11a   : > { %2802 = vmatpush.bf16.msra.mxu0 %v3639_v21  ;;  %v1427_v21 = vld [vmem:[#allocation2 + $0xa9] sm:$0xff] }
 0x11b   : > { %v1454_v26 = vpack.c.bf16 %v1427_v21, %v1426_v11  ;;  %v3621_v21 = vld [vmem:[%s4559_s5 + $0x190] sm:$0xff] }
 0x11d   : > { %1080 = vmatmul.bf16.gmra.mxu1 %v760_v10  ;;  %1552 = vmatmul.bf16.gmra.mxu3 %v1449_v12  ;;  %v1676_v10 = vld [vmem:[#allocation2 + $0x82] sm:$0xff] }
 0x11e   : > { %2803 = vmatpush.bf16.msra.mxu0 %v3638_v9 }
 0x120   : > { %v4192_v44 = vpop.f32.mrf.mxu2 }
 0x121   : > { %v4201_v59 = vpop.f32.mrf.mxu0 }
 0x122   : > { %v4197_v48 = vpop.f32.mrf.mxu1 }
 0x125   : > { %1303 = vmatmul.bf16.gmra.mxu2 %v1449_v12  ;;  %1806 = vmatmul.bf16.gmra.mxu0 %v1703_v46  ;;  %v1706_v12 = vpack.c.bf16 %v4049_v55, %v1676_v10  ;;  %v736_v46 = vld [vmem:[#allocation2 + $0x87] sm:$0xff]  ;;  %v3622_v55 = vld [vmem:[%s4559_s5 + $0x198] sm:$0xff] }
 0x126   : > { %2295 = vmatpush.bf16.msra.mxu2 %v3622_v55  ;;  %v1681_v10 = vld [vmem:[#allocation2 + $0xaa] sm:$0xff] }
 0x127   : > { %v1708_v52 = vpack.c.bf16 %v1681_v10, %v4076_v19  ;;  %v740_v55 = vld [vmem:[#allocation2 + $0xa7] sm:$0xff]  ;;  %v3613_v10 = vld [vmem:[%s4559_s5 + $0x150] sm:$0xff] }
 0x128   : > { %v4199_v49 = vpop.f32.mrf.mxu2 }
 0x129   : > { %v4210_v3 = vpop.f32.mrf.mxu0 }
 0x12a   : > { %v4205_v63 = vpop.f32.mrf.mxu1  ;;  %2296 = vmatpush.bf16.msra.mxu2 %v3621_v21 }
 0x12d   : > { %1085 = vmatmul.bf16.gmra.mxu1 %v761_v40  ;;  %1557 = vmatmul.bf16.gmra.mxu3 %v1450_v57  ;;  %v735_v40 = vld [vmem:[#allocation2 + $0x7f] sm:$0xff] }
 0x130   : > { %v4203_v60 = vpop.f32.mrf.mxu2 }
 0x135   : > { %1308 = vmatmul.bf16.gmra.mxu2 %v1450_v57  ;;  %1811 = vmatmul.bf16.gmra.mxu0 %v1704_v1  ;;  %v764_v57 = vpack.c.bf16 %v736_v46, %v735_v40  ;;  %v3614_v1 = vld [vmem:[%s4559_s5 + $0x158] sm:$0xff] }
 0x136   : > { %2041 = vmatpush.bf16.msra.mxu1 %v3614_v1 }
 0x138   : > { %v4212_v4 = vpop.f32.mrf.mxu2  ;;  %v4222_v16 = vpop.f32.mrf.mxu3 }
 0x139   : > { %v4224_v17 = vpop.f32.mrf.mxu0 }
 0x13a   : > { %v4217_v8 = vpop.f32.mrf.mxu1  ;;  %2042 = vmatpush.bf16.msra.mxu1 %v3613_v10 }
 0x13d   : > { %1090 = vmatmul.bf16.gmra.mxu1 %v762_v14  ;;  %1562 = vmatmul.bf16.gmra.mxu3 %v1451_v15 }
 0x140   : > { %v4226_v18 = vpop.f32.mrf.mxu2  ;;  %v4233_v27 = vpop.f32.mrf.mxu3 }
 0x141   : > { %v4237_v28 = vpop.f32.mrf.mxu0 }
 0x142   : > { %v4231_v22 = vpop.f32.mrf.mxu1 }
 0x145   : > { %1313 = vmatmul.bf16.gmra.mxu2 %v1451_v15  ;;  %1816 = vmatmul.bf16.gmra.mxu0 %v1705_v25  ;;  %v737_v15 = vld [vmem:[#allocation2 + $0x8f] sm:$0xff] }
 0x146   : > { %v765_v42 = vpack.c.bf16 %v738_v20, %v737_v15  ;;  %v1455_v20 = vpack.c.bf16 %v1429_v62, %v1428_v53 }
 0x148   : > { %v4235_v29 = vpop.f32.mrf.mxu2 }
 0x14a   : > { %v4239_v30 = vpop.f32.mrf.mxu1 }
 0x14d   : > { %1095 = vmatmul.bf16.gmra.mxu1 %v763_v34  ;;  %1567 = vmatmul.bf16.gmra.mxu3 %v1452_v51 }
 0x150   : > { %v4241_v0 = vpop.f32.mrf.mxu2  ;;  %v4243_v38 = vpop.f32.mrf.mxu3 }
 0x152   : > { %v4245_v39 = vpop.f32.mrf.mxu0  ;;  %v4247_v41 = vpop.f32.mrf.mxu1 }
 0x155   : > { %1318 = vmatmul.bf16.gmra.mxu2 %v1452_v51  ;;  %1821 = vmatmul.bf16.gmra.mxu0 %v1706_v12 }
 0x158   : > { %v4250_v23 = vpop.f32.mrf.mxu2  ;;  %v4252_v45 = vpop.f32.mrf.mxu3 }
 0x15a   : > { %v4254_v54 = vpop.f32.mrf.mxu0  ;;  %v4256_v56 = vpop.f32.mrf.mxu1 }
 0x15d   : > { %1100 = vmatmul.bf16.gmra.mxu1 %v764_v57  ;;  %1572 = vmatmul.bf16.gmra.mxu3 %v1453_v58 }
 0x160   : > { %v4267_v2 = vpop.f32.mrf.mxu2  ;;  %v4269_v5 = vpop.f32.mrf.mxu3 }
 0x162   : > { %v4271_v6 = vpop.f32.mrf.mxu0  ;;  %v4273_v7 = vpop.f32.mrf.mxu1 }
 0x165   : > { %1323 = vmatmul.bf16.gmra.mxu2 %v1453_v58  ;;  %1826 = vmatmul.bf16.gmra.mxu0 %v1707_v61  ;;  %v739_v58 = vld [vmem:[#allocation2 + $0x9f] sm:$0xff] }
 0x168   : > { %v4281_v13 = vpop.f32.mrf.mxu3  ;;  %v1284_v14 = vpop.f32.mrf.mxu2 }
 0x16a   : > { %v4283_v24 = vpop.f32.mrf.mxu0  ;;  %v1066_v25 = vpop.f32.mrf.mxu1 }
 0x16b   : > { %v1067_v31 = vadd.f32 %v1066_v25, %v4185_v43 }
 0x16d   : > { %1105 = vmatmul.bf16.gmra.mxu1 %v765_v42  ;;  %1577 = vmatmul.bf16.gmra.mxu3 %v1454_v26  ;;  %v1374_v50 = vadd.f32 %v1284_v14, %v1067_v31  ;;  %v1682_v42 = vld [vmem:[#allocation2 + $0xb2] sm:$0xff] }
 0x170   : > { %v1286_v61 = vpop.f32.mrf.mxu2  ;;  %v1538_v32 = vpop.f32.mrf.mxu3 }
 0x171   : > { %v1628_v33 = vadd.f32 %v1538_v32, %v1374_v50  ;;  %v1683_v32 = vld [vmem:[#allocation2 + $0xba] sm:$0xff] }
 0x172   : > { %v1068_v34 = vpop.f32.mrf.mxu1  ;;  %v1792_v51 = vpop.f32.mrf.mxu0 }
 0x173   : > { %v1069_v12 = vadd.f32 %v1068_v34, %v4195_v47  ;;  %v4287_v46 = vadd.f32 %v1792_v51, %v1628_v33  ;;  %v766_v47 = vpack.c.bf16 %v740_v55, %v739_v58  ;;  %v1709_v51 = vpack.c.bf16 %v1683_v32, %v1682_v42  ;;  %v1431_v58 = vld [vmem:[#allocation2 + $0xc9] sm:$0xff] }
 0x175   : > { %1328 = vmatmul.bf16.gmra.mxu2 %v1454_v26  ;;  %1831 = vmatmul.bf16.gmra.mxu0 %v1708_v52  ;;  %v1375_v43 = vadd.f32 %v1286_v61, %v1069_v12  ;;  %v741_v52 = vld [vmem:[#allocation2 + $0xaf] sm:$0xff] }
 0x178   : > { %v1289_v40 = vpop.f32.mrf.mxu2  ;;  %v1540_v57 = vpop.f32.mrf.mxu3 }
 0x179   : > { %v1629_v1 = vadd.f32 %v1540_v57, %v1375_v43  ;;  %v1430_v57 = vld [vmem:[#allocation2 + $0xc1] sm:$0xff] }
 0x17a   : > { %v1071_v9 = vpop.f32.mrf.mxu1  ;;  %v1794_v11 = vpop.f32.mrf.mxu0 }
 0x17b   : > { %v1072_v14 = vadd.f32 %v1071_v9, %v4201_v59  ;;  %v4291_v15 = vadd.f32 %v1794_v11, %v1629_v1  ;;  %v3629_v59 = vld [vmem:[%s4559_s5 + $0x1d0] sm:$0xff] }
 0x17c   : > { %2550 = vmatpush.bf16.msra.mxu3 %v3629_v59 }
 0x17d   : > { %1110 = vmatmul.bf16.gmra.mxu1 %v766_v47  ;;  %1582 = vmatmul.bf16.gmra.mxu3 %v1455_v20  ;;  %v1376_v19 = vadd.f32 %v1289_v40, %v1072_v14  ;;  %v742_v40 = vld [vmem:[#allocation2 + $0xb7] sm:$0xff]  ;;  %v1456_v47 = vpack.c.bf16 %v1431_v58, %v1430_v57 }
 0x17e   : > { %v767_v14 = vpack.c.bf16 %v742_v40, %v741_v52  ;;  %v1432_v52 = vld [vmem:[#allocation2 + $0xd1] sm:$0xff] }
 0x180   : > { %v1291_v25 = vpop.f32.mrf.mxu2  ;;  %v1543_v31 = vpop.f32.mrf.mxu3 }
 0x181   : > { %v1630_v26 = vadd.f32 %v1543_v31, %v1376_v19  ;;  %v1685_v31 = vld [vmem:[#allocation2 + $0xca] sm:$0xff] }
 0x182   : > { %v1073_v50 = vpop.f32.mrf.mxu1  ;;  %v1797_v61 = vpop.f32.mrf.mxu0 }
 0x183   : > { %v1074_v33 = vadd.f32 %v1073_v50, %v4210_v3  ;;  %v4300_v34 = vadd.f32 %v1797_v61, %v1630_v26  ;;  %v3637_v3 = vld [vmem:[%s4559_s5 + $0x210] sm:$0xff] }
 0x184   : > { %2804 = vmatpush.bf16.msra.mxu0 %v3637_v3 }
 0x185   : > { %1333 = vmatmul.bf16.gmra.mxu2 %v1455_v20  ;;  %1836 = vmatmul.bf16.gmra.mxu0 %v1709_v51  ;;  %v1377_v12 = vadd.f32 %v1291_v25, %v1074_v33  ;;  %v1684_v25 = vld [vmem:[#allocation2 + $0xc2] sm:$0xff] }
 0x186   : > { %v743_v33 = vld [vmem:[#allocation2 + $0xbf] sm:$0xff] }
 0x188   : > { %v1294_v43 = vpop.f32.mrf.mxu2  ;;  %v1545_v53 = vpop.f32.mrf.mxu3 }
 0x189   : > { %v1631_v55 = vadd.f32 %v1545_v53, %v1377_v12  ;;  %v744_v12 = vld [vmem:[#allocation2 + $0xc7] sm:$0xff] }
 0x18a   : > { %v1076_v62 = vpop.f32.mrf.mxu1  ;;  %v1799_v1 = vpop.f32.mrf.mxu0 }
 0x18b   : > { %v1077_v9 = vadd.f32 %v1076_v62, %v4224_v17  ;;  %v4309_v11 = vadd.f32 %v1799_v1, %v1631_v55  ;;  %v1710_v17 = vpack.c.bf16 %v1685_v31, %v1684_v25 }
 0x18d   : > { %1115 = vmatmul.bf16.gmra.mxu1 %v767_v14  ;;  %1587 = vmatmul.bf16.gmra.mxu3 %v1456_v47  ;;  %v1378_v20 = vadd.f32 %v1294_v43, %v1077_v9  ;;  %v1433_v43 = vld [vmem:[#allocation2 + $0xd9] sm:$0xff] }
 0x18e   : > { %v1457_v3 = vpack.c.bf16 %v1433_v43, %v1432_v52  ;;  %v1686_v14 = vld [vmem:[#allocation2 + $0xd2] sm:$0xff] }
 0x190   : > { %v1296_v19 = vpop.f32.mrf.mxu2  ;;  %v1548_v21 = vpop.f32.mrf.mxu3 }
 0x191   : > { %v1632_v42 = vadd.f32 %v1548_v21, %v1378_v20 }
 0x192   : > { %v1078_v26 = vpop.f32.mrf.mxu1  ;;  %v1802_v59 = vpop.f32.mrf.mxu0 }
 0x193   : > { %v1079_v50 = vadd.f32 %v1078_v26, %v4237_v28  ;;  %v4312_v61 = vadd.f32 %v1802_v59, %v1632_v42  ;;  %v768_v28 = vpack.c.bf16 %v744_v12, %v743_v33  ;;  %v3628_v59 = vld [vmem:[%s4559_s5 + $0x1c8] sm:$0xff]  ;;  %v746_v33 = vld [vmem:[#allocation2 + $0xd7] sm:$0xff] }
 0x194   : > { %2551 = vmatpush.bf16.msra.mxu3 %v3628_v59  ;;  %v747_v59 = vld [vmem:[#allocation2 + $0xdf] sm:$0xff] }
 0x195   : > { %1338 = vmatmul.bf16.gmra.mxu2 %v1456_v47  ;;  %1841 = vmatmul.bf16.gmra.mxu0 %v1710_v17  ;;  %v1379_v32 = vadd.f32 %v1296_v19, %v1079_v50  ;;  %v1687_v47 = vld [vmem:[#allocation2 + $0xda] sm:$0xff]  ;;  %v3612_v50 = vld [vmem:[%s4559_s5 + $0x148] sm:$0xff] }
 0x196   : > { %v1711_v42 = vpack.c.bf16 %v1687_v47, %v1686_v14  ;;  %2043 = vmatpush.bf16.msra.mxu1 %v3612_v50  ;;  %v1689_v14 = vld [vmem:[#allocation2 + $0xea] sm:$0xff] }
 0x197   : > { %v748_v50 = vld [vmem:[#allocation2 + $0xe7] sm:$0xff] }
 0x198   : > { %v1299_v51 = vpop.f32.mrf.mxu2  ;;  %v1550_v10 = vpop.f32.mrf.mxu3 }
 0x199   : > { %v1633_v53 = vadd.f32 %v1550_v10, %v1379_v32  ;;  %v1435_v10 = vld [vmem:[#allocation2 + $0xe9] sm:$0xff] }
 0x19a   : > { %v1081_v40 = vpop.f32.mrf.mxu1  ;;  %v1804_v57 = vpop.f32.mrf.mxu0 }
 0x19b   : > { %v1082_v58 = vadd.f32 %v1081_v40, %v4245_v39  ;;  %v4315_v55 = vadd.f32 %v1804_v57, %v1633_v53  ;;  %v3620_v39 = vld [vmem:[%s4559_s5 + $0x188] sm:$0xff] }
 0x19c   : > { %2297 = vmatpush.bf16.msra.mxu2 %v3620_v39 }
 0x19d   : > { %1120 = vmatmul.bf16.gmra.mxu1 %v768_v28  ;;  %1592 = vmatmul.bf16.gmra.mxu3 %v1457_v3  ;;  %v1380_v62 = vadd.f32 %v1299_v51, %v1082_v58  ;;  %v1434_v51 = vld [vmem:[#allocation2 + $0xe1] sm:$0xff] }
 0x19e   : > { %v1458_v58 = vpack.c.bf16 %v1435_v10, %v1434_v51  ;;  %v1437_v51 = vld [vmem:[#allocation2 + $0xf9] sm:$0xff] }
 0x1a0   : > { %v1301_v1 = vpop.f32.mrf.mxu2  ;;  %v1553_v9 = vpop.f32.mrf.mxu3 }
 0x1a1   : > { %v1634_v20 = vadd.f32 %v1553_v9, %v1380_v62  ;;  %v1688_v9 = vld [vmem:[#allocation2 + $0xe2] sm:$0xff] }
 0x1a2   : > { %v1083_v19 = vpop.f32.mrf.mxu1  ;;  %v1807_v21 = vpop.f32.mrf.mxu0 }
 0x1a3   : > { %v1084_v25 = vadd.f32 %v1083_v19, %v4254_v54  ;;  %v4318_v31 = vadd.f32 %v1807_v21, %v1634_v20  ;;  %v745_v54 = vld [vmem:[#allocation2 + $0xcf] sm:$0xff] }
 0x1a4   : > { %v769_v57 = vpack.c.bf16 %v746_v33, %v745_v54  ;;  %v1436_v54 = vld [vmem:[#allocation2 + $0xf1] sm:$0xff] }
 0x1a5   : > { %1343 = vmatmul.bf16.gmra.mxu2 %v1457_v3  ;;  %1846 = vmatmul.bf16.gmra.mxu0 %v1711_v42  ;;  %v1381_v26 = vadd.f32 %v1301_v1, %v1084_v25  ;;  %v3636_v3 = vld [vmem:[%s4559_s5 + $0x208] sm:$0xff]  ;;  %v1712_v25 = vpack.c.bf16 %v1689_v14, %v1688_v9 }
 0x1a6   : > { %2805 = vmatpush.bf16.msra.mxu0 %v3636_v3 }
 0x1a8   : > { %v1304_v17 = vpop.f32.mrf.mxu2  ;;  %v1555_v32 = vpop.f32.mrf.mxu3 }
 0x1a9   : > { %v1635_v12 = vadd.f32 %v1555_v32, %v1381_v26 }
 0x1aa   : > { %v1086_v52 = vpop.f32.mrf.mxu1  ;;  %v1809_v43 = vpop.f32.mrf.mxu0 }
 0x1ab   : > { %v1087_v53 = vadd.f32 %v1086_v52, %v4271_v6  ;;  %v4330_v40 = vadd.f32 %v1809_v43, %v1635_v12  ;;  %v1459_v52 = vpack.c.bf16 %v1437_v51, %v1436_v54  ;;  %v750_v54 = vld [vmem:[#allocation2 + $0xf7] sm:$0xff] }
 0x1ad   : > { %1125 = vmatmul.bf16.gmra.mxu1 %v769_v57  ;;  %1597 = vmatmul.bf16.gmra.mxu3 %v1458_v58  ;;  %v1382_v28 = vadd.f32 %v1304_v17, %v1087_v53 }
 0x1b0   : > { %v1306_v62 = vpop.f32.mrf.mxu2  ;;  %v1558_v1 = vpop.f32.mrf.mxu3 }
 0x1b1   : > { %v1636_v47 = vadd.f32 %v1558_v1, %v1382_v28  ;;  %v1691_v1 = vld [vmem:[#allocation2 + $0xfa] sm:$0xff] }
 0x1b2   : > { %v1088_v20 = vpop.f32.mrf.mxu1  ;;  %v1812_v19 = vpop.f32.mrf.mxu0 }
 0x1b3   : > { %v1089_v6 = vadd.f32 %v1088_v20, %v4283_v24  ;;  %v4336_v21 = vadd.f32 %v1812_v19, %v1636_v47  ;;  %v770_v24 = vpack.c.bf16 %v748_v50, %v747_v59  ;;  %v3619_v20 = vld [vmem:[%s4559_s5 + $0x180] sm:$0xff] }
 0x1b4   : > { %2298 = vmatpush.bf16.msra.mxu2 %v3619_v20 }
 0x1b5   : > { %1348 = vmatmul.bf16.gmra.mxu2 %v1458_v58  ;;  %1851 = vmatmul.bf16.gmra.mxu0 %v1712_v25  ;;  %v1383_v42 = vadd.f32 %v1306_v62, %v1089_v6  ;;  %v1690_v58 = vld [vmem:[#allocation2 + $0xf2] sm:$0xff] }
 0x1b6   : > { %v1713_v47 = vpack.c.bf16 %v1691_v1, %v1690_v58  ;;  %v749_v25 = vld [vmem:[#allocation2 + $0xef] sm:$0xff] }
 0x1b8   : > { %v1309_v39 = vpop.f32.mrf.mxu2  ;;  %v1560_v26 = vpop.f32.mrf.mxu3 }
 0x1b9   : > { %v1637_v17 = vadd.f32 %v1560_v26, %v1383_v42  ;;  %v1438_v42 = vld [vmem:[#allocation2 + $0x101] sm:$0xff] }
 0x1ba   : > { %v1091_v32 = vpop.f32.mrf.mxu1  ;;  %v1814_v33 = vpop.f32.mrf.mxu0 }
 0x1bb   : > { %v1092_v10 = vadd.f32 %v1091_v32, %v4172_v35  ;;  %v4339_v12 = vadd.f32 %v1814_v33, %v1637_v17  ;;  %v771_v33 = vpack.c.bf16 %v750_v54, %v749_v25  ;;  %v1441_v25 = vld [vmem:[#allocation2 + $0x119] sm:$0xff] }
 0x1bd   : > { %1130 = vmatmul.bf16.gmra.mxu1 %v770_v24  ;;  %1602 = vmatmul.bf16.gmra.mxu3 %v1459_v52  ;;  %v1384_v43 = vadd.f32 %v1309_v39, %v1092_v10  ;;  %v1439_v39 = vld [vmem:[#allocation2 + $0x109] sm:$0xff]  ;;  %v3611_v10 = vld [vmem:[%s4559_s5 + $0x140] sm:$0xff] }
 0x1be   : > { %v1460_v51 = vpack.c.bf16 %v1439_v39, %v1438_v42  ;;  %2044 = vmatpush.bf16.msra.mxu1 %v3611_v10  ;;  %v1695_v10 = vld [vmem:[#allocation2 + $0x11a] sm:$0xff] }
 0x1c0   : > { %v1311_v53 = vpop.f32.mrf.mxu2  ;;  %v1563_v57 = vpop.f32.mrf.mxu3 }
 0x1c1   : > { %v1638_v28 = vadd.f32 %v1563_v57, %v1384_v43  ;;  %v1693_v57 = vld [vmem:[#allocation2 + $0x10a] sm:$0xff] }
 0x1c2   : > { %v1093_v3 = vpop.f32.mrf.mxu1  ;;  %v1817_v62 = vpop.f32.mrf.mxu0 }
 0x1c3   : > { %v1094_v9 = vadd.f32 %v1093_v3, %v4190_v37  ;;  %v4342_v14 = vadd.f32 %v1817_v62, %v1638_v28  ;;  %v3627_v37 = vld [vmem:[%s4559_s5 + $0x1c0] sm:$0xff] }
 0x1c4   : > { %2552 = vmatpush.bf16.msra.mxu3 %v3627_v37  ;;  %v1440_v37 = vld [vmem:[#allocation2 + $0x111] sm:$0xff] }
 0x1c5   : > { %1353 = vmatmul.bf16.gmra.mxu2 %v1459_v52  ;;  %1856 = vmatmul.bf16.gmra.mxu0 %v1713_v47  ;;  %v1385_v35 = vadd.f32 %v1311_v53, %v1094_v9  ;;  %v1692_v53 = vld [vmem:[#allocation2 + $0x102] sm:$0xff]  ;;  %v1461_v54 = vpack.c.bf16 %v1441_v25, %v1440_v37 }
 0x1c6   : > { %v1714_v9 = vpack.c.bf16 %v1693_v57, %v1692_v53  ;;  %v1694_v53 = vld [vmem:[#allocation2 + $0x112] sm:$0xff] }
 0x1c8   : > { %v1314_v19 = vpop.f32.mrf.mxu2  ;;  %v1565_v6 = vpop.f32.mrf.mxu3 }
 0x1c9   : > { %v1639_v26 = vadd.f32 %v1565_v6, %v1385_v35  ;;  %v752_v6 = vld [vmem:[#allocation2 + $0x107] sm:$0xff] }
 0x1ca   : > { %v1096_v59 = vpop.f32.mrf.mxu1  ;;  %v1819_v50 = vpop.f32.mrf.mxu0 }
 0x1cb   : > { %v1097_v17 = vadd.f32 %v1096_v59, %v4197_v48  ;;  %v4351_v32 = vadd.f32 %v1819_v50, %v1639_v26  ;;  %v3635_v48 = vld [vmem:[%s4559_s5 + $0x200] sm:$0xff] }
 0x1cc   : > { %2806 = vmatpush.bf16.msra.mxu0 %v3635_v48  ;;  %v1715_v48 = vpack.c.bf16 %v1695_v10, %v1694_v53 }
 0x1cd   : > { %1135 = vmatmul.bf16.gmra.mxu1 %v771_v33  ;;  %1607 = vmatmul.bf16.gmra.mxu3 %v1460_v51  ;;  %v1386_v24 = vadd.f32 %v1314_v19, %v1097_v17  ;;  %v751_v19 = vld [vmem:[#allocation2 + $0xff] sm:$0xff] }
 0x1d0   : > { %v1316_v52 = vpop.f32.mrf.mxu2  ;;  %v1568_v43 = vpop.f32.mrf.mxu3 }
 0x1d1   : > { %v1640_v58 = vadd.f32 %v1568_v43, %v1386_v24 }
 0x1d2   : > { %v1098_v28 = vpop.f32.mrf.mxu1  ;;  %v1822_v3 = vpop.f32.mrf.mxu0 }
 0x1d3   : > { %v1099_v62 = vadd.f32 %v1098_v28, %v4205_v63  ;;  %v4360_v1 = vadd.f32 %v1822_v3, %v1640_v58  ;;  %v772_v63 = vpack.c.bf16 %v752_v6, %v751_v19  ;;  %v753_v6 = vld [vmem:[#allocation2 + $0x10f] sm:$0xff] }
 0x1d5   : > { %1358 = vmatmul.bf16.gmra.mxu2 %v1460_v51  ;;  %1861 = vmatmul.bf16.gmra.mxu0 %v1714_v9  ;;  %v1387_v47 = vadd.f32 %v1316_v52, %v1099_v62  ;;  %v754_v62 = vld [vmem:[#allocation2 + $0x117] sm:$0xff]  ;;  %v1442_v9 = vld [vmem:[#allocation2 + $0x121] sm:$0xff] }
 0x1d8   : > { %v1319_v35 = vpop.f32.mrf.mxu2  ;;  %v1570_v20 = vpop.f32.mrf.mxu3 }
 0x1d9   : > { %v1641_v42 = vadd.f32 %v1570_v20, %v1387_v47  ;;  %v1443_v47 = vld [vmem:[#allocation2 + $0x129] sm:$0xff] }
 0x1da   : > { %v1101_v39 = vpop.f32.mrf.mxu1  ;;  %v1824_v26 = vpop.f32.mrf.mxu0 }
 0x1db   : > { %v1102_v59 = vadd.f32 %v1101_v39, %v4217_v8  ;;  %v4363_v50 = vadd.f32 %v1824_v26, %v1641_v42  ;;  %v1462_v39 = vpack.c.bf16 %v1443_v47, %v1442_v9 }
 0x1dd   : > { %1140 = vmatmul.bf16.gmra.mxu1 %v772_v63  ;;  %1612 = vmatmul.bf16.gmra.mxu3 %v1461_v54  ;;  %v1388_v17 = vadd.f32 %v1319_v35, %v1102_v59  ;;  %v1696_v63 = vld [vmem:[#allocation2 + $0x122] sm:$0xff] }
 0x1e0   : > { %v1321_v33 = vpop.f32.mrf.mxu2  ;;  %v1573_v51 = vpop.f32.mrf.mxu3 }
 0x1e1   : > { %v1642_v24 = vadd.f32 %v1573_v51, %v1388_v17 }
 0x1e2   : > { %v1103_v52 = vpop.f32.mrf.mxu1  ;;  %v1827_v43 = vpop.f32.mrf.mxu0 }
 0x1e3   : > { %v1104_v57 = vadd.f32 %v1103_v52, %v4231_v22  ;;  %v4366_v58 = vadd.f32 %v1827_v43, %v1642_v24  ;;  %v773_v22 = vpack.c.bf16 %v754_v62, %v753_v6  ;;  %v755_v43 = vld [vmem:[#allocation2 + $0x11f] sm:$0xff] }
 0x1e5   : > { %1363 = vmatmul.bf16.gmra.mxu2 %v1461_v54  ;;  %1866 = vmatmul.bf16.gmra.mxu0 %v1715_v48  ;;  %v1389_v8 = vadd.f32 %v1321_v33, %v1104_v57  ;;  %v1697_v54 = vld [vmem:[#allocation2 + $0x12a] sm:$0xff] }
 0x1e6   : > { %v1716_v52 = vpack.c.bf16 %v1697_v54, %v1696_v63  ;;  %v756_v48 = vld [vmem:[#allocation2 + $0x127] sm:$0xff]  ;;  %v1699_v63 = vld [vmem:[#allocation2 + $0x13a] sm:$0xff] }
 0x1e7   : > { %v2172_v54 = vld [vmem:[#allocation2 + $0x33] sm:$0xff] }
 0x1e8   : > { %v1324_v28 = vpop.f32.mrf.mxu2  ;;  %v1575_v3 = vpop.f32.mrf.mxu3 }
 0x1e9   : > { %v1643_v35 = vadd.f32 %v1575_v3, %v1389_v8  ;;  %v1444_v8 = vld [vmem:[#allocation2 + $0x131] sm:$0xff] }
 0x1ea   : > { %v1106_v20 = vpop.f32.mrf.mxu1  ;;  %v1829_v19 = vpop.f32.mrf.mxu0 }
 0x1eb   : > { %v1107_v25 = vadd.f32 %v1106_v20, %v4239_v30  ;;  %v4369_v42 = vadd.f32 %v1829_v19, %v1643_v35 }
 0x1ed   : > { %1145 = vmatmul.bf16.gmra.mxu1 %v773_v22  ;;  %1617 = vmatmul.bf16.gmra.mxu3 %v1462_v39  ;;  %v1390_v26 = vadd.f32 %v1324_v28, %v1107_v25  ;;  %v1445_v28 = vld [vmem:[#allocation2 + $0x139] sm:$0xff] }
 0x1ee   : > { %v1463_v20 = vpack.c.bf16 %v1445_v28, %v1444_v8  ;;  %v1698_v22 = vld [vmem:[#allocation2 + $0x132] sm:$0xff]  ;;  %v1918_v28 = vld [vmem:[#allocation2 + $0x23] sm:$0xff] }
 0x1f0   : > { %v1326_v37 = vpop.f32.mrf.mxu2  ;;  %v1578_v59 = vpop.f32.mrf.mxu3 }
 0x1f1   : > { %v1644_v17 = vadd.f32 %v1578_v59, %v1390_v26 }
 0x1f2   : > { %v1108_v33 = vpop.f32.mrf.mxu1  ;;  %v1832_v51 = vpop.f32.mrf.mxu0 }
 0x1f3   : > { %v1109_v10 = vadd.f32 %v1108_v33, %v4247_v41  ;;  %v4372_v24 = vadd.f32 %v1832_v51, %v1644_v17  ;;  %v774_v41 = vpack.c.bf16 %v756_v48, %v755_v43  ;;  %v1919_v43 = vld [vmem:[#allocation2 + $0x2b] sm:$0xff] }
 0x1f5   : > { %1368 = vmatmul.bf16.gmra.mxu2 %v1462_v39  ;;  %1871 = vmatmul.bf16.gmra.mxu0 %v1716_v52  ;;  %v1391_v30 = vadd.f32 %v1326_v37, %v1109_v10  ;;  %v2173_v39 = vld [vmem:[#allocation2 + $0x3b] sm:$0xff] }
 0x1f6   : > { %v2208_v51 = vpack.c.bf16 %v2173_v39, %v2172_v54 }
 0x1f8   : > { %v1329_v53 = vpop.f32.mrf.mxu2  ;;  %v1580_v57 = vpop.f32.mrf.mxu3 }
 0x1f9   : > { %v1645_v3 = vadd.f32 %v1580_v57, %v1391_v30 }
 0x1fa   : > { %v1111_v62 = vpop.f32.mrf.mxu1  ;;  %v1834_v9 = vpop.f32.mrf.mxu0 }
 0x1fb   : > { %v1112_v47 = vadd.f32 %v1111_v62, %v4256_v56  ;;  %v4375_v35 = vadd.f32 %v1834_v9, %v1645_v3  ;;  %v1717_v56 = vpack.c.bf16 %v1699_v63, %v1698_v22  ;;  %v2426_v3 = vld [vmem:[#allocation2 + $0x34] sm:$0xff] }
 0x1fd   : > { %1150 = vmatmul.bf16.gmra.mxu1 %v774_v41  ;;  %1622 = vmatmul.bf16.gmra.mxu3 %v1463_v20  ;;  %v1392_v19 = vadd.f32 %v1329_v53, %v1112_v47  ;;  %v2427_v53 = vld [vmem:[#allocation2 + $0x3c] sm:$0xff] }
 0x1fe   : > { %v2462_v47 = vpack.c.bf16 %v2427_v53, %v2426_v3 }
 0x200   : > { %v1331_v6 = vpop.f32.mrf.mxu2  ;;  %v1583_v25 = vpop.f32.mrf.mxu3 }
 0x201   : > { %v1646_v26 = vadd.f32 %v1583_v25, %v1392_v19  ;;  %v2681_v25 = vld [vmem:[#allocation2 + $0x3d] sm:$0xff] }
 0x202   : > { %v1113_v37 = vpop.f32.mrf.mxu1  ;;  %v1837_v59 = vpop.f32.mrf.mxu0 }
 0x203   : > { %v1114_v17 = vadd.f32 %v1113_v37, %v4273_v7  ;;  %v4378_v33 = vadd.f32 %v1837_v59, %v1646_v26  ;;  %v1954_v7 = vpack.c.bf16 %v1919_v43, %v1918_v28  ;;  %v2174_v37 = vld [vmem:[#allocation2 + $0x43] sm:$0xff]  ;;  %v2680_v59 = vld [vmem:[#allocation2 + $0x35] sm:$0xff] }
 0x205   : > { %1876 = vmatmul.bf16.gmra.mxu0 %v1717_v56  ;;  %2299 = vmatmul.bf16.vlgmr.msra.gmra.mxu2 %v2208_v51  ;;  %v1393_v10 = vadd.f32 %v1331_v6, %v1114_v17  ;;  %v2175_v6 = vld [vmem:[#allocation2 + $0x4b] sm:$0xff]  ;;  %v2716_v17 = vpack.c.bf16 %v2681_v25, %v2680_v59  ;;  %v2177_v25 = vld [vmem:[#allocation2 + $0x5b] sm:$0xff] }
 0x208   : > { %v1334_v52 = vpop.f32.mrf.mxu2  ;;  %v1585_v30 = vpop.f32.mrf.mxu3 }
 0x209   : > { %v1647_v57 = vadd.f32 %v1585_v30, %v1393_v10  ;;  %v2429_v30 = vld [vmem:[#allocation2 + $0x4c] sm:$0xff] }
 0x20a   : > { %v1116_v48 = vpop.f32.mrf.mxu1  ;;  %v1839_v8 = vpop.f32.mrf.mxu0 }
 0x20b   : > { %v1117_v62 = vadd.f32 %v1116_v48, %v4183_v36  ;;  %v4381_v9 = vadd.f32 %v1839_v8, %v1647_v57  ;;  %v2209_v36 = vpack.c.bf16 %v2175_v6, %v2174_v37  ;;  %v2428_v48 = vld [vmem:[#allocation2 + $0x44] sm:$0xff] }
 0x20c   : > { %v2463_v3 = vpack.c.bf16 %v2429_v30, %v2428_v48  ;;  %v2431_v30 = vld [vmem:[#allocation2 + $0x5c] sm:$0xff] }
 0x20d   : > { %2045 = vmatmul.bf16.vlgmr.msra.gmra.mxu1 %v1954_v7  ;;  %2553 = vmatmul.bf16.vlgmr.msra.gmra.mxu3 %v2462_v47  ;;  %v1394_v41 = vadd.f32 %v1334_v52, %v1117_v62  ;;  %v2176_v47 = vld [vmem:[#allocation2 + $0x53] sm:$0xff] }
 0x210   : > { %v1336_v20 = vpop.f32.mrf.mxu2  ;;  %v1588_v19 = vpop.f32.mrf.mxu3 }
 0x211   : > { %v1648_v22 = vadd.f32 %v1588_v19, %v1394_v41  ;;  %v2683_v41 = vld [vmem:[#allocation2 + $0x4d] sm:$0xff] }
 0x212   : > { %v1118_v39 = vpop.f32.mrf.mxu1  ;;  %v1842_v26 = vpop.f32.mrf.mxu0 }
 0x213   : > { %v1119_v63 = vadd.f32 %v1118_v39, %v4192_v44  ;;  %v4384_v54 = vadd.f32 %v1842_v26, %v1648_v22  ;;  %v2682_v22 = vld [vmem:[#allocation2 + $0x45] sm:$0xff] }
 0x214   : > { %v2717_v37 = vpack.c.bf16 %v2683_v41, %v2682_v22 }
 0x215   : > { %2304 = vmatmul.bf16.gmra.mxu2 %v2209_v36  ;;  %2807 = vmatmul.bf16.vlgmr.msra.gmra.mxu0 %v2716_v17  ;;  %v1395_v56 = vadd.f32 %v1336_v20, %v1119_v63  ;;  %v2430_v17 = vld [vmem:[#allocation2 + $0x54] sm:$0xff] }
 0x218   : > { %v1339_v10 = vpop.f32.mrf.mxu2  ;;  %v1590_v52 = vpop.f32.mrf.mxu3 }
 0x219   : > { %v1649_v43 = vadd.f32 %v1590_v52, %v1395_v56 }
 0x21a   : > { %v1121_v53 = vpop.f32.mrf.mxu1  ;;  %v1844_v57 = vpop.f32.mrf.mxu0 }
 0x21b   : > { %v1122_v8 = vadd.f32 %v1121_v53, %v4199_v49  ;;  %v4387_v28 = vadd.f32 %v1844_v57, %v1649_v43  ;;  %v2210_v49 = vpack.c.bf16 %v2177_v25, %v2176_v47  ;;  %v2464_v57 = vpack.c.bf16 %v2431_v30, %v2430_v17  ;;  %v2686_v30 = vld [vmem:[#allocation2 + $0x65] sm:$0xff] }
 0x21d   : > { %2050 = vmatmul.bf16.gmra.mxu1 %v2208_v51  ;;  %2558 = vmatmul.bf16.gmra.mxu3 %v2463_v3  ;;  %v1396_v44 = vadd.f32 %v1339_v10, %v1122_v8  ;;  %v2178_v3 = vld [vmem:[#allocation2 + $0x63] sm:$0xff] }
 0x220   : > { %v1341_v62 = vpop.f32.mrf.mxu2  ;;  %v1593_v7 = vpop.f32.mrf.mxu3 }
 0x221   : > { %v1650_v20 = vadd.f32 %v1593_v7, %v1396_v44  ;;  %v2179_v44 = vld [vmem:[#allocation2 + $0x6b] sm:$0xff] }
 0x222   : > { %v1123_v19 = vpop.f32.mrf.mxu1  ;;  %v1847_v6 = vpop.f32.mrf.mxu0 }
 0x223   : > { %v1124_v39 = vadd.f32 %v1123_v19, %v4203_v60  ;;  %v4390_v26 = vadd.f32 %v1847_v6, %v1650_v20  ;;  %v2685_v20 = vld [vmem:[#allocation2 + $0x5d] sm:$0xff] }
 0x225   : > { %2309 = vmatmul.bf16.gmra.mxu2 %v2210_v49  ;;  %2812 = vmatmul.bf16.gmra.mxu0 %v2717_v37  ;;  %v1397_v51 = vadd.f32 %v1341_v62, %v1124_v39  ;;  %v2684_v62 = vld [vmem:[#allocation2 + $0x55] sm:$0xff]  ;;  %v2432_v37 = vld [vmem:[#allocation2 + $0x64] sm:$0xff] }
 0x226   : > { %v2718_v25 = vpack.c.bf16 %v2685_v20, %v2684_v62 }
 0x228   : > { %v1344_v59 = vpop.f32.mrf.mxu2  ;;  %v1595_v63 = vpop.f32.mrf.mxu3 }
 0x229   : > { %v1651_v56 = vadd.f32 %v1595_v63, %v1397_v51  ;;  %v2433_v51 = vld [vmem:[#allocation2 + $0x6c] sm:$0xff] }
 0x22a   : > { %v1126_v10 = vpop.f32.mrf.mxu1  ;;  %v1849_v52 = vpop.f32.mrf.mxu0 }
 0x22b   : > { %v1127_v43 = vadd.f32 %v1126_v10, %v4212_v4  ;;  %v4393_v53 = vadd.f32 %v1849_v52, %v1651_v56  ;;  %v2211_v4 = vpack.c.bf16 %v2179_v44, %v2178_v3  ;;  %v2465_v52 = vpack.c.bf16 %v2433_v51, %v2432_v37 }
 0x22d   : > { %2055 = vmatmul.bf16.gmra.mxu1 %v2209_v36  ;;  %2563 = vmatmul.bf16.gmra.mxu3 %v2464_v57  ;;  %v1398_v60 = vadd.f32 %v1344_v59, %v1127_v43 }
 0x230   : > { %v1346_v48 = vpop.f32.mrf.mxu2  ;;  %v1598_v8 = vpop.f32.mrf.mxu3 }
 0x231   : > { %v1652_v7 = vadd.f32 %v1598_v8, %v1398_v60  ;;  %v2180_v60 = vld [vmem:[#allocation2 + $0x73] sm:$0xff] }
 0x232   : > { %v1128_v47 = vpop.f32.mrf.mxu1  ;;  %v1852_v41 = vpop.f32.mrf.mxu0  ;;  %v2687_v8 = vld [vmem:[#allocation2 + $0x6d] sm:$0xff] }
 0x233   : > { %v1129_v19 = vadd.f32 %v1128_v47, %v4226_v18  ;;  %v4396_v6 = vadd.f32 %v1852_v41, %v1652_v7  ;;  %v2719_v41 = vpack.c.bf16 %v2687_v8, %v2686_v30  ;;  %v2689_v30 = vld [vmem:[#allocation2 + $0x7d] sm:$0xff] }
 0x235   : > { %2314 = vmatmul.bf16.gmra.mxu2 %v2211_v4  ;;  %2817 = vmatmul.bf16.gmra.mxu0 %v2718_v25  ;;  %v1399_v36 = vadd.f32 %v1346_v48, %v1129_v19  ;;  %v2181_v48 = vld [vmem:[#allocation2 + $0x7b] sm:$0xff] }
 0x236   : > { %v2434_v25 = vld [vmem:[#allocation2 + $0x74] sm:$0xff] }
 0x238   : > { %v1349_v22 = vpop.f32.mrf.mxu2  ;;  %v1600_v39 = vpop.f32.mrf.mxu3 }
 0x239   : > { %v1653_v59 = vadd.f32 %v1600_v39, %v1399_v36  ;;  %v2435_v36 = vld [vmem:[#allocation2 + $0x7c] sm:$0xff] }
 0x23a   : > { %v1131_v63 = vpop.f32.mrf.mxu1  ;;  %v1854_v17 = vpop.f32.mrf.mxu0 }
 0x23b   : > { %v1132_v56 = vadd.f32 %v1131_v63, %v4235_v29  ;;  %v4399_v10 = vadd.f32 %v1854_v17, %v1653_v59  ;;  %v2212_v29 = vpack.c.bf16 %v2181_v48, %v2180_v60  ;;  %v2466_v63 = vpack.c.bf16 %v2435_v36, %v2434_v25  ;;  %v2182_v48 = vld [vmem:[#allocation2 + $0x83] sm:$0xff] }
 0x23c   : > { %v2436_v25 = vld [vmem:[#allocation2 + $0x84] sm:$0xff] }
 0x23d   : > { %2060 = vmatmul.bf16.gmra.mxu1 %v2210_v49  ;;  %2568 = vmatmul.bf16.gmra.mxu3 %v2465_v52  ;;  %v1400_v18 = vadd.f32 %v1349_v22, %v1132_v56  ;;  %v2183_v52 = vld [vmem:[#allocation2 + $0x8b] sm:$0xff] }
 0x240   : > { %v1351_v43 = vpop.f32.mrf.mxu2  ;;  %v1603_v57 = vpop.f32.mrf.mxu3 }
 0x241   : > { %v1654_v3 = vadd.f32 %v1603_v57, %v1400_v18  ;;  %v2688_v18 = vld [vmem:[#allocation2 + $0x75] sm:$0xff] }
 0x242   : > { %v1133_v44 = vpop.f32.mrf.mxu1  ;;  %v1857_v62 = vpop.f32.mrf.mxu0 }
 0x243   : > { %v1134_v7 = vadd.f32 %v1133_v44, %v4241_v0  ;;  %v4402_v47 = vadd.f32 %v1857_v62, %v1654_v3  ;;  %v2720_v44 = vpack.c.bf16 %v2689_v30, %v2688_v18  ;;  %v2185_v18 = vld [vmem:[#allocation2 + $0x9b] sm:$0xff]  ;;  %v2690_v30 = vld [vmem:[#allocation2 + $0x85] sm:$0xff] }
 0x245   : > { %2319 = vmatmul.bf16.gmra.mxu2 %v2212_v29  ;;  %2822 = vmatmul.bf16.gmra.mxu0 %v2719_v41  ;;  %v1401_v49 = vadd.f32 %v1351_v43, %v1134_v7  ;;  %v2437_v41 = vld [vmem:[#allocation2 + $0x8c] sm:$0xff] }
 0x248   : > { %v1354_v20 = vpop.f32.mrf.mxu2  ;;  %v1605_v19 = vpop.f32.mrf.mxu3 }
 0x249   : > { %v1655_v22 = vadd.f32 %v1605_v19, %v1401_v49 }
 0x24a   : > { %v1136_v39 = vpop.f32.mrf.mxu1  ;;  %v1859_v37 = vpop.f32.mrf.mxu0 }
 0x24b   : > { %v1137_v51 = vadd.f32 %v1136_v39, %v4250_v23  ;;  %v4405_v59 = vadd.f32 %v1859_v37, %v1655_v22  ;;  %v2213_v23 = vpack.c.bf16 %v2183_v52, %v2182_v48  ;;  %v2467_v39 = vpack.c.bf16 %v2437_v41, %v2436_v25  ;;  %v2439_v41 = vld [vmem:[#allocation2 + $0x9c] sm:$0xff] }
 0x24d   : > { %2065 = vmatmul.bf16.gmra.mxu1 %v2211_v4  ;;  %2573 = vmatmul.bf16.gmra.mxu3 %v2466_v63  ;;  %v1402_v0 = vadd.f32 %v1354_v20, %v1137_v51  ;;  %v2184_v63 = vld [vmem:[#allocation2 + $0x93] sm:$0xff] }
 0x250   : > { %v1356_v17 = vpop.f32.mrf.mxu2  ;;  %v1608_v56 = vpop.f32.mrf.mxu3 }
 0x251   : > { %v1656_v43 = vadd.f32 %v1608_v56, %v1402_v0  ;;  %v2691_v0 = vld [vmem:[#allocation2 + $0x8d] sm:$0xff] }
 0x252   : > { %v1138_v57 = vpop.f32.mrf.mxu1  ;;  %v1862_v60 = vpop.f32.mrf.mxu0 }
 0x253   : > { %v1139_v8 = vadd.f32 %v1138_v57, %v4267_v2  ;;  %v4408_v3 = vadd.f32 %v1862_v60, %v1656_v43  ;;  %v2721_v60 = vpack.c.bf16 %v2691_v0, %v2690_v30  ;;  %v2187_v0 = vld [vmem:[#allocation2 + $0xab] sm:$0xff] }
 0x255   : > { %2324 = vmatmul.bf16.gmra.mxu2 %v2213_v23  ;;  %2827 = vmatmul.bf16.gmra.mxu0 %v2720_v44  ;;  %v1403_v4 = vadd.f32 %v1356_v17, %v1139_v8  ;;  %v2438_v44 = vld [vmem:[#allocation2 + $0x94] sm:$0xff] }
 0x258   : > { %v1359_v62 = vpop.f32.mrf.mxu2  ;;  %v1610_v7 = vpop.f32.mrf.mxu3 }
 0x259   : > { %v1657_v49 = vadd.f32 %v1610_v7, %v1403_v4 }
 0x25a   : > { %v1141_v20 = vpop.f32.mrf.mxu1  ;;  %v1864_v19 = vpop.f32.mrf.mxu0 }
 0x25b   : > { %v1142_v36 = vadd.f32 %v1141_v20, %v4222_v16  ;;  %v4411_v22 = vadd.f32 %v1864_v19, %v1657_v49  ;;  %v2214_v16 = vpack.c.bf16 %v2185_v18, %v2184_v63  ;;  %v2468_v19 = vpack.c.bf16 %v2439_v41, %v2438_v44  ;;  %v2441_v44 = vld [vmem:[#allocation2 + $0xac] sm:$0xff] }
 0x25d   : > { %2070 = vmatmul.bf16.gmra.mxu1 %v2212_v29  ;;  %2578 = vmatmul.bf16.gmra.mxu3 %v2467_v39  ;;  %v1404_v2 = vadd.f32 %v1359_v62, %v1142_v36  ;;  %v2186_v39 = vld [vmem:[#allocation2 + $0xa3] sm:$0xff] }
 0x260   : > { %v1361_v37 = vpop.f32.mrf.mxu2  ;;  %v1613_v51 = vpop.f32.mrf.mxu3 }
 0x261   : > { %v1658_v17 = vadd.f32 %v1613_v51, %v1404_v2  ;;  %v2692_v2 = vld [vmem:[#allocation2 + $0x95] sm:$0xff] }
 0x262   : > { %v1143_v56 = vpop.f32.mrf.mxu1  ;;  %v1867_v52 = vpop.f32.mrf.mxu0 }
 0x263   : > { %v1144_v43 = vadd.f32 %v1143_v56, %v4233_v27  ;;  %v4414_v57 = vadd.f32 %v1867_v52, %v1658_v17  ;;  %v2693_v17 = vld [vmem:[#allocation2 + $0x9d] sm:$0xff] }
 0x264   : > { %v2722_v18 = vpack.c.bf16 %v2693_v17, %v2692_v2  ;;  %v2188_v2 = vld [vmem:[#allocation2 + $0xb3] sm:$0xff] }
 0x265   : > { %2329 = vmatmul.bf16.gmra.mxu2 %v2214_v16  ;;  %2832 = vmatmul.bf16.gmra.mxu0 %v2721_v60  ;;  %v1405_v29 = vadd.f32 %v1361_v37, %v1144_v43  ;;  %v2440_v60 = vld [vmem:[#allocation2 + $0xa4] sm:$0xff] }
 0x268   : > { %v1364_v48 = vpop.f32.mrf.mxu2  ;;  %v1615_v8 = vpop.f32.mrf.mxu3 }
 0x269   : > { %v1659_v4 = vadd.f32 %v1615_v8, %v1405_v29 }
 0x26a   : > { %v1146_v62 = vpop.f32.mrf.mxu1  ;;  %v1869_v7 = vpop.f32.mrf.mxu0 }
 0x26b   : > { %v1147_v49 = vadd.f32 %v1146_v62, %v4243_v38  ;;  %v4417_v20 = vadd.f32 %v1869_v7, %v1659_v4  ;;  %v2215_v38 = vpack.c.bf16 %v2187_v0, %v2186_v39  ;;  %v2469_v7 = vpack.c.bf16 %v2441_v44, %v2440_v60  ;;  %v2442_v60 = vld [vmem:[#allocation2 + $0xb4] sm:$0xff] }
 0x26d   : > { %2075 = vmatmul.bf16.gmra.mxu1 %v2213_v23  ;;  %2583 = vmatmul.bf16.gmra.mxu3 %v2468_v19  ;;  %v1406_v27 = vadd.f32 %v1364_v48, %v1147_v49  ;;  %v2189_v19 = vld [vmem:[#allocation2 + $0xbb] sm:$0xff] }
 0x270   : > { %v1366_v25 = vpop.f32.mrf.mxu2  ;;  %v1618_v36 = vpop.f32.mrf.mxu3 }
 0x271   : > { %v1660_v37 = vadd.f32 %v1618_v36, %v1406_v27  ;;  %v2694_v27 = vld [vmem:[#allocation2 + $0xa5] sm:$0xff] }
 0x272   : > { %v1148_v51 = vpop.f32.mrf.mxu1  ;;  %v1872_v63 = vpop.f32.mrf.mxu0 }
 0x273   : > { %v1149_v56 = vadd.f32 %v1148_v51, %v4252_v45  ;;  %v4420_v52 = vadd.f32 %v1872_v63, %v1660_v37  ;;  %v2695_v37 = vld [vmem:[#allocation2 + $0xad] sm:$0xff] }
 0x274   : > { %v2723_v0 = vpack.c.bf16 %v2695_v37, %v2694_v27  ;;  %v2190_v27 = vld [vmem:[#allocation2 + $0xc3] sm:$0xff] }
 0x275   : > { %2334 = vmatmul.bf16.gmra.mxu2 %v2215_v38  ;;  %2837 = vmatmul.bf16.gmra.mxu0 %v2722_v18  ;;  %v1407_v23 = vadd.f32 %v1366_v25, %v1149_v56  ;;  %v2443_v18 = vld [vmem:[#allocation2 + $0xbc] sm:$0xff] }
 0x278   : > { %v1369_v30 = vpop.f32.mrf.mxu2  ;;  %v1620_v43 = vpop.f32.mrf.mxu3 }
 0x279   : > { %v1661_v29 = vadd.f32 %v1620_v43, %v1407_v23 }
 0x27a   : > { %v1151_v48 = vpop.f32.mrf.mxu1  ;;  %v1874_v8 = vpop.f32.mrf.mxu0 }
 0x27b   : > { %v1152_v4 = vadd.f32 %v1151_v48, %v4269_v5  ;;  %v4423_v62 = vadd.f32 %v1874_v8, %v1661_v29  ;;  %v2216_v5 = vpack.c.bf16 %v2189_v19, %v2188_v2 }
 0x27d   : > { %2080 = vmatmul.bf16.gmra.mxu1 %v2214_v16  ;;  %2588 = vmatmul.bf16.gmra.mxu3 %v2469_v7  ;;  %v1408_v45 = vadd.f32 %v1369_v30, %v1152_v4  ;;  %v2191_v7 = vld [vmem:[#allocation2 + $0xcb] sm:$0xff] }
 0x280   : > { %v1371_v41 = vpop.f32.mrf.mxu2  ;;  %v1623_v49 = vpop.f32.mrf.mxu3 }
 0x281   : > { %v1662_v25 = vadd.f32 %v1623_v49, %v1408_v45  ;;  %v2697_v45 = vld [vmem:[#allocation2 + $0xbd] sm:$0xff] }
 0x282   : > { %v1153_v36 = vpop.f32.mrf.mxu1  ;;  %v1877_v39 = vpop.f32.mrf.mxu0 }
 0x283   : > { %v1154_v51 = vadd.f32 %v1153_v36, %v4281_v13  ;;  %v4426_v63 = vadd.f32 %v1877_v39, %v1662_v25  ;;  %v2470_v13 = vpack.c.bf16 %v2443_v18, %v2442_v60  ;;  %v2696_v25 = vld [vmem:[#allocation2 + $0xb5] sm:$0xff]  ;;  %v2217_v39 = vpack.c.bf16 %v2191_v7, %v2190_v27 }
 0x284   : > { %v2724_v2 = vpack.c.bf16 %v2697_v45, %v2696_v25  ;;  %v2936_v25 = vld [vmem:[%s4435_s18 + $0x22] sm:$0xff] }
 0x285   : > { %2339 = vmatmul.bf16.gmra.mxu2 %v2216_v5  ;;  %2842 = vmatmul.bf16.gmra.mxu0 %v2723_v0  ;;  %v1409_v16 = vadd.f32 %v1371_v41, %v1154_v51 }
 0x288   : > { %v1625_v17 = vpop.f32.mrf.mxu3  ;;  %v2300_v56 = vpop.f32.mrf.mxu2 }
 0x289   : > { %v1663_v23 = vadd.f32 %v1625_v17, %v1409_v16 }
 0x28a   : > { %v1879_v30 = vpop.f32.mrf.mxu0  ;;  %v2046_v43 = vpop.f32.mrf.mxu1 }
 0x28b   : > { %v4428_v29 = vadd.f32 %v1879_v30, %v1663_v23  ;;  %v2136_v48 = vadd.f32 %v2046_v43, %v4287_v46  ;;  %v2934_v46 = vld [vmem:[%s4435_s18 + $0x12] sm:$0xff]  ;;  %v2935_v30 = vld [vmem:[%s4435_s18 + $0x1a] sm:$0xff]  ;;  %v2444_v43 = vld [vmem:[#allocation2 + $0xc4] sm:$0xff] }
 0x28d   : > { %2085 = vmatmul.bf16.gmra.mxu1 %v2215_v38  ;;  %2593 = vmatmul.bf16.gmra.mxu3 %v2470_v13  ;;  %v2390_v8 = vadd.f32 %v2300_v56, %v2136_v48  ;;  %v2445_v56 = vld [vmem:[#allocation2 + $0xcc] sm:$0xff] }
 0x28e   : > { %v2471_v13 = vpack.c.bf16 %v2445_v56, %v2444_v43  ;;  %v2937_v43 = vld [vmem:[%s4435_s18 + $0x2a] sm:$0xff] }
 0x290   : > { %v2302_v44 = vpop.f32.mrf.mxu2  ;;  %v2554_v4 = vpop.f32.mrf.mxu3 }
 0x291   : > { %v2644_v41 = vadd.f32 %v2554_v4, %v2390_v8 }
 0x292   : > { %v2048_v49 = vpop.f32.mrf.mxu1  ;;  %v2808_v19 = vpop.f32.mrf.mxu0 }
 0x293   : > { %v2137_v38 = vadd.f32 %v2048_v49, %v4291_v15  ;;  %v2898_v36 = vadd.f32 %v2808_v19, %v2644_v41  ;;  %v2193_v41 = vld [vmem:[#allocation2 + $0xdb] sm:$0xff]  ;;  %v2699_v49 = vld [vmem:[#allocation2 + $0xcd] sm:$0xff] }
 0x295   : > { %v2970_v37 = vadd.f32 %v2934_v46, %v2898_v36  ;;  %2344 = vmatmul.bf16.gmra.mxu2 %v2217_v39  ;;  %2847 = vmatmul.bf16.gmra.mxu0 %v2724_v2  ;;  %v2391_v0 = vadd.f32 %v2302_v44, %v2137_v38  ;;  %v2192_v38 = vld [vmem:[#allocation2 + $0xd3] sm:$0xff] }
 0x297   : > { %v3006_v51 = vmax.f32 %v2970_v37, 0.0 }
 0x298   : > { %v2305_v16 = vpop.f32.mrf.mxu2  ;;  %v2556_v17 = vpop.f32.mrf.mxu3 }
 0x299   : > { %3042 = vst [vmem:[%s4444_s20] sm:$0xff] %v3006_v51  ;;  %v2645_v15 = vadd.f32 %v2556_v17, %v2391_v0 }
 0x29a   : > { %v2051_v18 = vpop.f32.mrf.mxu1  ;;  %v2810_v23 = vpop.f32.mrf.mxu0 }
 0x29b   : > { %v2138_v60 = vadd.f32 %v2051_v18, %v4300_v34  ;;  %v2899_v48 = vadd.f32 %v2810_v23, %v2645_v15  ;;  %v2698_v34 = vld [vmem:[#allocation2 + $0xc5] sm:$0xff]  ;;  %v2447_v15 = vld [vmem:[#allocation2 + $0xdc] sm:$0xff] }
 0x29c   : > { %v2725_v37 = vpack.c.bf16 %v2699_v49, %v2698_v34  ;;  %v2195_v49 = vld [vmem:[#allocation2 + $0xeb] sm:$0xff] }
 0x29d   : > { %v2971_v8 = vadd.f32 %v2935_v30, %v2899_v48  ;;  %2090 = vmatmul.bf16.gmra.mxu1 %v2216_v5  ;;  %2598 = vmatmul.bf16.gmra.mxu3 %v2471_v13  ;;  %v2392_v44 = vadd.f32 %v2305_v16, %v2138_v60  ;;  %v2218_v5 = vpack.c.bf16 %v2193_v41, %v2192_v38  ;;  %v2446_v60 = vld [vmem:[#allocation2 + $0xd4] sm:$0xff]  ;;  %v2194_v41 = vld [vmem:[#allocation2 + $0xe3] sm:$0xff] }
 0x29e   : > { %v2472_v13 = vpack.c.bf16 %v2447_v15, %v2446_v60  ;;  %v2938_v38 = vld [vmem:[%s4435_s18 + $0x32] sm:$0xff] }
 0x29f   : > { %v3007_v4 = vmax.f32 %v2971_v8, 0.0  ;;  %v2449_v15 = vld [vmem:[#allocation2 + $0xec] sm:$0xff] }
 0x2a0   : > { %v2307_v7 = vpop.f32.mrf.mxu2  ;;  %v2559_v45 = vpop.f32.mrf.mxu3 }
 0x2a1   : > { %3043 = vst [vmem:[%s4444_s20 + $0x8] sm:$0xff] %v3007_v4  ;;  %v2646_v19 = vadd.f32 %v2559_v45, %v2392_v44 }
 0x2a2   : > { %v2053_v46 = vpop.f32.mrf.mxu1  ;;  %v2813_v27 = vpop.f32.mrf.mxu0 }
 0x2a3   : > { %v2139_v36 = vadd.f32 %v2053_v46, %v4309_v11  ;;  %v2900_v2 = vadd.f32 %v2813_v27, %v2646_v19  ;;  %v2701_v19 = vld [vmem:[#allocation2 + $0xdd] sm:$0xff] }
 0x2a5   : > { %v2972_v51 = vadd.f32 %v2936_v25, %v2900_v2  ;;  %2349 = vmatmul.bf16.gmra.mxu2 %v2218_v5  ;;  %2852 = vmatmul.bf16.gmra.mxu0 %v2725_v37  ;;  %v2393_v16 = vadd.f32 %v2307_v7, %v2139_v36 }
 0x2a7   : > { %v3008_v0 = vmax.f32 %v2972_v51, 0.0 }
 0x2a8   : > { %v2310_v17 = vpop.f32.mrf.mxu2  ;;  %v2561_v56 = vpop.f32.mrf.mxu3 }
 0x2a9   : > { %3044 = vst [vmem:[%s4444_s20 + $0x10] sm:$0xff] %v3008_v0  ;;  %v2647_v18 = vadd.f32 %v2561_v56, %v2393_v16  ;;  %v2448_v56 = vld [vmem:[#allocation2 + $0xe4] sm:$0xff] }
 0x2aa   : > { %v2056_v23 = vpop.f32.mrf.mxu1  ;;  %v2815_v30 = vpop.f32.mrf.mxu0 }
 0x2ab   : > { %v2140_v11 = vadd.f32 %v2056_v23, %v4312_v61  ;;  %v2901_v48 = vadd.f32 %v2815_v30, %v2647_v18  ;;  %v2700_v61 = vld [vmem:[#allocation2 + $0xd5] sm:$0xff] }
 0x2ac   : > { %v2726_v2 = vpack.c.bf16 %v2701_v19, %v2700_v61 }
 0x2ad   : > { %v2973_v8 = vadd.f32 %v2937_v43, %v2901_v48  ;;  %2095 = vmatmul.bf16.gmra.mxu1 %v2217_v39  ;;  %2603 = vmatmul.bf16.gmra.mxu3 %v2472_v13  ;;  %v2394_v44 = vadd.f32 %v2310_v17, %v2140_v11  ;;  %v2219_v39 = vpack.c.bf16 %v2195_v49, %v2194_v41  ;;  %v2939_v43 = vld [vmem:[%s4435_s18 + $0x3a] sm:$0xff]  ;;  %v2703_v41 = vld [vmem:[#allocation2 + $0xed] sm:$0xff] }
 0x2ae   : > { %v2473_v11 = vpack.c.bf16 %v2449_v15, %v2448_v56  ;;  %v2941_v15 = vld [vmem:[%s4435_s18 + $0x4a] sm:$0xff] }
 0x2af   : > { %v3009_v4 = vmax.f32 %v2973_v8, 0.0 }
 0x2b0   : > { %v2312_v7 = vpop.f32.mrf.mxu2  ;;  %v2564_v45 = vpop.f32.mrf.mxu3 }
 0x2b1   : > { %3045 = vst [vmem:[%s4444_s20 + $0x18] sm:$0xff] %v3009_v4  ;;  %v2648_v46 = vadd.f32 %v2564_v45, %v2394_v44  ;;  %v2702_v45 = vld [vmem:[#allocation2 + $0xe5] sm:$0xff] }
 0x2b2   : > { %v2058_v27 = vpop.f32.mrf.mxu1  ;;  %v2818_v25 = vpop.f32.mrf.mxu0  ;;  %v2727_v61 = vpack.c.bf16 %v2703_v41, %v2702_v45  ;;  %v2942_v41 = vld [vmem:[%s4435_s18 + $0x52] sm:$0xff] }
 0x2b3   : > { %v2141_v34 = vadd.f32 %v2058_v27, %v4315_v55  ;;  %v2902_v36 = vadd.f32 %v2818_v25, %v2648_v46  ;;  %v2940_v27 = vld [vmem:[%s4435_s18 + $0x42] sm:$0xff] }
 0x2b5   : > { %v2974_v37 = vadd.f32 %v2938_v38, %v2902_v36  ;;  %2354 = vmatmul.bf16.gmra.mxu2 %v2219_v39  ;;  %2857 = vmatmul.bf16.gmra.mxu0 %v2726_v2  ;;  %v2395_v0 = vadd.f32 %v2312_v7, %v2141_v34  ;;  %v2196_v7 = vld [vmem:[#allocation2 + $0xf3] sm:$0xff] }
 0x2b7   : > { %v3010_v51 = vmax.f32 %v2974_v37, 0.0 }
 0x2b8   : > { %v2315_v16 = vpop.f32.mrf.mxu2  ;;  %v2566_v17 = vpop.f32.mrf.mxu3 }
 0x2b9   : > { %3046 = vst [vmem:[%s4444_s20 + $0x20] sm:$0xff] %v3010_v51  ;;  %v2649_v18 = vadd.f32 %v2566_v17, %v2395_v0  ;;  %v2450_v0 = vld [vmem:[#allocation2 + $0xf4] sm:$0xff] }
 0x2ba   : > { %v2061_v23 = vpop.f32.mrf.mxu1  ;;  %v2820_v30 = vpop.f32.mrf.mxu0 }
 0x2bb   : > { %v2142_v55 = vadd.f32 %v2061_v23, %v4318_v31  ;;  %v2903_v60 = vadd.f32 %v2820_v30, %v2649_v18  ;;  %v2197_v31 = vld [vmem:[#allocation2 + $0xfb] sm:$0xff] }
 0x2bc   : > { %v2451_v18 = vld [vmem:[#allocation2 + $0xfc] sm:$0xff] }
 0x2bd   : > { %v2975_v48 = vadd.f32 %v2939_v43, %v2903_v60  ;;  %2100 = vmatmul.bf16.gmra.mxu1 %v2218_v5  ;;  %2608 = vmatmul.bf16.gmra.mxu3 %v2473_v11  ;;  %v2396_v8 = vadd.f32 %v2315_v16, %v2142_v55  ;;  %v2220_v5 = vpack.c.bf16 %v2197_v31, %v2196_v7 }
 0x2be   : > { %v2474_v30 = vpack.c.bf16 %v2451_v18, %v2450_v0  ;;  %v2943_v0 = vld [vmem:[%s4435_s18 + $0x5a] sm:$0xff] }
 0x2bf   : > { %v3011_v13 = vmax.f32 %v2975_v48, 0.0 }
 0x2c0   : > { %v2317_v4 = vpop.f32.mrf.mxu2  ;;  %v2569_v44 = vpop.f32.mrf.mxu3 }
 0x2c1   : > { %3047 = vst [vmem:[%s4444_s20 + $0x28] sm:$0xff] %v3011_v13  ;;  %v2650_v49 = vadd.f32 %v2569_v44, %v2396_v8  ;;  %v2198_v13 = vld [vmem:[#allocation2 + $0x103] sm:$0xff]  ;;  %v2199_v8 = vld [vmem:[#allocation2 + $0x10b] sm:$0xff] }
 0x2c2   : > { %v2063_v19 = vpop.f32.mrf.mxu1  ;;  %v2823_v46 = vpop.f32.mrf.mxu0 }
 0x2c3   : > { %v2143_v25 = vadd.f32 %v2063_v19, %v4330_v40  ;;  %v2904_v38 = vadd.f32 %v2823_v46, %v2650_v49 }
 0x2c5   : > { %v2976_v34 = vadd.f32 %v2940_v27, %v2904_v38  ;;  %2359 = vmatmul.bf16.gmra.mxu2 %v2220_v5  ;;  %2862 = vmatmul.bf16.gmra.mxu0 %v2727_v61  ;;  %v2397_v2 = vadd.f32 %v2317_v4, %v2143_v25  ;;  %v2704_v4 = vld [vmem:[#allocation2 + $0xf5] sm:$0xff] }
 0x2c7   : > { %v3012_v36 = vmax.f32 %v2976_v34, 0.0  ;;  %v2452_v34 = vld [vmem:[#allocation2 + $0x104] sm:$0xff] }
 0x2c8   : > { %v2320_v37 = vpop.f32.mrf.mxu2  ;;  %v2571_v51 = vpop.f32.mrf.mxu3 }
 0x2c9   : > { %3048 = vst [vmem:[%s4444_s20 + $0x30] sm:$0xff] %v3012_v36  ;;  %v2651_v16 = vadd.f32 %v2571_v51, %v2397_v2  ;;  %v2453_v36 = vld [vmem:[#allocation2 + $0x10c] sm:$0xff] }
 0x2ca   : > { %v2066_v17 = vpop.f32.mrf.mxu1  ;;  %v2825_v56 = vpop.f32.mrf.mxu0 }
 0x2cb   : > { %v2144_v40 = vadd.f32 %v2066_v17, %v4336_v21  ;;  %v2905_v23 = vadd.f32 %v2825_v56, %v2651_v16  ;;  %v2705_v21 = vld [vmem:[#allocation2 + $0xfd] sm:$0xff]  ;;  %v2475_v17 = vpack.c.bf16 %v2453_v36, %v2452_v34 }
 0x2cc   : > { %v2728_v46 = vpack.c.bf16 %v2705_v21, %v2704_v4 }
 0x2cd   : > { %v2977_v43 = vadd.f32 %v2941_v15, %v2905_v23  ;;  %2105 = vmatmul.bf16.gmra.mxu1 %v2219_v39  ;;  %2613 = vmatmul.bf16.gmra.mxu3 %v2474_v30  ;;  %v2398_v60 = vadd.f32 %v2320_v37, %v2144_v40  ;;  %v2221_v39 = vpack.c.bf16 %v2199_v8, %v2198_v13  ;;  %v2201_v30 = vld [vmem:[#allocation2 + $0x11b] sm:$0xff] }
 0x2ce   : > { %v2944_v13 = vld [vmem:[%s4435_s18 + $0x62] sm:$0xff] }
 0x2cf   : > { %v3013_v55 = vmax.f32 %v2977_v43, 0.0  ;;  %v2706_v43 = vld [vmem:[#allocation2 + $0x105] sm:$0xff] }
 0x2d0   : > { %v2322_v11 = vpop.f32.mrf.mxu2  ;;  %v2574_v48 = vpop.f32.mrf.mxu3 }
 0x2d1   : > { %3049 = vst [vmem:[%s4444_s20 + $0x38] sm:$0xff] %v3013_v55  ;;  %v2652_v44 = vadd.f32 %v2574_v48, %v2398_v60  ;;  %v2707_v55 = vld [vmem:[#allocation2 + $0x10d] sm:$0xff] }
 0x2d2   : > { %v2068_v7 = vpop.f32.mrf.mxu1  ;;  %v2828_v45 = vpop.f32.mrf.mxu0 }
 0x2d3   : > { %v2145_v49 = vadd.f32 %v2068_v7, %v4339_v12  ;;  %v2906_v19 = vadd.f32 %v2828_v45, %v2652_v44  ;;  %v2729_v44 = vpack.c.bf16 %v2707_v55, %v2706_v43 }
 0x2d5   : > { %v2978_v27 = vadd.f32 %v2942_v41, %v2906_v19  ;;  %2364 = vmatmul.bf16.gmra.mxu2 %v2221_v39  ;;  %2867 = vmatmul.bf16.gmra.mxu0 %v2728_v46  ;;  %v2399_v25 = vadd.f32 %v2322_v11, %v2145_v49  ;;  %v2455_v19 = vld [vmem:[#allocation2 + $0x11c] sm:$0xff] }
 0x2d7   : > { %v3014_v31 = vmax.f32 %v2978_v27, 0.0 }
 0x2d8   : > { %v2325_v38 = vpop.f32.mrf.mxu2  ;;  %v2576_v61 = vpop.f32.mrf.mxu3 }
 0x2d9   : > { %3050 = vst [vmem:[%s4444_s20 + $0x40] sm:$0xff] %v3014_v31  ;;  %v2653_v2 = vadd.f32 %v2576_v61, %v2399_v25  ;;  %v2945_v25 = vld [vmem:[%s4435_s18 + $0x6a] sm:$0xff] }
 0x2da   : > { %v2071_v37 = vpop.f32.mrf.mxu1  ;;  %v2830_v51 = vpop.f32.mrf.mxu0 }
 0x2db   : > { %v2146_v12 = vadd.f32 %v2071_v37, %v4342_v14  ;;  %v2907_v16 = vadd.f32 %v2830_v51, %v2653_v2  ;;  %v2200_v14 = vld [vmem:[#allocation2 + $0x113] sm:$0xff] }
 0x2dd   : > { %v2979_v56 = vadd.f32 %v2943_v0, %v2907_v16  ;;  %2110 = vmatmul.bf16.gmra.mxu1 %v2220_v5  ;;  %2618 = vmatmul.bf16.gmra.mxu3 %v2475_v17  ;;  %v2400_v18 = vadd.f32 %v2325_v38, %v2146_v12  ;;  %v2222_v5 = vpack.c.bf16 %v2201_v30, %v2200_v14  ;;  %v2454_v38 = vld [vmem:[#allocation2 + $0x114] sm:$0xff]  ;;  %v2203_v12 = vld [vmem:[#allocation2 + $0x12b] sm:$0xff]  ;;  %v2709_v16 = vld [vmem:[#allocation2 + $0x11d] sm:$0xff] }
 0x2de   : > { %v2476_v34 = vpack.c.bf16 %v2455_v19, %v2454_v38  ;;  %v2457_v14 = vld [vmem:[#allocation2 + $0x12c] sm:$0xff] }
 0x2df   : > { %v3015_v15 = vmax.f32 %v2979_v56, 0.0  ;;  %v2711_v38 = vld [vmem:[#allocation2 + $0x12d] sm:$0xff] }
 0x2e0   : > { %v2327_v40 = vpop.f32.mrf.mxu2  ;;  %v2579_v23 = vpop.f32.mrf.mxu3 }
 0x2e1   : > { %3051 = vst [vmem:[%s4444_s20 + $0x48] sm:$0xff] %v3015_v15  ;;  %v2654_v60 = vadd.f32 %v2579_v23, %v2400_v18  ;;  %v2946_v18 = vld [vmem:[%s4435_s18 + $0x72] sm:$0xff] }
 0x2e2   : > { %v2073_v11 = vpop.f32.mrf.mxu1  ;;  %v2833_v48 = vpop.f32.mrf.mxu0 }
 0x2e3   : > { %v2147_v8 = vadd.f32 %v2073_v11, %v4351_v32  ;;  %v2908_v4 = vadd.f32 %v2833_v48, %v2654_v60 }
 0x2e5   : > { %v2980_v7 = vadd.f32 %v2944_v13, %v2908_v4  ;;  %2369 = vmatmul.bf16.gmra.mxu2 %v2222_v5  ;;  %2872 = vmatmul.bf16.gmra.mxu0 %v2729_v44  ;;  %v2401_v41 = vadd.f32 %v2327_v40, %v2147_v8  ;;  %v2202_v40 = vld [vmem:[#allocation2 + $0x123] sm:$0xff] }
 0x2e7   : > { %v3016_v45 = vmax.f32 %v2980_v7, 0.0  ;;  %v2947_v7 = vld [vmem:[%s4435_s18 + $0x7a] sm:$0xff] }
 0x2e8   : > { %v2330_v21 = vpop.f32.mrf.mxu2  ;;  %v2581_v49 = vpop.f32.mrf.mxu3 }
 0x2e9   : > { %3052 = vst [vmem:[%s4444_s20 + $0x50] sm:$0xff] %v3016_v45  ;;  %v2655_v46 = vadd.f32 %v2581_v49, %v2401_v41  ;;  %v2456_v45 = vld [vmem:[#allocation2 + $0x124] sm:$0xff] }
 0x2ea   : > { %v2076_v27 = vpop.f32.mrf.mxu1  ;;  %v2835_v31 = vpop.f32.mrf.mxu0 }
 0x2eb   : > { %v2148_v32 = vadd.f32 %v2076_v27, %v4360_v1  ;;  %v2909_v61 = vadd.f32 %v2835_v31, %v2655_v46  ;;  %v2708_v1 = vld [vmem:[#allocation2 + $0x115] sm:$0xff] }
 0x2ec   : > { %v2730_v43 = vpack.c.bf16 %v2709_v16, %v2708_v1 }
 0x2ed   : > { %v2981_v36 = vadd.f32 %v2945_v25, %v2909_v61  ;;  %2115 = vmatmul.bf16.gmra.mxu1 %v2221_v39  ;;  %2623 = vmatmul.bf16.gmra.mxu3 %v2476_v34  ;;  %v2402_v37 = vadd.f32 %v2330_v21, %v2148_v32  ;;  %v2223_v39 = vpack.c.bf16 %v2203_v12, %v2202_v40  ;;  %v2204_v25 = vld [vmem:[#allocation2 + $0x133] sm:$0xff] }
 0x2ee   : > { %v2477_v21 = vpack.c.bf16 %v2457_v14, %v2456_v45 }
 0x2ef   : > { %v3017_v2 = vmax.f32 %v2981_v36, 0.0  ;;  %v2948_v36 = vld [vmem:[%s4435_s18 + $0x82] sm:$0xff] }
 0x2f0   : > { %v2332_v51 = vpop.f32.mrf.mxu2  ;;  %v2584_v0 = vpop.f32.mrf.mxu3 }
 0x2f1   : > { %3053 = vst [vmem:[%s4444_s20 + $0x58] sm:$0xff] %v3017_v2  ;;  %v2656_v17 = vadd.f32 %v2584_v0, %v2402_v37  ;;  %v2205_v2 = vld [vmem:[#allocation2 + $0x13b] sm:$0xff] }
 0x2f2   : > { %v2078_v56 = vpop.f32.mrf.mxu1  ;;  %v2838_v15 = vpop.f32.mrf.mxu0 }
 0x2f3   : > { %v2149_v23 = vadd.f32 %v2078_v56, %v4363_v50  ;;  %v2910_v30 = vadd.f32 %v2838_v15, %v2656_v17 }
 0x2f5   : > { %v2982_v55 = vadd.f32 %v2946_v18, %v2910_v30  ;;  %2374 = vmatmul.bf16.gmra.mxu2 %v2223_v39  ;;  %2877 = vmatmul.bf16.gmra.mxu0 %v2730_v43  ;;  %v2403_v11 = vadd.f32 %v2332_v51, %v2149_v23  ;;  %v2458_v18 = vld [vmem:[#allocation2 + $0x134] sm:$0xff]  ;;  %v2949_v30 = vld [vmem:[%s4435_s18 + $0x8a] sm:$0xff]  ;;  %v2459_v43 = vld [vmem:[#allocation2 + $0x13c] sm:$0xff] }
 0x2f7   : > { %v3018_v60 = vmax.f32 %v2982_v55, 0.0 }
 0x2f8   : > { %v2335_v48 = vpop.f32.mrf.mxu2  ;;  %v2586_v13 = vpop.f32.mrf.mxu3 }
 0x2f9   : > { %3054 = vst [vmem:[%s4444_s20 + $0x60] sm:$0xff] %v3018_v60  ;;  %v2657_v8 = vadd.f32 %v2586_v13, %v2403_v11  ;;  %v2478_v60 = vpack.c.bf16 %v2459_v43, %v2458_v18  ;;  %v2207_v13 = vld [vmem:[#allocation2 + $0x14b] sm:$0xff] }
 0x2fa   : > { %v2081_v4 = vpop.f32.mrf.mxu1  ;;  %v2840_v44 = vpop.f32.mrf.mxu0 }
 0x2fb   : > { %v2150_v50 = vadd.f32 %v2081_v4, %v4366_v58  ;;  %v2911_v41 = vadd.f32 %v2840_v44, %v2657_v8  ;;  %v2710_v58 = vld [vmem:[#allocation2 + $0x125] sm:$0xff] }
 0x2fc   : > { %v2731_v0 = vpack.c.bf16 %v2711_v38, %v2710_v58 }
 0x2fd   : > { %v2983_v49 = vadd.f32 %v2947_v7, %v2911_v41  ;;  %2120 = vmatmul.bf16.gmra.mxu1 %v2222_v5  ;;  %2628 = vmatmul.bf16.gmra.mxu3 %v2477_v21  ;;  %v2404_v46 = vadd.f32 %v2335_v48, %v2150_v50  ;;  %v2224_v5 = vpack.c.bf16 %v2205_v2, %v2204_v25  ;;  %v2206_v48 = vld [vmem:[#allocation2 + $0x143] sm:$0xff]  ;;  %v2712_v7 = vld [vmem:[#allocation2 + $0x135] sm:$0xff]  ;;  %v2461_v25 = vld [vmem:[#allocation2 + $0x14c] sm:$0xff] }
 0x2fe   : > { %v2225_v50 = vpack.c.bf16 %v2207_v13, %v2206_v48 }
 0x2ff   : > { %v3019_v19 = vmax.f32 %v2983_v49, 0.0  ;;  %v2713_v49 = vld [vmem:[#allocation2 + $0x13d] sm:$0xff] }
 0x300   : > { %v2337_v27 = vpop.f32.mrf.mxu2  ;;  %v2589_v31 = vpop.f32.mrf.mxu3 }
 0x301   : > { %3055 = vst [vmem:[%s4444_s20 + $0x68] sm:$0xff] %v3019_v19  ;;  %v2658_v32 = vadd.f32 %v2589_v31, %v2404_v46  ;;  %v2460_v31 = vld [vmem:[#allocation2 + $0x144] sm:$0xff] }
 0x302   : > { %v2083_v61 = vpop.f32.mrf.mxu1  ;;  %v2843_v34 = vpop.f32.mrf.mxu0  ;;  %v2479_v2 = vpack.c.bf16 %v2461_v25, %v2460_v31 }
 0x303   : > { %v2151_v37 = vadd.f32 %v2083_v61, %v4369_v42  ;;  %v2912_v51 = vadd.f32 %v2843_v34, %v2658_v32 }
 0x305   : > { %v2984_v12 = vadd.f32 %v2948_v36, %v2912_v51  ;;  %2379 = vmatmul.bf16.gmra.mxu2 %v2224_v5  ;;  %2882 = vmatmul.bf16.gmra.mxu0 %v2731_v0  ;;  %v2405_v17 = vadd.f32 %v2337_v27, %v2151_v37  ;;  %v2951_v51 = vld [vmem:[%s4435_s18 + $0x9a] sm:$0xff] }
 0x307   : > { %v3020_v16 = vmax.f32 %v2984_v12, 0.0 }
 0x308   : > { %v2340_v56 = vpop.f32.mrf.mxu2  ;;  %v2591_v15 = vpop.f32.mrf.mxu3 }
 0x309   : > { %3056 = vst [vmem:[%s4444_s20 + $0x70] sm:$0xff] %v3020_v16  ;;  %v2659_v40 = vadd.f32 %v2591_v15, %v2405_v17  ;;  %v2714_v16 = vld [vmem:[#allocation2 + $0x145] sm:$0xff]  ;;  %v2715_v17 = vld [vmem:[#allocation2 + $0x14d] sm:$0xff] }
 0x30a   : > { %v2086_v1 = vpop.f32.mrf.mxu1  ;;  %v2845_v23 = vpop.f32.mrf.mxu0 }
 0x30b   : > { %v2152_v42 = vadd.f32 %v2086_v1, %v4372_v24  ;;  %v2913_v55 = vadd.f32 %v2845_v23, %v2659_v40  ;;  %v2950_v24 = vld [vmem:[%s4435_s18 + $0x92] sm:$0xff]  ;;  %v2733_v23 = vpack.c.bf16 %v2715_v17, %v2714_v16 }
 0x30d   : > { %v2985_v11 = vadd.f32 %v2949_v30, %v2913_v55  ;;  %2125 = vmatmul.bf16.gmra.mxu1 %v2223_v39  ;;  %2633 = vmatmul.bf16.gmra.mxu3 %v2478_v60  ;;  %v2406_v8 = vadd.f32 %v2340_v56, %v2152_v42  ;;  %v2732_v39 = vpack.c.bf16 %v2713_v49, %v2712_v7  ;;  %v2952_v42 = vld [vmem:[%s4435_s18 + $0xa2] sm:$0xff] }
 0x30f   : > { %v3021_v14 = vmax.f32 %v2985_v11, 0.0 }
 0x310   : > { %v2342_v4 = vpop.f32.mrf.mxu2  ;;  %v2594_v44 = vpop.f32.mrf.mxu3 }
 0x311   : > { %3057 = vst [vmem:[%s4444_s20 + $0x78] sm:$0xff] %v3021_v14  ;;  %v2660_v45 = vadd.f32 %v2594_v44, %v2406_v8  ;;  %v2953_v44 = vld [vmem:[%s4435_s18 + $0xaa] sm:$0xff] }
 0x312   : > { %v2088_v41 = vpop.f32.mrf.mxu1  ;;  %v2848_v21 = vpop.f32.mrf.mxu0 }
 0x313   : > { %v2153_v19 = vadd.f32 %v2088_v41, %v4375_v35  ;;  %v2914_v46 = vadd.f32 %v2848_v21, %v2660_v45 }
 0x315   : > { %v2986_v27 = vadd.f32 %v2950_v24, %v2914_v46  ;;  %2384 = vmatmul.bf16.gmra.mxu2 %v2225_v50  ;;  %2887 = vmatmul.bf16.gmra.mxu0 %v2732_v39  ;;  %v2407_v32 = vadd.f32 %v2342_v4, %v2153_v19  ;;  %v2954_v39 = vld [vmem:[%s4435_s18 + $0xb2] sm:$0xff] }
 0x317   : > { %v3022_v38 = vmax.f32 %v2986_v27, 0.0 }
 0x318   : > { %v2345_v61 = vpop.f32.mrf.mxu2  ;;  %v2596_v34 = vpop.f32.mrf.mxu3 }
 0x319   : > { %3058 = vst [vmem:[%s4444_s20 + $0x80] sm:$0xff] %v3022_v38  ;;  %v2661_v36 = vadd.f32 %v2596_v34, %v2407_v32 }
 0x31a   : > { %v2091_v58 = vpop.f32.mrf.mxu1  ;;  %v2850_v37 = vpop.f32.mrf.mxu0 }
 0x31b   : > { %v2154_v35 = vadd.f32 %v2091_v58, %v4378_v33  ;;  %v2915_v0 = vadd.f32 %v2850_v37, %v2661_v36  ;;  %v2955_v58 = vld [vmem:[%s4435_s18 + $0xba] sm:$0xff] }
 0x31d   : > { %v2987_v12 = vadd.f32 %v2951_v51, %v2915_v0  ;;  %2130 = vmatmul.bf16.gmra.mxu1 %v2224_v5  ;;  %2638 = vmatmul.bf16.gmra.mxu3 %v2479_v2  ;;  %v2408_v15 = vadd.f32 %v2345_v61, %v2154_v35 }
 0x31f   : > { %v3023_v56 = vmax.f32 %v2987_v12, 0.0 }
 0x320   : > { %v2347_v18 = vpop.f32.mrf.mxu2  ;;  %v2599_v40 = vpop.f32.mrf.mxu3 }
 0x321   : > { %3059 = vst [vmem:[%s4444_s20 + $0x88] sm:$0xff] %v3023_v56  ;;  %v2662_v1 = vadd.f32 %v2599_v40, %v2408_v15 }
 0x322   : > { %v2093_v30 = vpop.f32.mrf.mxu1  ;;  %v2853_v43 = vpop.f32.mrf.mxu0 }
 0x323   : > { %v2155_v33 = vadd.f32 %v2093_v30, %v4381_v9  ;;  %v2916_v55 = vadd.f32 %v2853_v43, %v2662_v1 }
 0x325   : > { %v2988_v60 = vadd.f32 %v2952_v42, %v2916_v55  ;;  %2892 = vmatmul.bf16.gmra.mxu0 %v2733_v23  ;;  %v2409_v11 = vadd.f32 %v2347_v18, %v2155_v33  ;;  %v2956_v18 = vld [vmem:[%s4435_s18 + $0xc2] sm:$0xff] }
 0x327   : > { %v3024_v5 = vmax.f32 %v2988_v60, 0.0 }
 0x328   : > { %v2350_v48 = vpop.f32.mrf.mxu2  ;;  %v2601_v13 = vpop.f32.mrf.mxu3 }
 0x329   : > { %3060 = vst [vmem:[%s4444_s20 + $0x90] sm:$0xff] %v3024_v5  ;;  %v2663_v14 = vadd.f32 %v2601_v13, %v2409_v11  ;;  %v2957_v5 = vld [vmem:[%s4435_s18 + $0xca] sm:$0xff] }
 0x32a   : > { %v2096_v8 = vpop.f32.mrf.mxu1  ;;  %v2855_v4 = vpop.f32.mrf.mxu0 }
 0x32b   : > { %v2156_v7 = vadd.f32 %v2096_v8, %v4384_v54  ;;  %v2917_v45 = vadd.f32 %v2855_v4, %v2663_v14 }
 0x32d   : > { %v2989_v50 = vadd.f32 %v2953_v44, %v2917_v45  ;;  %v2410_v9 = vadd.f32 %v2350_v48, %v2156_v7 }
 0x32f   : > { %v3025_v41 = vmax.f32 %v2989_v50, 0.0  ;;  %v2958_v50 = vld [vmem:[%s4435_s18 + $0xd2] sm:$0xff] }
 0x330   : > { %v2352_v21 = vpop.f32.mrf.mxu2  ;;  %v2604_v24 = vpop.f32.mrf.mxu3 }
 0x331   : > { %3061 = vst [vmem:[%s4444_s20 + $0x98] sm:$0xff] %v3025_v41  ;;  %v2664_v49 = vadd.f32 %v2604_v24, %v2410_v9 }
 0x332   : > { %v2098_v19 = vpop.f32.mrf.mxu1  ;;  %v2858_v46 = vpop.f32.mrf.mxu0 }
 0x333   : > { %v2157_v27 = vadd.f32 %v2098_v19, %v4387_v28  ;;  %v2918_v31 = vadd.f32 %v2858_v46, %v2664_v49 }
 0x335   : > { %v2990_v25 = vadd.f32 %v2954_v39, %v2918_v31  ;;  %v2411_v54 = vadd.f32 %v2352_v21, %v2157_v27  ;;  %v2959_v31 = vld [vmem:[%s4435_s18 + $0xda] sm:$0xff] }
 0x337   : > { %v3026_v38 = vmax.f32 %v2990_v25, 0.0 }
 0x338   : > { %v2355_v32 = vpop.f32.mrf.mxu2  ;;  %v2606_v61 = vpop.f32.mrf.mxu3 }
 0x339   : > { %3062 = vst [vmem:[%s4444_s20 + $0xa0] sm:$0xff] %v3026_v38  ;;  %v2665_v34 = vadd.f32 %v2606_v61, %v2411_v54 }
 0x33a   : > { %v2101_v36 = vpop.f32.mrf.mxu1  ;;  %v2860_v2 = vpop.f32.mrf.mxu0 }
 0x33b   : > { %v2158_v37 = vadd.f32 %v2101_v36, %v4390_v26  ;;  %v2919_v51 = vadd.f32 %v2860_v2, %v2665_v34 }
 0x33d   : > { %v2991_v35 = vadd.f32 %v2955_v58, %v2919_v51  ;;  %v2412_v28 = vadd.f32 %v2355_v32, %v2158_v37  ;;  %v2960_v37 = vld [vmem:[%s4435_s18 + $0xe2] sm:$0xff] }
 0x33f   : > { %v3027_v0 = vmax.f32 %v2991_v35, 0.0 }
 0x340   : > { %v2357_v12 = vpop.f32.mrf.mxu2  ;;  %v2609_v16 = vpop.f32.mrf.mxu3 }
 0x341   : > { %3063 = vst [vmem:[%s4444_s20 + $0xa8] sm:$0xff] %v3027_v0  ;;  %v2666_v17 = vadd.f32 %v2609_v16, %v2412_v28 }
 0x342   : > { %v2103_v56 = vpop.f32.mrf.mxu1  ;;  %v2863_v15 = vpop.f32.mrf.mxu0 }
 0x343   : > { %v2159_v40 = vadd.f32 %v2103_v56, %v4393_v53  ;;  %v2920_v1 = vadd.f32 %v2863_v15, %v2666_v17 }
 0x345   : > { %v2992_v23 = vadd.f32 %v2956_v18, %v2920_v1  ;;  %v2413_v26 = vadd.f32 %v2357_v12, %v2159_v40  ;;  %v2961_v18 = vld [vmem:[%s4435_s18 + $0xea] sm:$0xff] }
 0x347   : > { %v3028_v30 = vmax.f32 %v2992_v23, 0.0 }
 0x348   : > { %v2360_v43 = vpop.f32.mrf.mxu2  ;;  %v2611_v42 = vpop.f32.mrf.mxu3 }
 0x349   : > { %3064 = vst [vmem:[%s4444_s20 + $0xb0] sm:$0xff] %v3028_v30  ;;  %v2667_v33 = vadd.f32 %v2611_v42, %v2413_v26 }
 0x34a   : > { %v2106_v55 = vpop.f32.mrf.mxu1  ;;  %v2865_v60 = vpop.f32.mrf.mxu0 }
 0x34b   : > { %v2160_v11 = vadd.f32 %v2106_v55, %v4396_v6  ;;  %v2921_v48 = vadd.f32 %v2865_v60, %v2667_v33  ;;  %v2962_v60 = vld [vmem:[%s4435_s18 + $0xf2] sm:$0xff] }
 0x34d   : > { %v2993_v13 = vadd.f32 %v2957_v5, %v2921_v48  ;;  %v2414_v53 = vadd.f32 %v2360_v43, %v2160_v11 }
 0x34f   : > { %v3029_v14 = vmax.f32 %v2993_v13, 0.0 }
 0x350   : > { %v2362_v8 = vpop.f32.mrf.mxu2  ;;  %v2614_v4 = vpop.f32.mrf.mxu3 }
 0x351   : > { %3065 = vst [vmem:[%s4444_s20 + $0xb8] sm:$0xff] %v3029_v14  ;;  %v2668_v44 = vadd.f32 %v2614_v4, %v2414_v53 }
 0x352   : > { %v2108_v7 = vpop.f32.mrf.mxu1  ;;  %v2868_v45 = vpop.f32.mrf.mxu0 }
 0x353   : > { %v2161_v41 = vadd.f32 %v2108_v7, %v4399_v10  ;;  %v2922_v9 = vadd.f32 %v2868_v45, %v2668_v44  ;;  %v2963_v7 = vld [vmem:[%s4435_s18 + $0xfa] sm:$0xff] }
 0x355   : > { %v2994_v21 = vadd.f32 %v2958_v50, %v2922_v9  ;;  %v2415_v6 = vadd.f32 %v2362_v8, %v2161_v41 }
 0x357   : > { %v3030_v24 = vmax.f32 %v2994_v21, 0.0 }
 0x358   : > { %v2365_v49 = vpop.f32.mrf.mxu2  ;;  %v2616_v19 = vpop.f32.mrf.mxu3 }
 0x359   : > { %3066 = vst [vmem:[%s4444_s20 + $0xc0] sm:$0xff] %v3030_v24  ;;  %v2669_v46 = vadd.f32 %v2616_v19, %v2415_v6 }
 0x35a   : > { %v2111_v39 = vpop.f32.mrf.mxu1  ;;  %v2870_v27 = vpop.f32.mrf.mxu0 }
 0x35b   : > { %v2162_v25 = vadd.f32 %v2111_v39, %v4402_v47  ;;  %v2923_v38 = vadd.f32 %v2870_v27, %v2669_v46  ;;  %v2964_v46 = vld [vmem:[%s4435_s18 + $0x102] sm:$0xff] }
 0x35d   : > { %v2995_v54 = vadd.f32 %v2959_v31, %v2923_v38  ;;  %v2416_v10 = vadd.f32 %v2365_v49, %v2162_v25 }
 0x35f   : > { %v3031_v32 = vmax.f32 %v2995_v54, 0.0 }
 0x360   : > { %v2367_v61 = vpop.f32.mrf.mxu2  ;;  %v2619_v34 = vpop.f32.mrf.mxu3 }
 0x361   : > { %3067 = vst [vmem:[%s4444_s20 + $0xc8] sm:$0xff] %v3031_v32  ;;  %v2670_v36 = vadd.f32 %v2619_v34, %v2416_v10  ;;  %v2965_v34 = vld [vmem:[%s4435_s18 + $0x10a] sm:$0xff] }
 0x362   : > { %v2113_v2 = vpop.f32.mrf.mxu1  ;;  %v2873_v58 = vpop.f32.mrf.mxu0 }
 0x363   : > { %v2163_v51 = vadd.f32 %v2113_v2, %v4405_v59  ;;  %v2924_v35 = vadd.f32 %v2873_v58, %v2670_v36 }
 0x365   : > { %v2996_v0 = vadd.f32 %v2960_v37, %v2924_v35  ;;  %v2417_v47 = vadd.f32 %v2367_v61, %v2163_v51 }
 0x367   : > { %v3032_v28 = vmax.f32 %v2996_v0, 0.0 }
 0x368   : > { %v2370_v12 = vpop.f32.mrf.mxu2  ;;  %v2621_v16 = vpop.f32.mrf.mxu3 }
 0x369   : > { %3068 = vst [vmem:[%s4444_s20 + $0xd0] sm:$0xff] %v3032_v28  ;;  %v2671_v17 = vadd.f32 %v2621_v16, %v2417_v47 }
 0x36a   : > { %v2116_v56 = vpop.f32.mrf.mxu1  ;;  %v2875_v15 = vpop.f32.mrf.mxu0 }
 0x36b   : > { %v2164_v40 = vadd.f32 %v2116_v56, %v4408_v3  ;;  %v2925_v1 = vadd.f32 %v2875_v15, %v2671_v17 }
 0x36d   : > { %v2997_v23 = vadd.f32 %v2961_v18, %v2925_v1  ;;  %v2418_v59 = vadd.f32 %v2370_v12, %v2164_v40  ;;  %v2966_v12 = vld [vmem:[%s4435_s18 + $0x112] sm:$0xff] }
 0x36f   : > { %v3033_v30 = vmax.f32 %v2997_v23, 0.0 }
 0x370   : > { %v2372_v26 = vpop.f32.mrf.mxu2  ;;  %v2624_v43 = vpop.f32.mrf.mxu3 }
 0x371   : > { %3069 = vst [vmem:[%s4444_s20 + $0xd8] sm:$0xff] %v3033_v30  ;;  %v2672_v42 = vadd.f32 %v2624_v43, %v2418_v59  ;;  %v2967_v30 = vld [vmem:[%s4435_s18 + $0x11a] sm:$0xff] }
 0x372   : > { %v2118_v33 = vpop.f32.mrf.mxu1  ;;  %v2878_v55 = vpop.f32.mrf.mxu0 }
 0x373   : > { %v2165_v5 = vadd.f32 %v2118_v33, %v4411_v22  ;;  %v2926_v11 = vadd.f32 %v2878_v55, %v2672_v42 }
 0x375   : > { %v2998_v48 = vadd.f32 %v2962_v60, %v2926_v11  ;;  %v2419_v3 = vadd.f32 %v2372_v26, %v2165_v5 }
 0x377   : > { %v3034_v13 = vmax.f32 %v2998_v48, 0.0  ;;  %v2968_v48 = vld [vmem:[%s4435_s18 + $0x122] sm:$0xff] }
 0x378   : > { %v2375_v14 = vpop.f32.mrf.mxu2  ;;  %v2626_v53 = vpop.f32.mrf.mxu3 }
 0x379   : > { %3070 = vst [vmem:[%s4444_s20 + $0xe0] sm:$0xff] %v3034_v13  ;;  %v2673_v8 = vadd.f32 %v2626_v53, %v2419_v3 }
 0x37a   : > { %v2121_v4 = vpop.f32.mrf.mxu1  ;;  %v2880_v44 = vpop.f32.mrf.mxu0 }
 0x37b   : > { %v2166_v45 = vadd.f32 %v2121_v4, %v4414_v57  ;;  %v2927_v50 = vadd.f32 %v2880_v44, %v2673_v8 }
 0x37d   : > { %v2999_v41 = vadd.f32 %v2963_v7, %v2927_v50  ;;  %v2420_v22 = vadd.f32 %v2375_v14, %v2166_v45  ;;  %v2969_v45 = vld [vmem:[%s4435_s18 + $0x12a] sm:$0xff] }
 0x37f   : > { %v3035_v9 = vmax.f32 %v2999_v41, 0.0 }
 0x380   : > { %v2377_v21 = vpop.f32.mrf.mxu2  ;;  %v2629_v24 = vpop.f32.mrf.mxu3 }
 0x381   : > { %3071 = vst [vmem:[%s4444_s20 + $0xe8] sm:$0xff] %v3035_v9  ;;  %v2674_v6 = vadd.f32 %v2629_v24, %v2420_v22 }
 0x382   : > { %v2123_v49 = vpop.f32.mrf.mxu1  ;;  %v2883_v19 = vpop.f32.mrf.mxu0 }
 0x383   : > { %v2167_v39 = vadd.f32 %v2123_v49, %v4417_v20  ;;  %v2928_v27 = vadd.f32 %v2883_v19, %v2674_v6 }
 0x385   : > { %v3000_v31 = vadd.f32 %v2964_v46, %v2928_v27  ;;  %v2421_v57 = vadd.f32 %v2377_v21, %v2167_v39 }
 0x387   : > { %v3036_v25 = vmax.f32 %v3000_v31, 0.0 }
 0x388   : > { %v2380_v38 = vpop.f32.mrf.mxu2  ;;  %v2631_v54 = vpop.f32.mrf.mxu3 }
 0x389   : > { %3072 = vst [vmem:[%s4444_s20 + $0xf0] sm:$0xff] %v3036_v25  ;;  %v2675_v32 = vadd.f32 %v2631_v54, %v2421_v57 }
 0x38a   : > { %v2126_v10 = vpop.f32.mrf.mxu1  ;;  %v2885_v61 = vpop.f32.mrf.mxu0 }
 0x38b   : > { %v2168_v36 = vadd.f32 %v2126_v10, %v4420_v52  ;;  %v2929_v2 = vadd.f32 %v2885_v61, %v2675_v32 }
 0x38d   : > { %v3001_v58 = vadd.f32 %v2965_v34, %v2929_v2  ;;  %v2422_v20 = vadd.f32 %v2380_v38, %v2168_v36 }
 0x38f   : > { %v3037_v37 = vmax.f32 %v3001_v58, 0.0 }
 0x390   : > { %v2634_v51 = vpop.f32.mrf.mxu3  ;;  %v2382_v35 = vpop.f32.mrf.mxu2 }
 0x391   : > { %3073 = vst [vmem:[%s4444_s20 + $0xf8] sm:$0xff] %v3037_v37  ;;  %v2676_v0 = vadd.f32 %v2634_v51, %v2422_v20 }
 0x392   : > { %v2128_v28 = vpop.f32.mrf.mxu1  ;;  %v2888_v47 = vpop.f32.mrf.mxu0 }
 0x393   : > { %v2169_v16 = vadd.f32 %v2128_v28, %v4423_v62  ;;  %v2930_v17 = vadd.f32 %v2888_v47, %v2676_v0 }
 0x395   : > { %v3002_v56 = vadd.f32 %v2966_v12, %v2930_v17  ;;  %v2423_v52 = vadd.f32 %v2382_v35, %v2169_v16 }
 0x397   : > { %v3038_v15 = vmax.f32 %v3002_v56, 0.0 }
 0x398   : > { %v2636_v18 = vpop.f32.mrf.mxu3  ;;  %v2385_v43 = vpop.f32.mrf.mxu2 }
 0x399   : > { %3074 = vst [vmem:[%s4444_s20 + $0x100] sm:$0xff] %v3038_v15  ;;  %v2677_v40 = vadd.f32 %v2636_v18, %v2423_v52 }
 0x39a   : > { %v2131_v1 = vpop.f32.mrf.mxu1  ;;  %v2890_v23 = vpop.f32.mrf.mxu0 }
 0x39b   : > { %v2170_v59 = vadd.f32 %v2131_v1, %v4426_v63  ;;  %v2931_v26 = vadd.f32 %v2890_v23, %v2677_v40 }
 0x39d   : > { %v3003_v42 = vadd.f32 %v2967_v30, %v2931_v26  ;;  %v2424_v62 = vadd.f32 %v2385_v43, %v2170_v59 }
 0x39f   : > { %v3039_v33 = vmax.f32 %v3003_v42, 0.0 }
 0x3a0   : > { %v2639_v55 = vpop.f32.mrf.mxu3  ;;  %v2387_v53 = vpop.f32.mrf.mxu2 }
 0x3a1   : > { %3075 = vst [vmem:[%s4444_s20 + $0x108] sm:$0xff] %v3039_v33  ;;  %v2678_v60 = vadd.f32 %v2639_v55, %v2424_v62 }
 0x3a2   : > { %v2133_v5 = vpop.f32.mrf.mxu1  ;;  %v2893_v11 = vpop.f32.mrf.mxu0 }
 0x3a3   : > { %v2171_v13 = vadd.f32 %v2133_v5, %v4428_v29  ;;  %v2932_v3 = vadd.f32 %v2893_v11, %v2678_v60 }
 0x3a5   : > { %v3004_v14 = vadd.f32 %v2968_v48, %v2932_v3  ;;  %v2425_v8 = vadd.f32 %v2387_v53, %v2171_v13 }
 0x3a7   : > { %v3040_v63 = vmax.f32 %v3004_v14, 0.0 }
 0x3a8   : > { %v2641_v4 = vpop.f32.mrf.mxu3 }
 0x3a9   : > { %3076 = vst [vmem:[%s4444_s20 + $0x110] sm:$0xff] %v3040_v63  ;;  %v2679_v44 = vadd.f32 %v2641_v4, %v2425_v8 }
 0x3aa   : > { %v2895_v7 = vpop.f32.mrf.mxu0 }
 0x3ab   : > { %v2933_v50 = vadd.f32 %v2895_v7, %v2679_v44 }
 0x3ad   : > { %v3005_v41 = vadd.f32 %v2969_v45, %v2933_v50 }
 0x3af   : > { %v3041_v9 = vmax.f32 %v3005_v41, 0.0 }
 0x3b1   : > { %3077 = vst [vmem:[%s4444_s20 + $0x118] sm:$0xff] %v3041_v9 }
 0x3b2 PF: > { %s16_s21 = sadd.s32 1, %s3690_s21  }
 0x3b3   : > { %p13_p4 = scmp.ge.s32.totalorder %s16_s21, 4  }
 0x3b5   :  { %15 = sbr.rel (!%p13_p4) target bundleno = 1 (0x1), region = 85 }

</bundles_post_ra>
